<compile_context>
chip_gen: v7x
topology: tpu7x:2x2x1
jax: 0.10.0
libtpu: 0.0.40
codegen_flags: <defaults>
</compile_context>

<pallas_src>
import functools

import jax
import jax.numpy as jnp
from jax.experimental import pallas as pl
from jax.experimental.pallas import tpu as pltpu


# ---------------------------------------------------------------------------
# The fused kernel
# ---------------------------------------------------------------------------
def _net_kernel(x_ref, w1_ref, b1_ref, w2_ref, b2_ref,
                wf1_ref, bf1_ref, wf2_ref, bf2_ref,
                wf3_ref, bf3_ref, wf4_ref, bf4_ref,
                o_ref, *, batch, bpad, l1, l2):
    f32, bf16 = jnp.float32, jnp.bfloat16
    B, Bp = batch, bpad
    r1 = l1 * Bp                      # conv1 output rows (51 * Bp)
    r2 = l2 * Bp                      # conv2 output rows (49 * Bp)

    # ---- conv1 (Cin=1, k=3) + ReLU: three shifted VPU FMAs ----------------
    # x_ref[(l)*Bp + b, 0] == x[b, 0, l]; each tap is an 8-aligned row slice.
    h1 = b1_ref[...].astype(f32)                            # (1, 64) -> broadcast
    for t in range(3):
        h1 = h1 + x_ref[t * Bp:t * Bp + r1, :] * w1_ref[t:t + 1, :]   # (r1,1)*(1,64)
    h1 = jnp.maximum(h1, 0.0).astype(bf16)                  # (r1, 64)

    # ---- conv2 (64 -> 128, k=3) + ReLU: three MXU matmuls -----------------
    z2 = b2_ref[...].astype(f32)                            # (1, 128)
    for t in range(3):
        z2 = z2 + jnp.dot(h1[t * Bp:t * Bp + r2, :], w2_ref[t],
                          preferred_element_type=f32)       # (r2, 128)
    z2 = jnp.maximum(z2, 0.0).astype(bf16)                  # (r2, 128)

    # ---- flatten + fc1 (49*128 -> 184) + ReLU ------------------------------
    # torch's x.view(B, -1) flatten is folded into the host-side weight
    # permutation; accumulate over the 49 output positions with 8-aligned
    # activation slabs and 128-row weight slabs (no in-kernel reshape).
    acc = bf1_ref[...].astype(f32)                          # (1, 184)
    for l in range(l2):
        lhs = z2[l * Bp:(l + 1) * Bp, :]                    # (Bp, 128) bf16
        rhs = wf1_ref[l * 128:(l + 1) * 128, :]             # (128, 184) bf16
        acc = acc + jnp.dot(lhs, rhs, preferred_element_type=f32)
    h3 = jnp.maximum(acc, 0.0)                              # (Bp, 184)

    # ---- fc2 (184 -> 80) + ReLU -------------------------------------------
    h4 = jnp.maximum(
        jnp.dot(h3.astype(bf16), wf2_ref[...], preferred_element_type=f32)
        + bf2_ref[...], 0.0)                                # (Bp, 80)

    # ---- fc3 (80 -> 10) + ReLU --------------------------------------------
    h5 = jnp.maximum(
        jnp.dot(h4.astype(bf16), wf3_ref[...], preferred_element_type=f32)
        + bf3_ref[...], 0.0)                                # (Bp, 10)

    # ---- fc4 (10 -> 1): VPU multiply + cross-lane reduce --------------------
    out = jnp.sum(h5 * wf4_ref[...], axis=-1, keepdims=True) + bf4_ref[...]
    o_ref[...] = out[:B].astype(o_ref.dtype)                # (B, 1)


# ---------------------------------------------------------------------------
# Wrapper: one pallas_call, whole arrays as single VMEM-resident blocks
# ---------------------------------------------------------------------------
def net_forward(params, x):
    """x: (B, 1, 53) f32 -> (B, 1) f32. `params` = prepare_params(...) output."""
    B = x.shape[0]
    L = x.shape[-1]
    l1, l2 = L - 2, L - 4
    assert l2 * 128 == params["wf1"].shape[0], "input length must match fc1 (49*128)"

    # Pad batch to a sublane multiple so every in-kernel row slice is aligned.
    Bp = ((B + 7) // 8) * 8

    # Interleave (padded) batch into the row dim: x2[l*Bp + b, 0] = x[b, 0, l].
    # Tiny one-off relayout (4*Bp*53 bytes); every conv tap becomes a
    # contiguous, 8-aligned row slice inside the kernel.
    xb = x.reshape(B, L)
    if Bp != B:
        xb = jnp.pad(xb, ((0, Bp - B), (0, 0)))
    x2 = xb.T.reshape(L * Bp, 1)

    args = (x2,
            params["w1"], params["b1"], params["w2"], params["b2"],
            params["wf1"], params["bf1"], params["wf2"], params["bf2"],
            params["wf3"], params["bf3"], params["wf4"], params["bf4"])

    def full_spec(a):
        if a.ndim == 3:
            return pl.BlockSpec(a.shape, lambda i: (0, 0, 0))
        return pl.BlockSpec(a.shape, lambda i: (0, 0))

    return pl.pallas_call(
        functools.partial(_net_kernel, batch=B, bpad=Bp, l1=l1, l2=l2),
        out_shape=jax.ShapeDtypeStruct((B, 1), jnp.float32),
        grid=(1,),
        in_specs=[full_spec(a) for a in args],
        out_specs=pl.BlockSpec((B, 1), lambda i: (0, 0)),
        compiler_params=pltpu.CompilerParams(
            dimension_semantics=("arbitrary",)),
    )(*args)


# ---------------------------------------------------------------------------
# Parameters: synthetic PyTorch-layout init + one-time kernel-layout prep
# ---------------------------------------------------------------------------
def init_params(key):
    ks = jax.random.split(key, 12)

    def w(k, shape, fan_in):
        return jax.random.normal(k, shape, jnp.float32) / jnp.sqrt(fan_in)

    return {
        "conv1_w": w(ks[0], (64, 1, 3), 1 * 3),
        "conv1_b": w(ks[1], (64,), 1 * 3),
        "conv2_w": w(ks[2], (128, 64, 3), 64 * 3),
        "conv2_b": w(ks[3], (128,), 64 * 3),
        "fc1_w": w(ks[4], (184, 49 * 128), 49 * 128),
        "fc1_b": w(ks[5], (184,), 49 * 128),
        "fc2_w": w(ks[6], (80, 184), 184),
        "fc2_b": w(ks[7], (80,), 184),
        "fc3_w": w(ks[8], (10, 80), 80),
        "fc3_b": w(ks[9], (10,), 80),
        "fc4_w": w(ks[10], (1, 10), 10),
        "fc4_b": w(ks[11], (1,), 10),
    }


def prepare_params(p):
    """One-time host-side re-layout of PyTorch-layout params into kernel layout."""
    f32, bf16 = jnp.float32, jnp.bfloat16
    return {
        # conv1: (64, 1, 3) -> (tap, cout) = (3, 64)
        "w1": jnp.transpose(p["conv1_w"].reshape(64, 3), (1, 0)).astype(f32),
        "b1": p["conv1_b"].reshape(1, 64).astype(f32),
        # conv2: (128, 64, 3) -> (tap, cin, cout) = (3, 64, 128)
        "w2": jnp.transpose(p["conv2_w"], (2, 1, 0)).astype(bf16),
        "b2": p["conv2_b"].reshape(1, 128).astype(f32),
        # fc1: (184, 6272) with input index c*49+l -> rows ordered l*128+c
        "wf1": jnp.transpose(p["fc1_w"].reshape(184, 128, 49), (2, 1, 0))
                  .reshape(49 * 128, 184).astype(bf16),
        "bf1": p["fc1_b"].reshape(1, 184).astype(f32),
        "wf2": p["fc2_w"].T.astype(bf16),                  # (184, 80)
        "bf2": p["fc2_b"].reshape(1, 80).astype(f32),
        "wf3": p["fc3_w"].T.astype(bf16),                  # (80, 10)
        "bf3": p["fc3_b"].reshape(1, 10).astype(f32),
        "wf4": p["fc4_w"].astype(f32),                     # (1, 10)
        "bf4": p["fc4_b"].reshape(1, 1).astype(f32),
    }


# ---------------------------------------------------------------------------
# Pure-JAX f32 reference (PyTorch layout) — used only for validation
# ---------------------------------------------------------------------------
def reference_forward(p, x):
    B = x.shape[0]

    def conv1d(h, w, b):                     # h (B,Cin,L), w (Cout,Cin,k)
        cout, cin, k = w.shape
        lout = h.shape[-1] - k + 1
        cols = jnp.stack([h[:, :, t:t + lout] for t in range(k)], axis=-1)
        patches = cols.transpose(0, 2, 1, 3).reshape(B, lout, cin * k)
        y = patches @ w.reshape(cout, cin * k).T + b       # (B, Lout, Cout)
        return y.transpose(0, 2, 1)                        # (B, Cout, Lout)

    h = jax.nn.relu(conv1d(x, p["conv1_w"], p["conv1_b"]))
    h = jax.nn.relu(conv1d(h, p["conv2_w"], p["conv2_b"]))
    h = h.reshape(B, -1)
    h = jax.nn.relu(h @ p["fc1_w"].T + p["fc1_b"])
    h = jax.nn.relu(h @ p["fc2_w"].T + p["fc2_b"])
    h = jax.nn.relu(h @ p["fc3_w"].T + p["fc3_b"])
    return h @ p["fc4_w"].T + p["fc4_b"]


if __name__ == "__main__":
    key = jax.random.PRNGKey(0)
    pkey, xkey = jax.random.split(key)
    torch_params = init_params(pkey)            # PyTorch-layout params
    params = prepare_params(torch_params)       # one-time re-layout / bf16 cast
    x = jax.random.normal(xkey, (2, 1, 53), dtype=jnp.float32)

    fwd = jax.jit(net_forward)
    out = jax.block_until_ready(fwd(params, x))
    assert out.shape == (2, 1) and out.dtype == jnp.float32

    ref = reference_forward(torch_params, x)
    max_err = float(jnp.max(jnp.abs(out - ref)))
    assert max_err < 1e-1, f"kernel deviates from f32 reference by {max_err}"
    print("KERNEL_OK")
</pallas_src>

<mosaic_0001>
module attributes {stable_mosaic.version = 11 : i64} {
  func.func @_net_kernel(%arg0: i32, %arg1: memref<424x1xf32, #tpu.memory_space<vmem>>, %arg2: memref<3x64xf32, #tpu.memory_space<vmem>>, %arg3: memref<1x64xf32, #tpu.memory_space<vmem>>, %arg4: memref<3x64x128xbf16, #tpu.memory_space<vmem>>, %arg5: memref<1x128xf32, #tpu.memory_space<vmem>>, %arg6: memref<6272x184xbf16, #tpu.memory_space<vmem>>, %arg7: memref<1x184xf32, #tpu.memory_space<vmem>>, %arg8: memref<184x80xbf16, #tpu.memory_space<vmem>>, %arg9: memref<1x80xf32, #tpu.memory_space<vmem>>, %arg10: memref<80x10xbf16, #tpu.memory_space<vmem>>, %arg11: memref<1x10xf32, #tpu.memory_space<vmem>>, %arg12: memref<1x10xf32, #tpu.memory_space<vmem>>, %arg13: memref<1x1xf32, #tpu.memory_space<vmem>>, %arg14: memref<2x1xf32, #tpu.memory_space<vmem>>) attributes {dimension_semantics = [#tpu.dimension_semantics<arbitrary>], iteration_bounds = array<i64: 1>, scalar_prefetch = 0 : i64, scratch_operands = 0 : i64, tpu.core_type = #tpu.core_type<tc>, window_params = [{pipeline_mode = #tpu.pipeline_mode<synchronous>, transform_indices = @transform_0, window_bounds = array<i64: 424, 1>}, {pipeline_mode = #tpu.pipeline_mode<synchronous>, transform_indices = @transform_1, window_bounds = array<i64: 3, 64>}, {pipeline_mode = #tpu.pipeline_mode<synchronous>, transform_indices = @transform_2, window_bounds = array<i64: 1, 64>}, {pipeline_mode = #tpu.pipeline_mode<synchronous>, transform_indices = @transform_3, window_bounds = array<i64: 3, 64, 128>}, {pipeline_mode = #tpu.pipeline_mode<synchronous>, transform_indices = @transform_4, window_bounds = array<i64: 1, 128>}, {pipeline_mode = #tpu.pipeline_mode<synchronous>, transform_indices = @transform_5, window_bounds = array<i64: 6272, 184>}, {pipeline_mode = #tpu.pipeline_mode<synchronous>, transform_indices = @transform_6, window_bounds = array<i64: 1, 184>}, {pipeline_mode = #tpu.pipeline_mode<synchronous>, transform_indices = @transform_7, window_bounds = array<i64: 184, 80>}, {pipeline_mode = #tpu.pipeline_mode<synchronous>, transform_indices = @transform_8, window_bounds = array<i64: 1, 80>}, {pipeline_mode = #tpu.pipeline_mode<synchronous>, transform_indices = @transform_9, window_bounds = array<i64: 80, 10>}, {pipeline_mode = #tpu.pipeline_mode<synchronous>, transform_indices = @transform_10, window_bounds = array<i64: 1, 10>}, {pipeline_mode = #tpu.pipeline_mode<synchronous>, transform_indices = @transform_11, window_bounds = array<i64: 1, 10>}, {pipeline_mode = #tpu.pipeline_mode<synchronous>, transform_indices = @transform_12, window_bounds = array<i64: 1, 1>}, {pipeline_mode = #tpu.pipeline_mode<synchronous>, transform_indices = @transform_13, window_bounds = array<i64: 2, 1>}]} {
    %c0 = arith.constant 0 : index
    %c0_0 = arith.constant 0 : index
    %0 = vector.load %arg3[%c0, %c0_0] : memref<1x64xf32, #tpu.memory_space<vmem>>, vector<1x64xf32>
    %c0_1 = arith.constant 0 : index
    %c0_2 = arith.constant 0 : index
    %1 = vector.load %arg1[%c0_1, %c0_2] : memref<424x1xf32, #tpu.memory_space<vmem>>, vector<408x1xf32>
    %c0_3 = arith.constant 0 : index
    %c0_4 = arith.constant 0 : index
    %2 = vector.load %arg2[%c0_3, %c0_4] : memref<3x64xf32, #tpu.memory_space<vmem>>, vector<1x64xf32>
    %3 = vector.broadcast %1 : vector<408x1xf32> to vector<408x64xf32>
    %4 = vector.broadcast %2 : vector<1x64xf32> to vector<408x64xf32>
    %5 = arith.mulf %3, %4 : vector<408x64xf32>
    %6 = vector.broadcast %0 : vector<1x64xf32> to vector<408x64xf32>
    %7 = arith.addf %6, %5 : vector<408x64xf32>
    %c8 = arith.constant 8 : index
    %c0_5 = arith.constant 0 : index
    %8 = vector.load %arg1[%c8, %c0_5] : memref<424x1xf32, #tpu.memory_space<vmem>>, vector<408x1xf32>
    %c1 = arith.constant 1 : index
    %c0_6 = arith.constant 0 : index
    %9 = vector.load %arg2[%c1, %c0_6] : memref<3x64xf32, #tpu.memory_space<vmem>>, vector<1x64xf32>
    %10 = vector.broadcast %8 : vector<408x1xf32> to vector<408x64xf32>
    %11 = vector.broadcast %9 : vector<1x64xf32> to vector<408x64xf32>
    %12 = arith.mulf %10, %11 : vector<408x64xf32>
    %13 = arith.addf %7, %12 : vector<408x64xf32>
    %c16 = arith.constant 16 : index
    %c0_7 = arith.constant 0 : index
    %14 = vector.load %arg1[%c16, %c0_7] : memref<424x1xf32, #tpu.memory_space<vmem>>, vector<408x1xf32>
    %c2 = arith.constant 2 : index
    %c0_8 = arith.constant 0 : index
    %15 = vector.load %arg2[%c2, %c0_8] : memref<3x64xf32, #tpu.memory_space<vmem>>, vector<1x64xf32>
    %16 = vector.broadcast %14 : vector<408x1xf32> to vector<408x64xf32>
    %17 = vector.broadcast %15 : vector<1x64xf32> to vector<408x64xf32>
    %18 = arith.mulf %16, %17 : vector<408x64xf32>
    %19 = arith.addf %13, %18 : vector<408x64xf32>
    %cst = arith.constant 0.000000e+00 : f32
    %20 = vector.broadcast %cst : f32 to vector<408x64xf32>
    %21 = arith.maximumf %19, %20 : vector<408x64xf32>
    %22 = arith.truncf %21 : vector<408x64xf32> to vector<408x64xbf16>
    %c0_9 = arith.constant 0 : index
    %c0_10 = arith.constant 0 : index
    %23 = vector.load %arg5[%c0_9, %c0_10] : memref<1x128xf32, #tpu.memory_space<vmem>>, vector<1x128xf32>
    %24 = vector.extract_strided_slice %22 {offsets = [0, 0], sizes = [392, 64], strides = [1, 1]} : vector<408x64xbf16> to vector<392x64xbf16>
    %c0_11 = arith.constant 0 : index
    %c0_12 = arith.constant 0 : index
    %c0_13 = arith.constant 0 : index
    %25 = vector.load %arg4[%c0_11, %c0_12, %c0_13] : memref<3x64x128xbf16, #tpu.memory_space<vmem>>, vector<1x64x128xbf16>
    %26 = vector.shape_cast %25 : vector<1x64x128xbf16> to vector<64x128xbf16>
    %cst_14 = arith.constant dense<0.000000e+00> : vector<392x128xf32>
    %27 = tpu.matmul %24, %26, %cst_14 {dimension_numbers = #tpu.dot_dimension_numbers<[1], [0], [0], [1], [0, 0, 1, 1], [], []>} : vector<392x64xbf16>, vector<64x128xbf16>, vector<392x128xf32> -> vector<392x128xf32>
    %28 = vector.broadcast %23 : vector<1x128xf32> to vector<392x128xf32>
    %29 = arith.addf %28, %27 : vector<392x128xf32>
    %30 = vector.extract_strided_slice %22 {offsets = [8, 0], sizes = [392, 64], strides = [1, 1]} : vector<408x64xbf16> to vector<392x64xbf16>
    %c1_15 = arith.constant 1 : index
    %c0_16 = arith.constant 0 : index
    %c0_17 = arith.constant 0 : index
    %31 = vector.load %arg4[%c1_15, %c0_16, %c0_17] : memref<3x64x128xbf16, #tpu.memory_space<vmem>>, vector<1x64x128xbf16>
    %32 = vector.shape_cast %31 : vector<1x64x128xbf16> to vector<64x128xbf16>
    %cst_18 = arith.constant dense<0.000000e+00> : vector<392x128xf32>
    %33 = tpu.matmul %30, %32, %cst_18 {dimension_numbers = #tpu.dot_dimension_numbers<[1], [0], [0], [1], [0, 0, 1, 1], [], []>} : vector<392x64xbf16>, vector<64x128xbf16>, vector<392x128xf32> -> vector<392x128xf32>
    %34 = arith.addf %29, %33 : vector<392x128xf32>
    %35 = vector.extract_strided_slice %22 {offsets = [16, 0], sizes = [392, 64], strides = [1, 1]} : vector<408x64xbf16> to vector<392x64xbf16>
    %c2_19 = arith.constant 2 : index
    %c0_20 = arith.constant 0 : index
    %c0_21 = arith.constant 0 : index
    %36 = vector.load %arg4[%c2_19, %c0_20, %c0_21] : memref<3x64x128xbf16, #tpu.memory_space<vmem>>, vector<1x64x128xbf16>
    %37 = vector.shape_cast %36 : vector<1x64x128xbf16> to vector<64x128xbf16>
    %cst_22 = arith.constant dense<0.000000e+00> : vector<392x128xf32>
    %38 = tpu.matmul %35, %37, %cst_22 {dimension_numbers = #tpu.dot_dimension_numbers<[1], [0], [0], [1], [0, 0, 1, 1], [], []>} : vector<392x64xbf16>, vector<64x128xbf16>, vector<392x128xf32> -> vector<392x128xf32>
    %39 = arith.addf %34, %38 : vector<392x128xf32>
    %cst_23 = arith.constant 0.000000e+00 : f32
    %40 = vector.broadcast %cst_23 : f32 to vector<392x128xf32>
    %41 = arith.maximumf %39, %40 : vector<392x128xf32>
    %42 = arith.truncf %41 : vector<392x128xf32> to vector<392x128xbf16>
    %c0_24 = arith.constant 0 : index
    %c0_25 = arith.constant 0 : index
    %43 = vector.load %arg7[%c0_24, %c0_25] : memref<1x184xf32, #tpu.memory_space<vmem>>, vector<1x184xf32>
    %44 = vector.extract_strided_slice %42 {offsets = [0, 0], sizes = [8, 128], strides = [1, 1]} : vector<392x128xbf16> to vector<8x128xbf16>
    %c0_26 = arith.constant 0 : index
    %c0_27 = arith.constant 0 : index
    %45 = vector.load %arg6[%c0_26, %c0_27] : memref<6272x184xbf16, #tpu.memory_space<vmem>>, vector<128x184xbf16>
    %cst_28 = arith.constant dense<0.000000e+00> : vector<8x184xf32>
    %46 = tpu.matmul %44, %45, %cst_28 {dimension_numbers = #tpu.dot_dimension_numbers<[1], [0], [0], [1], [0, 0, 1, 1], [], []>} : vector<8x128xbf16>, vector<128x184xbf16>, vector<8x184xf32> -> vector<8x184xf32>
    %47 = vector.broadcast %43 : vector<1x184xf32> to vector<8x184xf32>
    %48 = arith.addf %47, %46 : vector<8x184xf32>
    %49 = vector.extract_strided_slice %42 {offsets = [8, 0], sizes = [8, 128], strides = [1, 1]} : vector<392x128xbf16> to vector<8x128xbf16>
    %c128 = arith.constant 128 : index
    %c0_29 = arith.constant 0 : index
    %50 = vector.load %arg6[%c128, %c0_29] : memref<6272x184xbf16, #tpu.memory_space<vmem>>, vector<128x184xbf16>
    %cst_30 = arith.constant dense<0.000000e+00> : vector<8x184xf32>
    %51 = tpu.matmul %49, %50, %cst_30 {dimension_numbers = #tpu.dot_dimension_numbers<[1], [0], [0], [1], [0, 0, 1, 1], [], []>} : vector<8x128xbf16>, vector<128x184xbf16>, vector<8x184xf32> -> vector<8x184xf32>
    %52 = arith.addf %48, %51 : vector<8x184xf32>
    %53 = vector.extract_strided_slice %42 {offsets = [16, 0], sizes = [8, 128], strides = [1, 1]} : vector<392x128xbf16> to vector<8x128xbf16>
    %c256 = arith.constant 256 : index
    %c0_31 = arith.constant 0 : index
    %54 = vector.load %arg6[%c256, %c0_31] : memref<6272x184xbf16, #tpu.memory_space<vmem>>, vector<128x184xbf16>
    %cst_32 = arith.constant dense<0.000000e+00> : vector<8x184xf32>
    %55 = tpu.matmul %53, %54, %cst_32 {dimension_numbers = #tpu.dot_dimension_numbers<[1], [0], [0], [1], [0, 0, 1, 1], [], []>} : vector<8x128xbf16>, vector<128x184xbf16>, vector<8x184xf32> -> vector<8x184xf32>
    %56 = arith.addf %52, %55 : vector<8x184xf32>
    %57 = vector.extract_strided_slice %42 {offsets = [24, 0], sizes = [8, 128], strides = [1, 1]} : vector<392x128xbf16> to vector<8x128xbf16>
    %c384 = arith.constant 384 : index
    %c0_33 = arith.constant 0 : index
    %58 = vector.load %arg6[%c384, %c0_33] : memref<6272x184xbf16, #tpu.memory_space<vmem>>, vector<128x184xbf16>
    %cst_34 = arith.constant dense<0.000000e+00> : vector<8x184xf32>
    %59 = tpu.matmul %57, %58, %cst_34 {dimension_numbers = #tpu.dot_dimension_numbers<[1], [0], [0], [1], [0, 0, 1, 1], [], []>} : vector<8x128xbf16>, vector<128x184xbf16>, vector<8x184xf32> -> vector<8x184xf32>
    %60 = arith.addf %56, %59 : vector<8x184xf32>
    %61 = vector.extract_strided_slice %42 {offsets = [32, 0], sizes = [8, 128], strides = [1, 1]} : vector<392x128xbf16> to vector<8x128xbf16>
    %c512 = arith.constant 512 : index
    %c0_35 = arith.constant 0 : index
    %62 = vector.load %arg6[%c512, %c0_35] : memref<6272x184xbf16, #tpu.memory_space<vmem>>, vector<128x184xbf16>
    %cst_36 = arith.constant dense<0.000000e+00> : vector<8x184xf32>
    %63 = tpu.matmul %61, %62, %cst_36 {dimension_numbers = #tpu.dot_dimension_numbers<[1], [0], [0], [1], [0, 0, 1, 1], [], []>} : vector<8x128xbf16>, vector<128x184xbf16>, vector<8x184xf32> -> vector<8x184xf32>
    %64 = arith.addf %60, %63 : vector<8x184xf32>
    %65 = vector.extract_strided_slice %42 {offsets = [40, 0], sizes = [8, 128], strides = [1, 1]} : vector<392x128xbf16> to vector<8x128xbf16>
    %c640 = arith.constant 640 : index
    %c0_37 = arith.constant 0 : index
    %66 = vector.load %arg6[%c640, %c0_37] : memref<6272x184xbf16, #tpu.memory_space<vmem>>, vector<128x184xbf16>
    %cst_38 = arith.constant dense<0.000000e+00> : vector<8x184xf32>
    %67 = tpu.matmul %65, %66, %cst_38 {dimension_numbers = #tpu.dot_dimension_numbers<[1], [0], [0], [1], [0, 0, 1, 1], [], []>} : vector<8x128xbf16>, vector<128x184xbf16>, vector<8x184xf32> -> vector<8x184xf32>
    %68 = arith.addf %64, %67 : vector<8x184xf32>
    %69 = vector.extract_strided_slice %42 {offsets = [48, 0], sizes = [8, 128], strides = [1, 1]} : vector<392x128xbf16> to vector<8x128xbf16>
    %c768 = arith.constant 768 : index
    %c0_39 = arith.constant 0 : index
    %70 = vector.load %arg6[%c768, %c0_39] : memref<6272x184xbf16, #tpu.memory_space<vmem>>, vector<128x184xbf16>
    %cst_40 = arith.constant dense<0.000000e+00> : vector<8x184xf32>
    %71 = tpu.matmul %69, %70, %cst_40 {dimension_numbers = #tpu.dot_dimension_numbers<[1], [0], [0], [1], [0, 0, 1, 1], [], []>} : vector<8x128xbf16>, vector<128x184xbf16>, vector<8x184xf32> -> vector<8x184xf32>
    %72 = arith.addf %68, %71 : vector<8x184xf32>
    %73 = vector.extract_strided_slice %42 {offsets = [56, 0], sizes = [8, 128], strides = [1, 1]} : vector<392x128xbf16> to vector<8x128xbf16>
    %c896 = arith.constant 896 : index
    %c0_41 = arith.constant 0 : index
    %74 = vector.load %arg6[%c896, %c0_41] : memref<6272x184xbf16, #tpu.memory_space<vmem>>, vector<128x184xbf16>
    %cst_42 = arith.constant dense<0.000000e+00> : vector<8x184xf32>
    %75 = tpu.matmul %73, %74, %cst_42 {dimension_numbers = #tpu.dot_dimension_numbers<[1], [0], [0], [1], [0, 0, 1, 1], [], []>} : vector<8x128xbf16>, vector<128x184xbf16>, vector<8x184xf32> -> vector<8x184xf32>
    %76 = arith.addf %72, %75 : vector<8x184xf32>
    %77 = vector.extract_strided_slice %42 {offsets = [64, 0], sizes = [8, 128], strides = [1, 1]} : vector<392x128xbf16> to vector<8x128xbf16>
    %c1024 = arith.constant 1024 : index
    %c0_43 = arith.constant 0 : index
    %78 = vector.load %arg6[%c1024, %c0_43] : memref<6272x184xbf16, #tpu.memory_space<vmem>>, vector<128x184xbf16>
    %cst_44 = arith.constant dense<0.000000e+00> : vector<8x184xf32>
    %79 = tpu.matmul %77, %78, %cst_44 {dimension_numbers = #tpu.dot_dimension_numbers<[1], [0], [0], [1], [0, 0, 1, 1], [], []>} : vector<8x128xbf16>, vector<128x184xbf16>, vector<8x184xf32> -> vector<8x184xf32>
    %80 = arith.addf %76, %79 : vector<8x184xf32>
    %81 = vector.extract_strided_slice %42 {offsets = [72, 0], sizes = [8, 128], strides = [1, 1]} : vector<392x128xbf16> to vector<8x128xbf16>
    %c1152 = arith.constant 1152 : index
    %c0_45 = arith.constant 0 : index
    %82 = vector.load %arg6[%c1152, %c0_45] : memref<6272x184xbf16, #tpu.memory_space<vmem>>, vector<128x184xbf16>
    %cst_46 = arith.constant dense<0.000000e+00> : vector<8x184xf32>
    %83 = tpu.matmul %81, %82, %cst_46 {dimension_numbers = #tpu.dot_dimension_numbers<[1], [0], [0], [1], [0, 0, 1, 1], [], []>} : vector<8x128xbf16>, vector<128x184xbf16>, vector<8x184xf32> -> vector<8x184xf32>
    %84 = arith.addf %80, %83 : vector<8x184xf32>
    %85 = vector.extract_strided_slice %42 {offsets = [80, 0], sizes = [8, 128], strides = [1, 1]} : vector<392x128xbf16> to vector<8x128xbf16>
    %c1280 = arith.constant 1280 : index
    %c0_47 = arith.constant 0 : index
    %86 = vector.load %arg6[%c1280, %c0_47] : memref<6272x184xbf16, #tpu.memory_space<vmem>>, vector<128x184xbf16>
    %cst_48 = arith.constant dense<0.000000e+00> : vector<8x184xf32>
    %87 = tpu.matmul %85, %86, %cst_48 {dimension_numbers = #tpu.dot_dimension_numbers<[1], [0], [0], [1], [0, 0, 1, 1], [], []>} : vector<8x128xbf16>, vector<128x184xbf16>, vector<8x184xf32> -> vector<8x184xf32>
    %88 = arith.addf %84, %87 : vector<8x184xf32>
    %89 = vector.extract_strided_slice %42 {offsets = [88, 0], sizes = [8, 128], strides = [1, 1]} : vector<392x128xbf16> to vector<8x128xbf16>
    %c1408 = arith.constant 1408 : index
    %c0_49 = arith.constant 0 : index
    %90 = vector.load %arg6[%c1408, %c0_49] : memref<6272x184xbf16, #tpu.memory_space<vmem>>, vector<128x184xbf16>
    %cst_50 = arith.constant dense<0.000000e+00> : vector<8x184xf32>
    %91 = tpu.matmul %89, %90, %cst_50 {dimension_numbers = #tpu.dot_dimension_numbers<[1], [0], [0], [1], [0, 0, 1, 1], [], []>} : vector<8x128xbf16>, vector<128x184xbf16>, vector<8x184xf32> -> vector<8x184xf32>
    %92 = arith.addf %88, %91 : vector<8x184xf32>
    %93 = vector.extract_strided_slice %42 {offsets = [96, 0], sizes = [8, 128], strides = [1, 1]} : vector<392x128xbf16> to vector<8x128xbf16>
    %c1536 = arith.constant 1536 : index
    %c0_51 = arith.constant 0 : index
    %94 = vector.load %arg6[%c1536, %c0_51] : memref<6272x184xbf16, #tpu.memory_space<vmem>>, vector<128x184xbf16>
    %cst_52 = arith.constant dense<0.000000e+00> : vector<8x184xf32>
    %95 = tpu.matmul %93, %94, %cst_52 {dimension_numbers = #tpu.dot_dimension_numbers<[1], [0], [0], [1], [0, 0, 1, 1], [], []>} : vector<8x128xbf16>, vector<128x184xbf16>, vector<8x184xf32> -> vector<8x184xf32>
    %96 = arith.addf %92, %95 : vector<8x184xf32>
    %97 = vector.extract_strided_slice %42 {offsets = [104, 0], sizes = [8, 128], strides = [1, 1]} : vector<392x128xbf16> to vector<8x128xbf16>
    %c1664 = arith.constant 1664 : index
    %c0_53 = arith.constant 0 : index
    %98 = vector.load %arg6[%c1664, %c0_53] : memref<6272x184xbf16, #tpu.memory_space<vmem>>, vector<128x184xbf16>
    %cst_54 = arith.constant dense<0.000000e+00> : vector<8x184xf32>
    %99 = tpu.matmul %97, %98, %cst_54 {dimension_numbers = #tpu.dot_dimension_numbers<[1], [0], [0], [1], [0, 0, 1, 1], [], []>} : vector<8x128xbf16>, vector<128x184xbf16>, vector<8x184xf32> -> vector<8x184xf32>
    %100 = arith.addf %96, %99 : vector<8x184xf32>
    %101 = vector.extract_strided_slice %42 {offsets = [112, 0], sizes = [8, 128], strides = [1, 1]} : vector<392x128xbf16> to vector<8x128xbf16>
    %c1792 = arith.constant 1792 : index
    %c0_55 = arith.constant 0 : index
    %102 = vector.load %arg6[%c1792, %c0_55] : memref<6272x184xbf16, #tpu.memory_space<vmem>>, vector<128x184xbf16>
    %cst_56 = arith.constant dense<0.000000e+00> : vector<8x184xf32>
    %103 = tpu.matmul %101, %102, %cst_56 {dimension_numbers = #tpu.dot_dimension_numbers<[1], [0], [0], [1], [0, 0, 1, 1], [], []>} : vector<8x128xbf16>, vector<128x184xbf16>, vector<8x184xf32> -> vector<8x184xf32>
    %104 = arith.addf %100, %103 : vector<8x184xf32>
    %105 = vector.extract_strided_slice %42 {offsets = [120, 0], sizes = [8, 128], strides = [1, 1]} : vector<392x128xbf16> to vector<8x128xbf16>
    %c1920 = arith.constant 1920 : index
    %c0_57 = arith.constant 0 : index
    %106 = vector.load %arg6[%c1920, %c0_57] : memref<6272x184xbf16, #tpu.memory_space<vmem>>, vector<128x184xbf16>
    %cst_58 = arith.constant dense<0.000000e+00> : vector<8x184xf32>
    %107 = tpu.matmul %105, %106, %cst_58 {dimension_numbers = #tpu.dot_dimension_numbers<[1], [0], [0], [1], [0, 0, 1, 1], [], []>} : vector<8x128xbf16>, vector<128x184xbf16>, vector<8x184xf32> -> vector<8x184xf32>
    %108 = arith.addf %104, %107 : vector<8x184xf32>
    %109 = vector.extract_strided_slice %42 {offsets = [128, 0], sizes = [8, 128], strides = [1, 1]} : vector<392x128xbf16> to vector<8x128xbf16>
    %c2048 = arith.constant 2048 : index
    %c0_59 = arith.constant 0 : index
    %110 = vector.load %arg6[%c2048, %c0_59] : memref<6272x184xbf16, #tpu.memory_space<vmem>>, vector<128x184xbf16>
    %cst_60 = arith.constant dense<0.000000e+00> : vector<8x184xf32>
    %111 = tpu.matmul %109, %110, %cst_60 {dimension_numbers = #tpu.dot_dimension_numbers<[1], [0], [0], [1], [0, 0, 1, 1], [], []>} : vector<8x128xbf16>, vector<128x184xbf16>, vector<8x184xf32> -> vector<8x184xf32>
    %112 = arith.addf %108, %111 : vector<8x184xf32>
    %113 = vector.extract_strided_slice %42 {offsets = [136, 0], sizes = [8, 128], strides = [1, 1]} : vector<392x128xbf16> to vector<8x128xbf16>
    %c2176 = arith.constant 2176 : index
    %c0_61 = arith.constant 0 : index
    %114 = vector.load %arg6[%c2176, %c0_61] : memref<6272x184xbf16, #tpu.memory_space<vmem>>, vector<128x184xbf16>
    %cst_62 = arith.constant dense<0.000000e+00> : vector<8x184xf32>
    %115 = tpu.matmul %113, %114, %cst_62 {dimension_numbers = #tpu.dot_dimension_numbers<[1], [0], [0], [1], [0, 0, 1, 1], [], []>} : vector<8x128xbf16>, vector<128x184xbf16>, vector<8x184xf32> -> vector<8x184xf32>
    %116 = arith.addf %112, %115 : vector<8x184xf32>
    %117 = vector.extract_strided_slice %42 {offsets = [144, 0], sizes = [8, 128], strides = [1, 1]} : vector<392x128xbf16> to vector<8x128xbf16>
    %c2304 = arith.constant 2304 : index
    %c0_63 = arith.constant 0 : index
    %118 = vector.load %arg6[%c2304, %c0_63] : memref<6272x184xbf16, #tpu.memory_space<vmem>>, vector<128x184xbf16>
    %cst_64 = arith.constant dense<0.000000e+00> : vector<8x184xf32>
    %119 = tpu.matmul %117, %118, %cst_64 {dimension_numbers = #tpu.dot_dimension_numbers<[1], [0], [0], [1], [0, 0, 1, 1], [], []>} : vector<8x128xbf16>, vector<128x184xbf16>, vector<8x184xf32> -> vector<8x184xf32>
    %120 = arith.addf %116, %119 : vector<8x184xf32>
    %121 = vector.extract_strided_slice %42 {offsets = [152, 0], sizes = [8, 128], strides = [1, 1]} : vector<392x128xbf16> to vector<8x128xbf16>
    %c2432 = arith.constant 2432 : index
    %c0_65 = arith.constant 0 : index
    %122 = vector.load %arg6[%c2432, %c0_65] : memref<6272x184xbf16, #tpu.memory_space<vmem>>, vector<128x184xbf16>
    %cst_66 = arith.constant dense<0.000000e+00> : vector<8x184xf32>
    %123 = tpu.matmul %121, %122, %cst_66 {dimension_numbers = #tpu.dot_dimension_numbers<[1], [0], [0], [1], [0, 0, 1, 1], [], []>} : vector<8x128xbf16>, vector<128x184xbf16>, vector<8x184xf32> -> vector<8x184xf32>
    %124 = arith.addf %120, %123 : vector<8x184xf32>
    %125 = vector.extract_strided_slice %42 {offsets = [160, 0], sizes = [8, 128], strides = [1, 1]} : vector<392x128xbf16> to vector<8x128xbf16>
    %c2560 = arith.constant 2560 : index
    %c0_67 = arith.constant 0 : index
    %126 = vector.load %arg6[%c2560, %c0_67] : memref<6272x184xbf16, #tpu.memory_space<vmem>>, vector<128x184xbf16>
    %cst_68 = arith.constant dense<0.000000e+00> : vector<8x184xf32>
    %127 = tpu.matmul %125, %126, %cst_68 {dimension_numbers = #tpu.dot_dimension_numbers<[1], [0], [0], [1], [0, 0, 1, 1], [], []>} : vector<8x128xbf16>, vector<128x184xbf16>, vector<8x184xf32> -> vector<8x184xf32>
    %128 = arith.addf %124, %127 : vector<8x184xf32>
    %129 = vector.extract_strided_slice %42 {offsets = [168, 0], sizes = [8, 128], strides = [1, 1]} : vector<392x128xbf16> to vector<8x128xbf16>
    %c2688 = arith.constant 2688 : index
    %c0_69 = arith.constant 0 : index
    %130 = vector.load %arg6[%c2688, %c0_69] : memref<6272x184xbf16, #tpu.memory_space<vmem>>, vector<128x184xbf16>
    %cst_70 = arith.constant dense<0.000000e+00> : vector<8x184xf32>
    %131 = tpu.matmul %129, %130, %cst_70 {dimension_numbers = #tpu.dot_dimension_numbers<[1], [0], [0], [1], [0, 0, 1, 1], [], []>} : vector<8x128xbf16>, vector<128x184xbf16>, vector<8x184xf32> -> vector<8x184xf32>
    %132 = arith.addf %128, %131 : vector<8x184xf32>
    %133 = vector.extract_strided_slice %42 {offsets = [176, 0], sizes = [8, 128], strides = [1, 1]} : vector<392x128xbf16> to vector<8x128xbf16>
    %c2816 = arith.constant 2816 : index
    %c0_71 = arith.constant 0 : index
    %134 = vector.load %arg6[%c2816, %c0_71] : memref<6272x184xbf16, #tpu.memory_space<vmem>>, vector<128x184xbf16>
    %cst_72 = arith.constant dense<0.000000e+00> : vector<8x184xf32>
    %135 = tpu.matmul %133, %134, %cst_72 {dimension_numbers = #tpu.dot_dimension_numbers<[1], [0], [0], [1], [0, 0, 1, 1], [], []>} : vector<8x128xbf16>, vector<128x184xbf16>, vector<8x184xf32> -> vector<8x184xf32>
    %136 = arith.addf %132, %135 : vector<8x184xf32>
    %137 = vector.extract_strided_slice %42 {offsets = [184, 0], sizes = [8, 128], strides = [1, 1]} : vector<392x128xbf16> to vector<8x128xbf16>
    %c2944 = arith.constant 2944 : index
    %c0_73 = arith.constant 0 : index
    %138 = vector.load %arg6[%c2944, %c0_73] : memref<6272x184xbf16, #tpu.memory_space<vmem>>, vector<128x184xbf16>
    %cst_74 = arith.constant dense<0.000000e+00> : vector<8x184xf32>
    %139 = tpu.matmul %137, %138, %cst_74 {dimension_numbers = #tpu.dot_dimension_numbers<[1], [0], [0], [1], [0, 0, 1, 1], [], []>} : vector<8x128xbf16>, vector<128x184xbf16>, vector<8x184xf32> -> vector<8x184xf32>
    %140 = arith.addf %136, %139 : vector<8x184xf32>
    %141 = vector.extract_strided_slice %42 {offsets = [192, 0], sizes = [8, 128], strides = [1, 1]} : vector<392x128xbf16> to vector<8x128xbf16>
    %c3072 = arith.constant 3072 : index
    %c0_75 = arith.constant 0 : index
    %142 = vector.load %arg6[%c3072, %c0_75] : memref<6272x184xbf16, #tpu.memory_space<vmem>>, vector<128x184xbf16>
    %cst_76 = arith.constant dense<0.000000e+00> : vector<8x184xf32>
    %143 = tpu.matmul %141, %142, %cst_76 {dimension_numbers = #tpu.dot_dimension_numbers<[1], [0], [0], [1], [0, 0, 1, 1], [], []>} : vector<8x128xbf16>, vector<128x184xbf16>, vector<8x184xf32> -> vector<8x184xf32>
    %144 = arith.addf %140, %143 : vector<8x184xf32>
    %145 = vector.extract_strided_slice %42 {offsets = [200, 0], sizes = [8, 128], strides = [1, 1]} : vector<392x128xbf16> to vector<8x128xbf16>
    %c3200 = arith.constant 3200 : index
    %c0_77 = arith.constant 0 : index
    %146 = vector.load %arg6[%c3200, %c0_77] : memref<6272x184xbf16, #tpu.memory_space<vmem>>, vector<128x184xbf16>
    %cst_78 = arith.constant dense<0.000000e+00> : vector<8x184xf32>
    %147 = tpu.matmul %145, %146, %cst_78 {dimension_numbers = #tpu.dot_dimension_numbers<[1], [0], [0], [1], [0, 0, 1, 1], [], []>} : vector<8x128xbf16>, vector<128x184xbf16>, vector<8x184xf32> -> vector<8x184xf32>
    %148 = arith.addf %144, %147 : vector<8x184xf32>
    %149 = vector.extract_strided_slice %42 {offsets = [208, 0], sizes = [8, 128], strides = [1, 1]} : vector<392x128xbf16> to vector<8x128xbf16>
    %c3328 = arith.constant 3328 : index
    %c0_79 = arith.constant 0 : index
    %150 = vector.load %arg6[%c3328, %c0_79] : memref<6272x184xbf16, #tpu.memory_space<vmem>>, vector<128x184xbf16>
    %cst_80 = arith.constant dense<0.000000e+00> : vector<8x184xf32>
    %151 = tpu.matmul %149, %150, %cst_80 {dimension_numbers = #tpu.dot_dimension_numbers<[1], [0], [0], [1], [0, 0, 1, 1], [], []>} : vector<8x128xbf16>, vector<128x184xbf16>, vector<8x184xf32> -> vector<8x184xf32>
    %152 = arith.addf %148, %151 : vector<8x184xf32>
    %153 = vector.extract_strided_slice %42 {offsets = [216, 0], sizes = [8, 128], strides = [1, 1]} : vector<392x128xbf16> to vector<8x128xbf16>
    %c3456 = arith.constant 3456 : index
    %c0_81 = arith.constant 0 : index
    %154 = vector.load %arg6[%c3456, %c0_81] : memref<6272x184xbf16, #tpu.memory_space<vmem>>, vector<128x184xbf16>
    %cst_82 = arith.constant dense<0.000000e+00> : vector<8x184xf32>
    %155 = tpu.matmul %153, %154, %cst_82 {dimension_numbers = #tpu.dot_dimension_numbers<[1], [0], [0], [1], [0, 0, 1, 1], [], []>} : vector<8x128xbf16>, vector<128x184xbf16>, vector<8x184xf32> -> vector<8x184xf32>
    %156 = arith.addf %152, %155 : vector<8x184xf32>
    %157 = vector.extract_strided_slice %42 {offsets = [224, 0], sizes = [8, 128], strides = [1, 1]} : vector<392x128xbf16> to vector<8x128xbf16>
    %c3584 = arith.constant 3584 : index
    %c0_83 = arith.constant 0 : index
    %158 = vector.load %arg6[%c3584, %c0_83] : memref<6272x184xbf16, #tpu.memory_space<vmem>>, vector<128x184xbf16>
    %cst_84 = arith.constant dense<0.000000e+00> : vector<8x184xf32>
    %159 = tpu.matmul %157, %158, %cst_84 {dimension_numbers = #tpu.dot_dimension_numbers<[1], [0], [0], [1], [0, 0, 1, 1], [], []>} : vector<8x128xbf16>, vector<128x184xbf16>, vector<8x184xf32> -> vector<8x184xf32>
    %160 = arith.addf %156, %159 : vector<8x184xf32>
    %161 = vector.extract_strided_slice %42 {offsets = [232, 0], sizes = [8, 128], strides = [1, 1]} : vector<392x128xbf16> to vector<8x128xbf16>
    %c3712 = arith.constant 3712 : index
    %c0_85 = arith.constant 0 : index
    %162 = vector.load %arg6[%c3712, %c0_85] : memref<6272x184xbf16, #tpu.memory_space<vmem>>, vector<128x184xbf16>
    %cst_86 = arith.constant dense<0.000000e+00> : vector<8x184xf32>
    %163 = tpu.matmul %161, %162, %cst_86 {dimension_numbers = #tpu.dot_dimension_numbers<[1], [0], [0], [1], [0, 0, 1, 1], [], []>} : vector<8x128xbf16>, vector<128x184xbf16>, vector<8x184xf32> -> vector<8x184xf32>
    %164 = arith.addf %160, %163 : vector<8x184xf32>
    %165 = vector.extract_strided_slice %42 {offsets = [240, 0], sizes = [8, 128], strides = [1, 1]} : vector<392x128xbf16> to vector<8x128xbf16>
    %c3840 = arith.constant 3840 : index
    %c0_87 = arith.constant 0 : index
    %166 = vector.load %arg6[%c3840, %c0_87] : memref<6272x184xbf16, #tpu.memory_space<vmem>>, vector<128x184xbf16>
    %cst_88 = arith.constant dense<0.000000e+00> : vector<8x184xf32>
    %167 = tpu.matmul %165, %166, %cst_88 {dimension_numbers = #tpu.dot_dimension_numbers<[1], [0], [0], [1], [0, 0, 1, 1], [], []>} : vector<8x128xbf16>, vector<128x184xbf16>, vector<8x184xf32> -> vector<8x184xf32>
    %168 = arith.addf %164, %167 : vector<8x184xf32>
    %169 = vector.extract_strided_slice %42 {offsets = [248, 0], sizes = [8, 128], strides = [1, 1]} : vector<392x128xbf16> to vector<8x128xbf16>
    %c3968 = arith.constant 3968 : index
    %c0_89 = arith.constant 0 : index
    %170 = vector.load %arg6[%c3968, %c0_89] : memref<6272x184xbf16, #tpu.memory_space<vmem>>, vector<128x184xbf16>
    %cst_90 = arith.constant dense<0.000000e+00> : vector<8x184xf32>
    %171 = tpu.matmul %169, %170, %cst_90 {dimension_numbers = #tpu.dot_dimension_numbers<[1], [0], [0], [1], [0, 0, 1, 1], [], []>} : vector<8x128xbf16>, vector<128x184xbf16>, vector<8x184xf32> -> vector<8x184xf32>
    %172 = arith.addf %168, %171 : vector<8x184xf32>
    %173 = vector.extract_strided_slice %42 {offsets = [256, 0], sizes = [8, 128], strides = [1, 1]} : vector<392x128xbf16> to vector<8x128xbf16>
    %c4096 = arith.constant 4096 : index
    %c0_91 = arith.constant 0 : index
    %174 = vector.load %arg6[%c4096, %c0_91] : memref<6272x184xbf16, #tpu.memory_space<vmem>>, vector<128x184xbf16>
    %cst_92 = arith.constant dense<0.000000e+00> : vector<8x184xf32>
    %175 = tpu.matmul %173, %174, %cst_92 {dimension_numbers = #tpu.dot_dimension_numbers<[1], [0], [0], [1], [0, 0, 1, 1], [], []>} : vector<8x128xbf16>, vector<128x184xbf16>, vector<8x184xf32> -> vector<8x184xf32>
    %176 = arith.addf %172, %175 : vector<8x184xf32>
    %177 = vector.extract_strided_slice %42 {offsets = [264, 0], sizes = [8, 128], strides = [1, 1]} : vector<392x128xbf16> to vector<8x128xbf16>
    %c4224 = arith.constant 4224 : index
    %c0_93 = arith.constant 0 : index
    %178 = vector.load %arg6[%c4224, %c0_93] : memref<6272x184xbf16, #tpu.memory_space<vmem>>, vector<128x184xbf16>
    %cst_94 = arith.constant dense<0.000000e+00> : vector<8x184xf32>
    %179 = tpu.matmul %177, %178, %cst_94 {dimension_numbers = #tpu.dot_dimension_numbers<[1], [0], [0], [1], [0, 0, 1, 1], [], []>} : vector<8x128xbf16>, vector<128x184xbf16>, vector<8x184xf32> -> vector<8x184xf32>
    %180 = arith.addf %176, %179 : vector<8x184xf32>
    %181 = vector.extract_strided_slice %42 {offsets = [272, 0], sizes = [8, 128], strides = [1, 1]} : vector<392x128xbf16> to vector<8x128xbf16>
    %c4352 = arith.constant 4352 : index
    %c0_95 = arith.constant 0 : index
    %182 = vector.load %arg6[%c4352, %c0_95] : memref<6272x184xbf16, #tpu.memory_space<vmem>>, vector<128x184xbf16>
    %cst_96 = arith.constant dense<0.000000e+00> : vector<8x184xf32>
    %183 = tpu.matmul %181, %182, %cst_96 {dimension_numbers = #tpu.dot_dimension_numbers<[1], [0], [0], [1], [0, 0, 1, 1], [], []>} : vector<8x128xbf16>, vector<128x184xbf16>, vector<8x184xf32> -> vector<8x184xf32>
    %184 = arith.addf %180, %183 : vector<8x184xf32>
    %185 = vector.extract_strided_slice %42 {offsets = [280, 0], sizes = [8, 128], strides = [1, 1]} : vector<392x128xbf16> to vector<8x128xbf16>
    %c4480 = arith.constant 4480 : index
    %c0_97 = arith.constant 0 : index
    %186 = vector.load %arg6[%c4480, %c0_97] : memref<6272x184xbf16, #tpu.memory_space<vmem>>, vector<128x184xbf16>
    %cst_98 = arith.constant dense<0.000000e+00> : vector<8x184xf32>
    %187 = tpu.matmul %185, %186, %cst_98 {dimension_numbers = #tpu.dot_dimension_numbers<[1], [0], [0], [1], [0, 0, 1, 1], [], []>} : vector<8x128xbf16>, vector<128x184xbf16>, vector<8x184xf32> -> vector<8x184xf32>
    %188 = arith.addf %184, %187 : vector<8x184xf32>
    %189 = vector.extract_strided_slice %42 {offsets = [288, 0], sizes = [8, 128], strides = [1, 1]} : vector<392x128xbf16> to vector<8x128xbf16>
    %c4608 = arith.constant 4608 : index
    %c0_99 = arith.constant 0 : index
    %190 = vector.load %arg6[%c4608, %c0_99] : memref<6272x184xbf16, #tpu.memory_space<vmem>>, vector<128x184xbf16>
    %cst_100 = arith.constant dense<0.000000e+00> : vector<8x184xf32>
    %191 = tpu.matmul %189, %190, %cst_100 {dimension_numbers = #tpu.dot_dimension_numbers<[1], [0], [0], [1], [0, 0, 1, 1], [], []>} : vector<8x128xbf16>, vector<128x184xbf16>, vector<8x184xf32> -> vector<8x184xf32>
    %192 = arith.addf %188, %191 : vector<8x184xf32>
    %193 = vector.extract_strided_slice %42 {offsets = [296, 0], sizes = [8, 128], strides = [1, 1]} : vector<392x128xbf16> to vector<8x128xbf16>
    %c4736 = arith.constant 4736 : index
    %c0_101 = arith.constant 0 : index
    %194 = vector.load %arg6[%c4736, %c0_101] : memref<6272x184xbf16, #tpu.memory_space<vmem>>, vector<128x184xbf16>
    %cst_102 = arith.constant dense<0.000000e+00> : vector<8x184xf32>
    %195 = tpu.matmul %193, %194, %cst_102 {dimension_numbers = #tpu.dot_dimension_numbers<[1], [0], [0], [1], [0, 0, 1, 1], [], []>} : vector<8x128xbf16>, vector<128x184xbf16>, vector<8x184xf32> -> vector<8x184xf32>
    %196 = arith.addf %192, %195 : vector<8x184xf32>
    %197 = vector.extract_strided_slice %42 {offsets = [304, 0], sizes = [8, 128], strides = [1, 1]} : vector<392x128xbf16> to vector<8x128xbf16>
    %c4864 = arith.constant 4864 : index
    %c0_103 = arith.constant 0 : index
    %198 = vector.load %arg6[%c4864, %c0_103] : memref<6272x184xbf16, #tpu.memory_space<vmem>>, vector<128x184xbf16>
    %cst_104 = arith.constant dense<0.000000e+00> : vector<8x184xf32>
    %199 = tpu.matmul %197, %198, %cst_104 {dimension_numbers = #tpu.dot_dimension_numbers<[1], [0], [0], [1], [0, 0, 1, 1], [], []>} : vector<8x128xbf16>, vector<128x184xbf16>, vector<8x184xf32> -> vector<8x184xf32>
    %200 = arith.addf %196, %199 : vector<8x184xf32>
    %201 = vector.extract_strided_slice %42 {offsets = [312, 0], sizes = [8, 128], strides = [1, 1]} : vector<392x128xbf16> to vector<8x128xbf16>
    %c4992 = arith.constant 4992 : index
    %c0_105 = arith.constant 0 : index
    %202 = vector.load %arg6[%c4992, %c0_105] : memref<6272x184xbf16, #tpu.memory_space<vmem>>, vector<128x184xbf16>
    %cst_106 = arith.constant dense<0.000000e+00> : vector<8x184xf32>
    %203 = tpu.matmul %201, %202, %cst_106 {dimension_numbers = #tpu.dot_dimension_numbers<[1], [0], [0], [1], [0, 0, 1, 1], [], []>} : vector<8x128xbf16>, vector<128x184xbf16>, vector<8x184xf32> -> vector<8x184xf32>
    %204 = arith.addf %200, %203 : vector<8x184xf32>
    %205 = vector.extract_strided_slice %42 {offsets = [320, 0], sizes = [8, 128], strides = [1, 1]} : vector<392x128xbf16> to vector<8x128xbf16>
    %c5120 = arith.constant 5120 : index
    %c0_107 = arith.constant 0 : index
    %206 = vector.load %arg6[%c5120, %c0_107] : memref<6272x184xbf16, #tpu.memory_space<vmem>>, vector<128x184xbf16>
    %cst_108 = arith.constant dense<0.000000e+00> : vector<8x184xf32>
    %207 = tpu.matmul %205, %206, %cst_108 {dimension_numbers = #tpu.dot_dimension_numbers<[1], [0], [0], [1], [0, 0, 1, 1], [], []>} : vector<8x128xbf16>, vector<128x184xbf16>, vector<8x184xf32> -> vector<8x184xf32>
    %208 = arith.addf %204, %207 : vector<8x184xf32>
    %209 = vector.extract_strided_slice %42 {offsets = [328, 0], sizes = [8, 128], strides = [1, 1]} : vector<392x128xbf16> to vector<8x128xbf16>
    %c5248 = arith.constant 5248 : index
    %c0_109 = arith.constant 0 : index
    %210 = vector.load %arg6[%c5248, %c0_109] : memref<6272x184xbf16, #tpu.memory_space<vmem>>, vector<128x184xbf16>
    %cst_110 = arith.constant dense<0.000000e+00> : vector<8x184xf32>
    %211 = tpu.matmul %209, %210, %cst_110 {dimension_numbers = #tpu.dot_dimension_numbers<[1], [0], [0], [1], [0, 0, 1, 1], [], []>} : vector<8x128xbf16>, vector<128x184xbf16>, vector<8x184xf32> -> vector<8x184xf32>
    %212 = arith.addf %208, %211 : vector<8x184xf32>
    %213 = vector.extract_strided_slice %42 {offsets = [336, 0], sizes = [8, 128], strides = [1, 1]} : vector<392x128xbf16> to vector<8x128xbf16>
    %c5376 = arith.constant 5376 : index
    %c0_111 = arith.constant 0 : index
    %214 = vector.load %arg6[%c5376, %c0_111] : memref<6272x184xbf16, #tpu.memory_space<vmem>>, vector<128x184xbf16>
    %cst_112 = arith.constant dense<0.000000e+00> : vector<8x184xf32>
    %215 = tpu.matmul %213, %214, %cst_112 {dimension_numbers = #tpu.dot_dimension_numbers<[1], [0], [0], [1], [0, 0, 1, 1], [], []>} : vector<8x128xbf16>, vector<128x184xbf16>, vector<8x184xf32> -> vector<8x184xf32>
    %216 = arith.addf %212, %215 : vector<8x184xf32>
    %217 = vector.extract_strided_slice %42 {offsets = [344, 0], sizes = [8, 128], strides = [1, 1]} : vector<392x128xbf16> to vector<8x128xbf16>
    %c5504 = arith.constant 5504 : index
    %c0_113 = arith.constant 0 : index
    %218 = vector.load %arg6[%c5504, %c0_113] : memref<6272x184xbf16, #tpu.memory_space<vmem>>, vector<128x184xbf16>
    %cst_114 = arith.constant dense<0.000000e+00> : vector<8x184xf32>
    %219 = tpu.matmul %217, %218, %cst_114 {dimension_numbers = #tpu.dot_dimension_numbers<[1], [0], [0], [1], [0, 0, 1, 1], [], []>} : vector<8x128xbf16>, vector<128x184xbf16>, vector<8x184xf32> -> vector<8x184xf32>
    %220 = arith.addf %216, %219 : vector<8x184xf32>
    %221 = vector.extract_strided_slice %42 {offsets = [352, 0], sizes = [8, 128], strides = [1, 1]} : vector<392x128xbf16> to vector<8x128xbf16>
    %c5632 = arith.constant 5632 : index
    %c0_115 = arith.constant 0 : index
    %222 = vector.load %arg6[%c5632, %c0_115] : memref<6272x184xbf16, #tpu.memory_space<vmem>>, vector<128x184xbf16>
    %cst_116 = arith.constant dense<0.000000e+00> : vector<8x184xf32>
    %223 = tpu.matmul %221, %222, %cst_116 {dimension_numbers = #tpu.dot_dimension_numbers<[1], [0], [0], [1], [0, 0, 1, 1], [], []>} : vector<8x128xbf16>, vector<128x184xbf16>, vector<8x184xf32> -> vector<8x184xf32>
    %224 = arith.addf %220, %223 : vector<8x184xf32>
    %225 = vector.extract_strided_slice %42 {offsets = [360, 0], sizes = [8, 128], strides = [1, 1]} : vector<392x128xbf16> to vector<8x128xbf16>
    %c5760 = arith.constant 5760 : index
    %c0_117 = arith.constant 0 : index
    %226 = vector.load %arg6[%c5760, %c0_117] : memref<6272x184xbf16, #tpu.memory_space<vmem>>, vector<128x184xbf16>
    %cst_118 = arith.constant dense<0.000000e+00> : vector<8x184xf32>
    %227 = tpu.matmul %225, %226, %cst_118 {dimension_numbers = #tpu.dot_dimension_numbers<[1], [0], [0], [1], [0, 0, 1, 1], [], []>} : vector<8x128xbf16>, vector<128x184xbf16>, vector<8x184xf32> -> vector<8x184xf32>
    %228 = arith.addf %224, %227 : vector<8x184xf32>
    %229 = vector.extract_strided_slice %42 {offsets = [368, 0], sizes = [8, 128], strides = [1, 1]} : vector<392x128xbf16> to vector<8x128xbf16>
    %c5888 = arith.constant 5888 : index
    %c0_119 = arith.constant 0 : index
    %230 = vector.load %arg6[%c5888, %c0_119] : memref<6272x184xbf16, #tpu.memory_space<vmem>>, vector<128x184xbf16>
    %cst_120 = arith.constant dense<0.000000e+00> : vector<8x184xf32>
    %231 = tpu.matmul %229, %230, %cst_120 {dimension_numbers = #tpu.dot_dimension_numbers<[1], [0], [0], [1], [0, 0, 1, 1], [], []>} : vector<8x128xbf16>, vector<128x184xbf16>, vector<8x184xf32> -> vector<8x184xf32>
    %232 = arith.addf %228, %231 : vector<8x184xf32>
    %233 = vector.extract_strided_slice %42 {offsets = [376, 0], sizes = [8, 128], strides = [1, 1]} : vector<392x128xbf16> to vector<8x128xbf16>
    %c6016 = arith.constant 6016 : index
    %c0_121 = arith.constant 0 : index
    %234 = vector.load %arg6[%c6016, %c0_121] : memref<6272x184xbf16, #tpu.memory_space<vmem>>, vector<128x184xbf16>
    %cst_122 = arith.constant dense<0.000000e+00> : vector<8x184xf32>
    %235 = tpu.matmul %233, %234, %cst_122 {dimension_numbers = #tpu.dot_dimension_numbers<[1], [0], [0], [1], [0, 0, 1, 1], [], []>} : vector<8x128xbf16>, vector<128x184xbf16>, vector<8x184xf32> -> vector<8x184xf32>
    %236 = arith.addf %232, %235 : vector<8x184xf32>
    %237 = vector.extract_strided_slice %42 {offsets = [384, 0], sizes = [8, 128], strides = [1, 1]} : vector<392x128xbf16> to vector<8x128xbf16>
    %c6144 = arith.constant 6144 : index
    %c0_123 = arith.constant 0 : index
    %238 = vector.load %arg6[%c6144, %c0_123] : memref<6272x184xbf16, #tpu.memory_space<vmem>>, vector<128x184xbf16>
    %cst_124 = arith.constant dense<0.000000e+00> : vector<8x184xf32>
    %239 = tpu.matmul %237, %238, %cst_124 {dimension_numbers = #tpu.dot_dimension_numbers<[1], [0], [0], [1], [0, 0, 1, 1], [], []>} : vector<8x128xbf16>, vector<128x184xbf16>, vector<8x184xf32> -> vector<8x184xf32>
    %240 = arith.addf %236, %239 : vector<8x184xf32>
    %cst_125 = arith.constant 0.000000e+00 : f32
    %241 = vector.broadcast %cst_125 : f32 to vector<8x184xf32>
    %242 = arith.maximumf %240, %241 : vector<8x184xf32>
    %243 = arith.truncf %242 : vector<8x184xf32> to vector<8x184xbf16>
    %c0_126 = arith.constant 0 : index
    %c0_127 = arith.constant 0 : index
    %244 = vector.load %arg8[%c0_126, %c0_127] : memref<184x80xbf16, #tpu.memory_space<vmem>>, vector<184x80xbf16>
    %cst_128 = arith.constant dense<0.000000e+00> : vector<8x80xf32>
    %245 = tpu.matmul %243, %244, %cst_128 {dimension_numbers = #tpu.dot_dimension_numbers<[1], [0], [0], [1], [0, 0, 1, 1], [], []>} : vector<8x184xbf16>, vector<184x80xbf16>, vector<8x80xf32> -> vector<8x80xf32>
    %c0_129 = arith.constant 0 : index
    %c0_130 = arith.constant 0 : index
    %246 = vector.load %arg9[%c0_129, %c0_130] : memref<1x80xf32, #tpu.memory_space<vmem>>, vector<1x80xf32>
    %247 = vector.broadcast %246 : vector<1x80xf32> to vector<8x80xf32>
    %248 = arith.addf %245, %247 : vector<8x80xf32>
    %cst_131 = arith.constant 0.000000e+00 : f32
    %249 = vector.broadcast %cst_131 : f32 to vector<8x80xf32>
    %250 = arith.maximumf %248, %249 : vector<8x80xf32>
    %251 = arith.truncf %250 : vector<8x80xf32> to vector<8x80xbf16>
    %c0_132 = arith.constant 0 : index
    %c0_133 = arith.constant 0 : index
    %252 = vector.load %arg10[%c0_132, %c0_133] : memref<80x10xbf16, #tpu.memory_space<vmem>>, vector<80x10xbf16>
    %cst_134 = arith.constant dense<0.000000e+00> : vector<8x10xf32>
    %253 = tpu.matmul %251, %252, %cst_134 {dimension_numbers = #tpu.dot_dimension_numbers<[1], [0], [0], [1], [0, 0, 1, 1], [], []>} : vector<8x80xbf16>, vector<80x10xbf16>, vector<8x10xf32> -> vector<8x10xf32>
    %c0_135 = arith.constant 0 : index
    %c0_136 = arith.constant 0 : index
    %254 = vector.load %arg11[%c0_135, %c0_136] : memref<1x10xf32, #tpu.memory_space<vmem>>, vector<1x10xf32>
    %255 = vector.broadcast %254 : vector<1x10xf32> to vector<8x10xf32>
    %256 = arith.addf %253, %255 : vector<8x10xf32>
    %cst_137 = arith.constant 0.000000e+00 : f32
    %257 = vector.broadcast %cst_137 : f32 to vector<8x10xf32>
    %258 = arith.maximumf %256, %257 : vector<8x10xf32>
    %c0_138 = arith.constant 0 : index
    %c0_139 = arith.constant 0 : index
    %259 = vector.load %arg12[%c0_138, %c0_139] : memref<1x10xf32, #tpu.memory_space<vmem>>, vector<1x10xf32>
    %260 = vector.broadcast %259 : vector<1x10xf32> to vector<8x10xf32>
    %261 = arith.mulf %258, %260 : vector<8x10xf32>
    %cst_140 = arith.constant dense<0.000000e+00> : vector<8xf32>
    %262 = vector.multi_reduction <add>, %261, %cst_140 [1] : vector<8x10xf32> to vector<8xf32>
    %263 = vector.shape_cast %262 : vector<8xf32> to vector<8x1xf32>
    %c0_141 = arith.constant 0 : index
    %c0_142 = arith.constant 0 : index
    %264 = vector.load %arg13[%c0_141, %c0_142] : memref<1x1xf32, #tpu.memory_space<vmem>>, vector<1x1xf32>
    %265 = vector.broadcast %264 : vector<1x1xf32> to vector<8x1xf32>
    %266 = arith.addf %263, %265 : vector<8x1xf32>
    %267 = vector.extract_strided_slice %266 {offsets = [0, 0], sizes = [2, 1], strides = [1, 1]} : vector<8x1xf32> to vector<2x1xf32>
    %c0_143 = arith.constant 0 : index
    %c0_144 = arith.constant 0 : index
    %268 = vector.load %arg14[%c0_143, %c0_144] : memref<2x1xf32, #tpu.memory_space<vmem>>, vector<2x1xf32>
    tpu.vector_store %arg14[%c0_143, %c0_144], %267 {strides = array<i32>} : memref<2x1xf32, #tpu.memory_space<vmem>>, vector<2x1xf32>,
    return
  }
  func.func @transform_0(%arg0: i32) -> (i32, i32) {
    %c0_i32 = arith.constant 0 : i32
    %c0_i32_0 = arith.constant 0 : i32
    %c0_i32_1 = arith.constant 0 : i32
    return %c0_i32, %c0_i32_0 : i32, i32
  }
  func.func @transform_1(%arg0: i32) -> (i32, i32) {
    %c0_i32 = arith.constant 0 : i32
    %c0_i32_0 = arith.constant 0 : i32
    %c0_i32_1 = arith.constant 0 : i32
    return %c0_i32, %c0_i32_0 : i32, i32
  }
  func.func @transform_2(%arg0: i32) -> (i32, i32) {
    %c0_i32 = arith.constant 0 : i32
    %c0_i32_0 = arith.constant 0 : i32
    %c0_i32_1 = arith.constant 0 : i32
    return %c0_i32, %c0_i32_0 : i32, i32
  }
  func.func @transform_3(%arg0: i32) -> (i32, i32, i32) {
    %c0_i32 = arith.constant 0 : i32
    %c0_i32_0 = arith.constant 0 : i32
    %c0_i32_1 = arith.constant 0 : i32
    %c0_i32_2 = arith.constant 0 : i32
    return %c0_i32, %c0_i32_0, %c0_i32_1 : i32, i32, i32
  }
  func.func @transform_4(%arg0: i32) -> (i32, i32) {
    %c0_i32 = arith.constant 0 : i32
    %c0_i32_0 = arith.constant 0 : i32
    %c0_i32_1 = arith.constant 0 : i32
    return %c0_i32, %c0_i32_0 : i32, i32
  }
  func.func @transform_5(%arg0: i32) -> (i32, i32) {
    %c0_i32 = arith.constant 0 : i32
    %c0_i32_0 = arith.constant 0 : i32
    %c0_i32_1 = arith.constant 0 : i32
    return %c0_i32, %c0_i32_0 : i32, i32
  }
  func.func @transform_6(%arg0: i32) -> (i32, i32) {
    %c0_i32 = arith.constant 0 : i32
    %c0_i32_0 = arith.constant 0 : i32
    %c0_i32_1 = arith.constant 0 : i32
    return %c0_i32, %c0_i32_0 : i32, i32
  }
  func.func @transform_7(%arg0: i32) -> (i32, i32) {
    %c0_i32 = arith.constant 0 : i32
    %c0_i32_0 = arith.constant 0 : i32
    %c0_i32_1 = arith.constant 0 : i32
    return %c0_i32, %c0_i32_0 : i32, i32
  }
  func.func @transform_8(%arg0: i32) -> (i32, i32) {
    %c0_i32 = arith.constant 0 : i32
    %c0_i32_0 = arith.constant 0 : i32
    %c0_i32_1 = arith.constant 0 : i32
    return %c0_i32, %c0_i32_0 : i32, i32
  }
  func.func @transform_9(%arg0: i32) -> (i32, i32) {
    %c0_i32 = arith.constant 0 : i32
    %c0_i32_0 = arith.constant 0 : i32
    %c0_i32_1 = arith.constant 0 : i32
    return %c0_i32, %c0_i32_0 : i32, i32
  }
  func.func @transform_10(%arg0: i32) -> (i32, i32) {
    %c0_i32 = arith.constant 0 : i32
    %c0_i32_0 = arith.constant 0 : i32
    %c0_i32_1 = arith.constant 0 : i32
    return %c0_i32, %c0_i32_0 : i32, i32
  }
  func.func @transform_11(%arg0: i32) -> (i32, i32) {
    %c0_i32 = arith.constant 0 : i32
    %c0_i32_0 = arith.constant 0 : i32
    %c0_i32_1 = arith.constant 0 : i32
    return %c0_i32, %c0_i32_0 : i32, i32
  }
  func.func @transform_12(%arg0: i32) -> (i32, i32) {
    %c0_i32 = arith.constant 0 : i32
    %c0_i32_0 = arith.constant 0 : i32
    %c0_i32_1 = arith.constant 0 : i32
    return %c0_i32, %c0_i32_0 : i32, i32
  }
  func.func @transform_13(%arg0: i32) -> (i32, i32) {
    %c0_i32 = arith.constant 0 : i32
    %c0_i32_0 = arith.constant 0 : i32
    %c0_i32_1 = arith.constant 0 : i32
    return %c0_i32, %c0_i32_0 : i32, i32
  }
}

</mosaic_0001>

<bundles_post_ra>
// kernel: net_forward.1
= control target key start
LH: loop header
LB: loop body
LE: loop exit
PB: predicated region body
PF: predicated region fallthrough
CT: control target
= control target key end

     0   :  { %v12794_v0 = vmov 0   ;;  %v12795_v4 = vmov 0.0   ;;  %vm12796_vm0 = vmmov 0   ;;  %vm1403_vm1 = vcmask 523264   ;;  %s16357_s0 = inlined_call_operand.vmem [shape: f32[424,1], index: 0, kind: input, shape index: {}]   ;;  %s16358_s3 = inlined_call_operand.vmem [shape: bf16[3,64,128], index: 3, kind: input, shape index: {}]   ;;  %s16359_s1 = inlined_call_operand.vmem [shape: f32[3,64], index: 1, kind: input, shape index: {}]   ;;  %s16360_s2 = inlined_call_operand.vmem [shape: f32[1,64], index: 2, kind: input, shape index: {}]   ;;  %s16361_s5 = inlined_call_operand.vmem [shape: bf16[6272,184], index: 5, kind: input, shape index: {}]   ;;  %s16362_s4 = inlined_call_operand.vmem [shape: f32[1,128], index: 4, kind: input, shape index: {}]   ;;  %s16363_s7 = inlined_call_operand.vmem [shape: bf16[184,80], index: 7, kind: input, shape index: {}]   ;;  %s16364_s9 = inlined_call_operand.vmem [shape: bf16[80,10], index: 9, kind: input, shape index: {}]   ;;  %s16365_s6 = inlined_call_operand.vmem [shape: f32[1,184], index: 6, kind: input, shape index: {}]   ;;  %s16366_s8 = inlined_call_operand.vmem [shape: f32[1,80], index: 8, kind: input, shape index: {}]   ;;  %s16367_s12 = inlined_call_operand.<no memory space> [shape: f32[1,1], index: 12, kind: input, shape index: {}]   ;;  %s16368_s10 = inlined_call_operand.vmem [shape: f32[1,10], index: 10, kind: input, shape index: {}]   ;;  %s16369_s11 = inlined_call_operand.vmem [shape: f32[1,10], index: 11, kind: input, shape index: {}]   ;;  %s16370_s13 = inlined_call_operand.vmem [shape: f32[2,1], index: 13, kind: output, shape index: {}]  }
   0x1   :  { %11578 = vset.pattern.permute.xlu1 %v12794_v0  ;;  %11577 = vset.pattern.permute.xlu0 %v12794_v0  ;;  %v467_v1 = vld [vmem:[%s16357_s0 + $0x8] sm:$0xff]  ;;  %v48_v2 = vld [vmem:[%s16357_s0] sm:$0xff]  ;;  %v468_v3 = vld [vmem:[%s16357_s0 + $0x10] sm:$0xff]  ;;  %vm1800_vm2 = vcmask 1043456   ;;  %vm9619_vm3 = vcmask 457728   ;;  %vm9716_vm4 = vcmask 654336  }
   0x2   :  { %521 = vperm.xlu1 %11578, %v467_v1   ;;  %102 = vperm.xlu0 %11577, %v48_v2   ;;  %v881_v5 = vld [vmem:[%s16357_s0 + $0x18] sm:$0xff]  ;;  %v11579_v6 = vld [vmem:[%s16358_s3] sm:$0xff]   ;;  %v11580_v7 = vld [vmem:[%s16358_s3 + $0x8] sm:$0xff]   ;;  %vm9769_vm5 = vcmask 80896   ;;  %vm9781_vm6 = vcmask 1024  }
   0x3   :  { %10795 = vmatprep.subr.bf16.mxu0 %v12795_v4  ;;  %4728 = vmatprep.mubr.bf16.mxu1 %v12794_v0  ;;  %v470_v8 = vld [vmem:[%s16357_s0 + $0x20] sm:$0xff]  ;;  %v11581_v9 = vld [vmem:[%s16358_s3 + $0x10] sm:$0xff]   ;;  %v883_v10 = vld [vmem:[%s16357_s0 + $0x28] sm:$0xff] }
   0x4   :  { %10796 = vmatpush3.bf16.msra.mxu0 %v11579_v6  ;;  %10803 = vmatprep.mubr.msk.bf16.mxu0 %vm12796_vm0, %v12795_v4  ;;  %v11582_v11 = vld [vmem:[%s16358_s3 + $0x18] sm:$0xff]   ;;  %v472_v12 = vld [vmem:[%s16357_s0 + $0x30] sm:$0xff]  ;;  %v474_v14 = vld [vmem:[%s16357_s0 + $0x40] sm:$0xff] }
   0x5   :  { %10797 = vmatprep.subr.bf16.mxu0 %v12795_v4  ;;  %v885_v13 = vld [vmem:[%s16357_s0 + $0x38] sm:$0xff]  ;;  %v887_v15 = vld [vmem:[%s16357_s0 + $0x48] sm:$0xff]  ;;  %v476_v16 = vld [vmem:[%s16357_s0 + $0x50] sm:$0xff] }
   0x6   :  { %526 = vperm.xlu1 %11578, %v468_v3   ;;  %107 = vperm.xlu0 %11577, %v467_v1   ;;  %v889_v17 = vld [vmem:[%s16357_s0 + $0x58] sm:$0xff]  ;;  %v478_v18 = vld [vmem:[%s16357_s0 + $0x60] sm:$0xff]  ;;  %v891_v19 = vld [vmem:[%s16357_s0 + $0x68] sm:$0xff] }
   0x7   :  { %v480_v20 = vld [vmem:[%s16357_s0 + $0x70] sm:$0xff]  ;;  %v893_v21 = vld [vmem:[%s16357_s0 + $0x78] sm:$0xff]  ;;  %v482_v22 = vld [vmem:[%s16357_s0 + $0x80] sm:$0xff] }
   0x8   :  { %10798 = vmatpush3.bf16.msra.mxu0 %v11580_v7  ;;  %v895_v23 = vld [vmem:[%s16357_s0 + $0x88] sm:$0xff]  ;;  %v484_v24 = vld [vmem:[%s16357_s0 + $0x90] sm:$0xff]  ;;  %v897_v25 = vld [vmem:[%s16357_s0 + $0x98] sm:$0xff] }
   0x9   :  { %10799 = vmatprep.subr.bf16.mxu0 %v12795_v4  ;;  %v486_v26 = vld [vmem:[%s16357_s0 + $0xa0] sm:$0xff]  ;;  %v899_v27 = vld [vmem:[%s16357_s0 + $0xa8] sm:$0xff]  ;;  %v488_v28 = vld [vmem:[%s16357_s0 + $0xb0] sm:$0xff] }
   0xa   :  { %939 = vperm.xlu1 %11578, %v881_v5   ;;  %934 = vperm.xlu0 %11577, %v468_v3   ;;  %v12961_v29 = vld [vmem:[%s16359_s1] ss:$0 sm:$0xff]  ;;  %v901_v30 = vld [vmem:[%s16357_s0 + $0xb8] sm:$0xff]  ;;  %v12975_v35 = vld [vmem:[%s16359_s1 + $0x1] ss:$0 sm:$0xff] }
   0xb   :  { %v12969_v33 = vld [vmem:[%s16360_s2] ss:$0 sm:$0xff]  ;;  %v12983_v41 = vld [vmem:[%s16359_s1 + $0x2] ss:$0 sm:$0xff]  ;;  %v903_v51 = vld [vmem:[%s16357_s0 + $0xc8] sm:$0xff] }
   0xc   :  { %10800 = vmatpush3.bf16.msra.mxu0 %v11581_v9  ;;  %v490_v42 = vld [vmem:[%s16357_s0 + $0xc0] sm:$0xff] }
   0xd   :  { %10801 = vmatprep.subr.bf16.mxu0 %v12795_v4  ;;  %v11583_v61 = vld [vmem:[%s16358_s3 + $0x20] sm:$0xff]  }
   0xe   :  { %117 = vperm.xlu1 %11578, %v881_v5   ;;  %112 = vperm.xlu0 %11577, %v468_v3  }
  0x10   :  { %10802 = vmatpush3.bf16.msra.mxu0 %v11582_v11 }
  0x11   :  { %10903 = vmatprep.subr.bf16.mxu0 %v12795_v4 }
  0x12   :  { %536 = vperm.xlu1 %11578, %v470_v8   ;;  %531 = vperm.xlu0 %11577, %v881_v5   ;;  %v492_v5 = vld [vmem:[%s16357_s0 + $0xd0] sm:$0xff] }
  0x16   :  { %949 = vperm.xlu1 %11578, %v883_v10   ;;  %944 = vperm.xlu0 %11577, %v470_v8  }
  0x1a   :  { %127 = vperm.xlu1 %11578, %v883_v10   ;;  %122 = vperm.xlu0 %11577, %v470_v8  }
  0x1e   :  { %546 = vperm.xlu1 %11578, %v472_v12   ;;  %541 = vperm.xlu0 %11577, %v883_v10  }
  0x22   :  { %959 = vperm.xlu1 %11578, %v885_v13   ;;  %954 = vperm.xlu0 %11577, %v472_v12  }
  0x26   :  { %137 = vperm.xlu1 %11578, %v885_v13   ;;  %132 = vperm.xlu0 %11577, %v472_v12  }
  0x2a   :  { %556 = vperm.xlu1 %11578, %v474_v14   ;;  %551 = vperm.xlu0 %11577, %v885_v13   ;;  %v905_v13 = vld [vmem:[%s16357_s0 + $0xd8] sm:$0xff] }
  0x2e   :  { %969 = vperm.xlu1 %11578, %v887_v15   ;;  %964 = vperm.xlu0 %11577, %v474_v14  }
  0x32   :  { %147 = vperm.xlu1 %11578, %v887_v15   ;;  %142 = vperm.xlu0 %11577, %v474_v14  }
  0x36   :  { %566 = vperm.xlu1 %11578, %v476_v16   ;;  %561 = vperm.xlu0 %11577, %v887_v15  }
  0x3a   :  { %979 = vperm.xlu1 %11578, %v889_v17   ;;  %974 = vperm.xlu0 %11577, %v476_v16  }
  0x3e   :  { %157 = vperm.xlu1 %11578, %v889_v17   ;;  %152 = vperm.xlu0 %11577, %v476_v16  }
  0x42   :  { %576 = vperm.xlu1 %11578, %v478_v18   ;;  %571 = vperm.xlu0 %11577, %v889_v17  }
  0x46   :  { %989 = vperm.xlu1 %11578, %v891_v19   ;;  %984 = vperm.xlu0 %11577, %v478_v18  }
  0x4a   :  { %167 = vperm.xlu1 %11578, %v891_v19   ;;  %162 = vperm.xlu0 %11577, %v478_v18  }
  0x4e   :  { %586 = vperm.xlu1 %11578, %v480_v20   ;;  %581 = vperm.xlu0 %11577, %v891_v19  }
  0x52   :  { %999 = vperm.xlu1 %11578, %v893_v21   ;;  %994 = vperm.xlu0 %11577, %v480_v20  }
  0x56   :  { %177 = vperm.xlu1 %11578, %v893_v21   ;;  %172 = vperm.xlu0 %11577, %v480_v20  }
  0x5a   :  { %596 = vperm.xlu1 %11578, %v482_v22   ;;  %591 = vperm.xlu0 %11577, %v893_v21  }
  0x5e   :  { %1009 = vperm.xlu1 %11578, %v895_v23   ;;  %1004 = vperm.xlu0 %11577, %v482_v22  }
  0x62   :  { %187 = vperm.xlu1 %11578, %v895_v23   ;;  %182 = vperm.xlu0 %11577, %v482_v22  }
  0x66   :  { %606 = vperm.xlu1 %11578, %v484_v24   ;;  %601 = vperm.xlu0 %11577, %v895_v23  }
  0x6a   :  { %1019 = vperm.xlu1 %11578, %v897_v25   ;;  %1014 = vperm.xlu0 %11577, %v484_v24  }
  0x6e   :  { %197 = vperm.xlu1 %11578, %v897_v25   ;;  %192 = vperm.xlu0 %11577, %v484_v24  }
  0x72   :  { %616 = vperm.xlu1 %11578, %v486_v26   ;;  %611 = vperm.xlu0 %11577, %v897_v25  }
  0x76   :  { %1029 = vperm.xlu1 %11578, %v899_v27   ;;  %1024 = vperm.xlu0 %11577, %v486_v26  }
  0x7a   :  { %207 = vperm.xlu1 %11578, %v899_v27   ;;  %202 = vperm.xlu0 %11577, %v486_v26  }
  0x7e   :  { %626 = vperm.xlu1 %11578, %v488_v28   ;;  %621 = vperm.xlu0 %11577, %v899_v27  }
  0x81   :  { %v522_v31 = vpop.permute.xlu1 %521  ;;  %v103_v32 = vpop.permute.xlu0 %102 }
  0x82   :  { %v359_v34 = vmul.f32 %v12961_v29, %v103_v32  ;;  %1039 = vperm.xlu1 %11578, %v901_v30   ;;  %1034 = vperm.xlu0 %11577, %v488_v28   ;;  %v778_v40 = vmul.f32 %v12975_v35, %v522_v31 }
  0x84   :  { %v416_v36 = vadd.f32 %v12969_v33, %v359_v34 }
  0x85   :  { %v527_v37 = vpop.permute.xlu1 %526  ;;  %v108_v38 = vpop.permute.xlu0 %107 }
  0x86   :  { %v360_v39 = vmul.f32 %v12961_v29, %v108_v38  ;;  %217 = vperm.xlu1 %11578, %v901_v30   ;;  %212 = vperm.xlu0 %11577, %v488_v28   ;;  %v779_v43 = vmul.f32 %v12975_v35, %v527_v37  ;;  %v829_v46 = vadd.f32 %v778_v40, %v416_v36  ;;  %v494_v28 = vld [vmem:[%s16357_s0 + $0xe0] sm:$0xff] }
  0x88   :  { %v417_v44 = vadd.f32 %v12969_v33, %v360_v39  ;;  %v907_v39 = vld [vmem:[%s16357_s0 + $0xe8] sm:$0xff] }
  0x89   :  { %v940_v45 = vpop.permute.xlu1 %939  ;;  %v935_v47 = vpop.permute.xlu0 %934 }
  0x8a   :  { %v830_v48 = vadd.f32 %v779_v43, %v417_v44  ;;  %v1192_v49 = vmul.f32 %v12983_v41, %v940_v45  ;;  %v1191_v50 = vmul.f32 %v12983_v41, %v935_v47  ;;  %636 = vperm.xlu1 %11578, %v490_v42   ;;  %631 = vperm.xlu0 %11577, %v901_v30   ;;  %v11584_v43 = vld [vmem:[%s16358_s3 + $0x28] sm:$0xff]  }
  0x8c   :  { %v1243_v52 = vadd.f32 %v1192_v49, %v830_v48  ;;  %v1242_v53 = vadd.f32 %v1191_v50, %v829_v46 }
  0x8d   :  { %v118_v54 = vpop.permute.xlu1 %117  ;;  %v113_v55 = vpop.permute.xlu0 %112 }
  0x8e   :  { %v1294_v56 = vmax.f32 %v1243_v52, 0.0  ;;  %v1293_v57 = vmax.f32 %v1242_v53, 0.0  ;;  %1049 = vperm.xlu1 %11578, %v903_v51   ;;  %1044 = vperm.xlu0 %11577, %v490_v42   ;;  %v362_v58 = vmul.f32 %v12961_v29, %v118_v54  ;;  %v361_v60 = vmul.f32 %v12961_v29, %v113_v55 }
  0x90   :  { %v12996_v59 = vpack.c.bf16 %v1294_v56, %v1293_v57  ;;  %v419_v3 = vadd.f32 %v12969_v33, %v362_v58  ;;  %v418_v6 = vadd.f32 %v12969_v33, %v361_v60  ;;  %v496_v56 = vld [vmem:[%s16357_s0 + $0xf0] sm:$0xff] }
  0x91   :  { %v537_v62 = vpop.permute.xlu1 %536  ;;  %v532_v63 = vpop.permute.xlu0 %531 }
  0x92   :  { %v781_v1 = vmul.f32 %v12975_v35, %v537_v62  ;;  %v780_v2 = vmul.f32 %v12975_v35, %v532_v63  ;;  %227 = vperm.xlu1 %11578, %v903_v51   ;;  %222 = vperm.xlu0 %11577, %v490_v42  }
  0x93   :  { %10804 = vmatmul.mubr.msk.bf16.vlgmr.msra.gmra.mrb[0].mxu0 %vm1403_vm1, %v12996_v59 }
  0x94   :  { %10807 = vmatprep.mubr.msk.bf16.mxu0 %vm12796_vm0, %v12795_v4  ;;  %10904 = vmatpush3.bf16.msra.mxu0 %v11583_v61  ;;  %v832_v7 = vadd.f32 %v781_v1, %v419_v3  ;;  %v831_v10 = vadd.f32 %v780_v2, %v418_v6  ;;  %v909_v2 = vld [vmem:[%s16357_s0 + $0xf8] sm:$0xff] }
  0x95   :  { %v950_v8 = vpop.permute.xlu1 %949  ;;  %v945_v9 = vpop.permute.xlu0 %944  ;;  %10905 = vmatprep.subr.bf16.mxu0 %v12795_v4 }
  0x96   :  { %v1194_v11 = vmul.f32 %v12983_v41, %v950_v8  ;;  %v1193_v12 = vmul.f32 %v12983_v41, %v945_v9  ;;  %646 = vperm.xlu1 %11578, %v492_v5   ;;  %641 = vperm.xlu0 %11577, %v903_v51  }
  0x98   :  { %v1245_v14 = vadd.f32 %v1194_v11, %v832_v7  ;;  %v1244_v15 = vadd.f32 %v1193_v12, %v831_v10  ;;  %10906 = vmatpush3.bf16.msra.mxu0 %v11584_v43 }
  0x99   :  { %v128_v16 = vpop.permute.xlu1 %127  ;;  %v123_v17 = vpop.permute.xlu0 %122  ;;  %10907 = vmatprep.subr.bf16.mxu0 %v12795_v4 }
  0x9a   :  { %v1296_v18 = vmax.f32 %v1245_v14, 0.0  ;;  %v1295_v19 = vmax.f32 %v1244_v15, 0.0  ;;  %1059 = vperm.xlu1 %11578, %v905_v13   ;;  %1054 = vperm.xlu0 %11577, %v492_v5   ;;  %v364_v20 = vmul.f32 %v12961_v29, %v128_v16  ;;  %v363_v22 = vmul.f32 %v12961_v29, %v123_v17 }
  0x9c   :  { %v13020_v21 = vpack.c.bf16 %v1296_v18, %v1295_v19  ;;  %v421_v27 = vadd.f32 %v12969_v33, %v364_v20  ;;  %v420_v30 = vadd.f32 %v12969_v33, %v363_v22  ;;  %v498_v18 = vld [vmem:[%s16357_s0 + $0x100] sm:$0xff] }
  0x9d   :  { %v547_v23 = vpop.permute.xlu1 %546  ;;  %v542_v24 = vpop.permute.xlu0 %541 }
  0x9e   :  { %v783_v25 = vmul.f32 %v12975_v35, %v547_v23  ;;  %v782_v26 = vmul.f32 %v12975_v35, %v542_v24  ;;  %237 = vperm.xlu1 %11578, %v905_v13   ;;  %232 = vperm.xlu0 %11577, %v492_v5  }
  0x9f   :  { %10808 = vmatmul.mubr.msk.bf16.gmra.mrb[4].mxu0 %vm1403_vm1, %v13020_v21 }
  0xa0   :  { %10811 = vmatprep.mubr.msk.bf16.mxu0 %vm12796_vm0, %v12795_v4  ;;  %v834_v31 = vadd.f32 %v783_v25, %v421_v27  ;;  %v833_v36 = vadd.f32 %v782_v26, %v420_v30  ;;  %v911_v27 = vld [vmem:[%s16357_s0 + $0x108] sm:$0xff] }
  0xa1   :  { %v960_v32 = vpop.permute.xlu1 %959  ;;  %v955_v34 = vpop.permute.xlu0 %954 }
  0xa2   :  { %v1196_v37 = vmul.f32 %v12983_v41, %v960_v32  ;;  %v1195_v38 = vmul.f32 %v12983_v41, %v955_v34  ;;  %656 = vperm.xlu1 %11578, %v494_v28   ;;  %651 = vperm.xlu0 %11577, %v905_v13  }
  0xa4   :  { %v1247_v40 = vadd.f32 %v1196_v37, %v834_v31  ;;  %v1246_v42 = vadd.f32 %v1195_v38, %v833_v36 }
  0xa5   :  { %v138_v44 = vpop.permute.xlu1 %137  ;;  %v133_v45 = vpop.permute.xlu0 %132 }
  0xa6   :  { %v1298_v46 = vmax.f32 %v1247_v40, 0.0  ;;  %v1297_v47 = vmax.f32 %v1246_v42, 0.0  ;;  %1069 = vperm.xlu1 %11578, %v907_v39   ;;  %1064 = vperm.xlu0 %11577, %v494_v28   ;;  %v366_v48 = vmul.f32 %v12961_v29, %v138_v44  ;;  %v365_v50 = vmul.f32 %v12961_v29, %v133_v45 }
  0xa8   :  { %v13043_v49 = vpack.c.bf16 %v1298_v46, %v1297_v47  ;;  %v423_v55 = vadd.f32 %v12969_v33, %v366_v48  ;;  %v422_v57 = vadd.f32 %v12969_v33, %v365_v50  ;;  %v500_v46 = vld [vmem:[%s16357_s0 + $0x110] sm:$0xff] }
  0xa9   :  { %v557_v51 = vpop.permute.xlu1 %556  ;;  %v552_v52 = vpop.permute.xlu0 %551 }
  0xaa   :  { %v785_v53 = vmul.f32 %v12975_v35, %v557_v51  ;;  %v784_v54 = vmul.f32 %v12975_v35, %v552_v52  ;;  %247 = vperm.xlu1 %11578, %v907_v39   ;;  %242 = vperm.xlu0 %11577, %v494_v28  }
  0xab   :  { %10812 = vmatmul.mubr.msk.bf16.gmra.mrb[8].mxu0 %vm1403_vm1, %v13043_v49 }
  0xac   :  { %10815 = vmatprep.mubr.msk.bf16.mxu0 %vm12796_vm0, %v12795_v4  ;;  %v836_v58 = vadd.f32 %v785_v53, %v423_v55  ;;  %v835_v62 = vadd.f32 %v784_v54, %v422_v57  ;;  %v913_v55 = vld [vmem:[%s16357_s0 + $0x118] sm:$0xff] }
  0xad   :  { %v970_v60 = vpop.permute.xlu1 %969  ;;  %v965_v61 = vpop.permute.xlu0 %964 }
  0xae   :  { %v1198_v63 = vmul.f32 %v12983_v41, %v970_v60  ;;  %v1197_v1 = vmul.f32 %v12983_v41, %v965_v61  ;;  %666 = vperm.xlu1 %11578, %v496_v56   ;;  %661 = vperm.xlu0 %11577, %v907_v39  }
  0xb0   :  { %v1249_v3 = vadd.f32 %v1198_v63, %v836_v58  ;;  %v1248_v5 = vadd.f32 %v1197_v1, %v835_v62 }
  0xb1   :  { %v148_v6 = vpop.permute.xlu1 %147  ;;  %v143_v7 = vpop.permute.xlu0 %142 }
  0xb2   :  { %v1300_v8 = vmax.f32 %v1249_v3, 0.0  ;;  %v1299_v9 = vmax.f32 %v1248_v5, 0.0  ;;  %1079 = vperm.xlu1 %11578, %v909_v2   ;;  %1074 = vperm.xlu0 %11577, %v496_v56   ;;  %v368_v10 = vmul.f32 %v12961_v29, %v148_v6  ;;  %v367_v12 = vmul.f32 %v12961_v29, %v143_v7 }
  0xb4   :  { %v13064_v11 = vpack.c.bf16 %v1300_v8, %v1299_v9  ;;  %v425_v17 = vadd.f32 %v12969_v33, %v368_v10  ;;  %v424_v19 = vadd.f32 %v12969_v33, %v367_v12  ;;  %v502_v9 = vld [vmem:[%s16357_s0 + $0x120] sm:$0xff] }
  0xb5   :  { %v567_v13 = vpop.permute.xlu1 %566  ;;  %v562_v14 = vpop.permute.xlu0 %561 }
  0xb6   :  { %v787_v15 = vmul.f32 %v12975_v35, %v567_v13  ;;  %v786_v16 = vmul.f32 %v12975_v35, %v562_v14  ;;  %257 = vperm.xlu1 %11578, %v909_v2   ;;  %252 = vperm.xlu0 %11577, %v496_v56  }
  0xb7   :  { %10816 = vmatmul.mubr.msk.bf16.gmra.mrb[12].mxu0 %vm1403_vm1, %v13064_v11 }
  0xb8   :  { %10819 = vmatprep.mubr.msk.bf16.mxu0 %vm12796_vm0, %v12795_v4  ;;  %v838_v20 = vadd.f32 %v787_v15, %v425_v17  ;;  %v837_v24 = vadd.f32 %v786_v16, %v424_v19 }
  0xb9   :  { %v980_v22 = vpop.permute.xlu1 %979  ;;  %v975_v23 = vpop.permute.xlu0 %974 }
  0xba   :  { %v1200_v25 = vmul.f32 %v12983_v41, %v980_v22  ;;  %v1199_v26 = vmul.f32 %v12983_v41, %v975_v23  ;;  %676 = vperm.xlu1 %11578, %v498_v18   ;;  %671 = vperm.xlu0 %11577, %v909_v2  }
  0xbc   :  { %v1251_v28 = vadd.f32 %v1200_v25, %v838_v20  ;;  %v1250_v30 = vadd.f32 %v1199_v26, %v837_v24 }
  0xbd   :  { %v158_v31 = vpop.permute.xlu1 %157  ;;  %v153_v32 = vpop.permute.xlu0 %152 }
  0xbe   :  { %v1302_v34 = vmax.f32 %v1251_v28, 0.0  ;;  %v1301_v36 = vmax.f32 %v1250_v30, 0.0  ;;  %1089 = vperm.xlu1 %11578, %v911_v27   ;;  %1084 = vperm.xlu0 %11577, %v498_v18   ;;  %v370_v37 = vmul.f32 %v12961_v29, %v158_v31  ;;  %v369_v39 = vmul.f32 %v12961_v29, %v153_v32 }
  0xc0   :  { %v13084_v38 = vpack.c.bf16 %v1302_v34, %v1301_v36  ;;  %v427_v45 = vadd.f32 %v12969_v33, %v370_v37  ;;  %v426_v47 = vadd.f32 %v12969_v33, %v369_v39  ;;  %v504_v37 = vld [vmem:[%s16357_s0 + $0x130] sm:$0xff] }
  0xc1   :  { %v577_v40 = vpop.permute.xlu1 %576  ;;  %v572_v42 = vpop.permute.xlu0 %571 }
  0xc2   :  { %v789_v43 = vmul.f32 %v12975_v35, %v577_v40  ;;  %v788_v44 = vmul.f32 %v12975_v35, %v572_v42  ;;  %267 = vperm.xlu1 %11578, %v911_v27   ;;  %262 = vperm.xlu0 %11577, %v498_v18   ;;  %v915_v18 = vld [vmem:[%s16357_s0 + $0x128] sm:$0xff]  ;;  %v11585_v40 = vld [vmem:[%s16358_s3 + $0x30] sm:$0xff]  }
  0xc3   :  { %10820 = vmatmul.mubr.msk.bf16.gmra.mrb[16].mxu0 %vm1403_vm1, %v13084_v38 }
  0xc4   :  { %10823 = vmatprep.mubr.msk.bf16.mxu0 %vm12796_vm0, %v12795_v4  ;;  %v840_v48 = vadd.f32 %v789_v43, %v427_v45  ;;  %v839_v52 = vadd.f32 %v788_v44, %v426_v47  ;;  %10908 = vmatpush3.bf16.msra.mxu0 %v11585_v40 }
  0xc5   :  { %v990_v50 = vpop.permute.xlu1 %989  ;;  %v985_v51 = vpop.permute.xlu0 %984  ;;  %10909 = vmatprep.subr.bf16.mxu0 %v12795_v4 }
  0xc6   :  { %v1202_v53 = vmul.f32 %v12983_v41, %v990_v50  ;;  %v1201_v54 = vmul.f32 %v12983_v41, %v985_v51  ;;  %686 = vperm.xlu1 %11578, %v500_v46   ;;  %681 = vperm.xlu0 %11577, %v911_v27  }
  0xc8   :  { %v1253_v56 = vadd.f32 %v1202_v53, %v840_v48  ;;  %v1252_v57 = vadd.f32 %v1201_v54, %v839_v52  ;;  %v917_v48 = vld [vmem:[%s16357_s0 + $0x138] sm:$0xff] }
  0xc9   :  { %v168_v58 = vpop.permute.xlu1 %167  ;;  %v163_v60 = vpop.permute.xlu0 %162 }
  0xca   :  { %v1304_v61 = vmax.f32 %v1253_v56, 0.0  ;;  %v1303_v62 = vmax.f32 %v1252_v57, 0.0  ;;  %1099 = vperm.xlu1 %11578, %v913_v55   ;;  %1094 = vperm.xlu0 %11577, %v500_v46   ;;  %v372_v63 = vmul.f32 %v12961_v29, %v168_v58  ;;  %v371_v2 = vmul.f32 %v12961_v29, %v163_v60 }
  0xcc   :  { %v13104_v1 = vpack.c.bf16 %v1304_v61, %v1303_v62  ;;  %v429_v8 = vadd.f32 %v12969_v33, %v372_v63  ;;  %v428_v10 = vadd.f32 %v12969_v33, %v371_v2 }
  0xcd   :  { %v587_v3 = vpop.permute.xlu1 %586  ;;  %v582_v5 = vpop.permute.xlu0 %581 }
  0xce   :  { %v791_v6 = vmul.f32 %v12975_v35, %v587_v3  ;;  %v790_v7 = vmul.f32 %v12975_v35, %v582_v5  ;;  %277 = vperm.xlu1 %11578, %v913_v55   ;;  %272 = vperm.xlu0 %11577, %v500_v46   ;;  %v506_v3 = vld [vmem:[%s16357_s0 + $0x140] sm:$0xff] }
  0xcf   :  { %10824 = vmatmul.mubr.msk.bf16.gmra.mrb[20].mxu0 %vm1403_vm1, %v13104_v1 }
  0xd0   :  { %10827 = vmatprep.mubr.msk.bf16.mxu0 %vm12796_vm0, %v12795_v4  ;;  %v842_v12 = vadd.f32 %v791_v6, %v429_v8  ;;  %v841_v15 = vadd.f32 %v790_v7, %v428_v10 }
  0xd1   :  { %v1000_v13 = vpop.permute.xlu1 %999  ;;  %v995_v14 = vpop.permute.xlu0 %994 }
  0xd2   :  { %v1204_v16 = vmul.f32 %v12983_v41, %v1000_v13  ;;  %v1203_v17 = vmul.f32 %v12983_v41, %v995_v14  ;;  %696 = vperm.xlu1 %11578, %v502_v9   ;;  %691 = vperm.xlu0 %11577, %v913_v55   ;;  %v919_v13 = vld [vmem:[%s16357_s0 + $0x148] sm:$0xff] }
  0xd4   :  { %v1255_v19 = vadd.f32 %v1204_v16, %v842_v12  ;;  %v1254_v20 = vadd.f32 %v1203_v17, %v841_v15 }
  0xd5   :  { %v178_v22 = vpop.permute.xlu1 %177  ;;  %v173_v23 = vpop.permute.xlu0 %172 }
  0xd6   :  { %v1306_v24 = vmax.f32 %v1255_v19, 0.0  ;;  %v1305_v25 = vmax.f32 %v1254_v20, 0.0  ;;  %1109 = vperm.xlu1 %11578, %v915_v18   ;;  %1104 = vperm.xlu0 %11577, %v502_v9   ;;  %v374_v26 = vmul.f32 %v12961_v29, %v178_v22  ;;  %v373_v28 = vmul.f32 %v12961_v29, %v173_v23 }
  0xd8   :  { %v13124_v27 = vpack.c.bf16 %v1306_v24, %v1305_v25  ;;  %v431_v36 = vadd.f32 %v12969_v33, %v374_v26  ;;  %v430_v39 = vadd.f32 %v12969_v33, %v373_v28 }
  0xd9   :  { %v597_v30 = vpop.permute.xlu1 %596  ;;  %v592_v31 = vpop.permute.xlu0 %591 }
  0xda   :  { %v793_v32 = vmul.f32 %v12975_v35, %v597_v30  ;;  %v792_v34 = vmul.f32 %v12975_v35, %v592_v31  ;;  %287 = vperm.xlu1 %11578, %v915_v18   ;;  %282 = vperm.xlu0 %11577, %v502_v9   ;;  %v508_v31 = vld [vmem:[%s16357_s0 + $0x150] sm:$0xff] }
  0xdb   :  { %10828 = vmatmul.mubr.msk.bf16.gmra.mrb[24].mxu0 %vm1403_vm1, %v13124_v27 }
  0xdc   :  { %10831 = vmatprep.mubr.msk.bf16.mxu0 %vm12796_vm0, %v12795_v4  ;;  %v844_v42 = vadd.f32 %v793_v32, %v431_v36  ;;  %v843_v45 = vadd.f32 %v792_v34, %v430_v39 }
  0xdd   :  { %v1010_v43 = vpop.permute.xlu1 %1009  ;;  %v1005_v44 = vpop.permute.xlu0 %1004 }
  0xde   :  { %v1206_v46 = vmul.f32 %v12983_v41, %v1010_v43  ;;  %v1205_v47 = vmul.f32 %v12983_v41, %v1005_v44  ;;  %706 = vperm.xlu1 %11578, %v504_v37   ;;  %701 = vperm.xlu0 %11577, %v915_v18   ;;  %v921_v43 = vld [vmem:[%s16357_s0 + $0x158] sm:$0xff] }
  0xe0   :  { %v1257_v50 = vadd.f32 %v1206_v46, %v844_v42  ;;  %v1256_v51 = vadd.f32 %v1205_v47, %v843_v45 }
  0xe1   :  { %v188_v52 = vpop.permute.xlu1 %187  ;;  %v183_v53 = vpop.permute.xlu0 %182 }
  0xe2   :  { %v1308_v54 = vmax.f32 %v1257_v50, 0.0  ;;  %v1307_v55 = vmax.f32 %v1256_v51, 0.0  ;;  %1119 = vperm.xlu1 %11578, %v917_v48   ;;  %1114 = vperm.xlu0 %11577, %v504_v37   ;;  %v376_v56 = vmul.f32 %v12961_v29, %v188_v52  ;;  %v375_v58 = vmul.f32 %v12961_v29, %v183_v53 }
  0xe4   :  { %v13148_v57 = vpack.c.bf16 %v1308_v54, %v1307_v55  ;;  %v433_v2 = vadd.f32 %v12969_v33, %v376_v56  ;;  %v432_v5 = vadd.f32 %v12969_v33, %v375_v58 }
  0xe5   :  { %v607_v60 = vpop.permute.xlu1 %606  ;;  %v602_v61 = vpop.permute.xlu0 %601 }
  0xe6   :  { %v795_v62 = vmul.f32 %v12975_v35, %v607_v60  ;;  %v794_v63 = vmul.f32 %v12975_v35, %v602_v61  ;;  %297 = vperm.xlu1 %11578, %v917_v48   ;;  %292 = vperm.xlu0 %11577, %v504_v37   ;;  %v510_v61 = vld [vmem:[%s16357_s0 + $0x160] sm:$0xff] }
  0xe7   :  { %10832 = vmatmul.mubr.msk.bf16.gmra.mrb[28].mxu0 %vm1403_vm1, %v13148_v57 }
  0xe8   :  { %10835 = vmatprep.mubr.msk.bf16.mxu0 %vm12796_vm0, %v12795_v4  ;;  %v846_v6 = vadd.f32 %v795_v62, %v433_v2  ;;  %v845_v9 = vadd.f32 %v794_v63, %v432_v5 }
  0xe9   :  { %v1020_v7 = vpop.permute.xlu1 %1019  ;;  %v1015_v8 = vpop.permute.xlu0 %1014 }
  0xea   :  { %v1208_v10 = vmul.f32 %v12983_v41, %v1020_v7  ;;  %v1207_v12 = vmul.f32 %v12983_v41, %v1015_v8  ;;  %716 = vperm.xlu1 %11578, %v506_v3   ;;  %711 = vperm.xlu0 %11577, %v917_v48   ;;  %v923_v8 = vld [vmem:[%s16357_s0 + $0x168] sm:$0xff] }
  0xec   :  { %v1259_v14 = vadd.f32 %v1208_v10, %v846_v6  ;;  %v1258_v15 = vadd.f32 %v1207_v12, %v845_v9 }
  0xed   :  { %v198_v16 = vpop.permute.xlu1 %197  ;;  %v193_v17 = vpop.permute.xlu0 %192 }
  0xee   :  { %v1310_v18 = vmax.f32 %v1259_v14, 0.0  ;;  %v1309_v19 = vmax.f32 %v1258_v15, 0.0  ;;  %1129 = vperm.xlu1 %11578, %v919_v13   ;;  %1124 = vperm.xlu0 %11577, %v506_v3   ;;  %v378_v20 = vmul.f32 %v12961_v29, %v198_v16  ;;  %v377_v23 = vmul.f32 %v12961_v29, %v193_v17 }
  0xf0   :  { %v13168_v22 = vpack.c.bf16 %v1310_v18, %v1309_v19  ;;  %v435_v30 = vadd.f32 %v12969_v33, %v378_v20  ;;  %v434_v32 = vadd.f32 %v12969_v33, %v377_v23 }
  0xf1   :  { %v617_v24 = vpop.permute.xlu1 %616  ;;  %v612_v25 = vpop.permute.xlu0 %611 }
  0xf2   :  { %v797_v26 = vmul.f32 %v12975_v35, %v617_v24  ;;  %v796_v28 = vmul.f32 %v12975_v35, %v612_v25  ;;  %307 = vperm.xlu1 %11578, %v919_v13   ;;  %302 = vperm.xlu0 %11577, %v506_v3  }
  0xf3   :  { %10836 = vmatmul.mubr.msk.bf16.gmra.mrb[32].mxu0 %vm1403_vm1, %v13168_v22 }
  0xf4   :  { %10839 = vmatprep.mubr.msk.bf16.mxu0 %vm12796_vm0, %v12795_v4  ;;  %v848_v34 = vadd.f32 %v797_v26, %v435_v30  ;;  %v847_v39 = vadd.f32 %v796_v28, %v434_v32  ;;  %v512_v26 = vld [vmem:[%s16357_s0 + $0x170] sm:$0xff]  ;;  %v11586_v30 = vld [vmem:[%s16358_s3 + $0x38] sm:$0xff]  }
  0xf5   :  { %v1030_v36 = vpop.permute.xlu1 %1029  ;;  %v1025_v37 = vpop.permute.xlu0 %1024  ;;  %10910 = vmatpush3.bf16.msra.mxu0 %v11586_v30 }
  0xf6   :  { %v1210_v40 = vmul.f32 %v12983_v41, %v1030_v36  ;;  %v1209_v42 = vmul.f32 %v12983_v41, %v1025_v37  ;;  %726 = vperm.xlu1 %11578, %v508_v31   ;;  %721 = vperm.xlu0 %11577, %v919_v13  }
  0xf7   :  { %11011 = vmatprep.subr.bf16.mxu0 %v12795_v4 }
  0xf8   :  { %v1261_v44 = vadd.f32 %v1210_v40, %v848_v34  ;;  %v1260_v45 = vadd.f32 %v1209_v42, %v847_v39  ;;  %v925_v40 = vld [vmem:[%s16357_s0 + $0x178] sm:$0xff] }
  0xf9   :  { %v208_v46 = vpop.permute.xlu1 %207  ;;  %v203_v47 = vpop.permute.xlu0 %202 }
  0xfa   :  { %v1312_v48 = vmax.f32 %v1261_v44, 0.0  ;;  %v1311_v50 = vmax.f32 %v1260_v45, 0.0  ;;  %1139 = vperm.xlu1 %11578, %v921_v43   ;;  %1134 = vperm.xlu0 %11577, %v508_v31   ;;  %v380_v51 = vmul.f32 %v12961_v29, %v208_v46  ;;  %v379_v53 = vmul.f32 %v12961_v29, %v203_v47 }
  0xfc   :  { %v13188_v52 = vpack.c.bf16 %v1312_v48, %v1311_v50  ;;  %v437_v60 = vadd.f32 %v12969_v33, %v380_v51  ;;  %v436_v62 = vadd.f32 %v12969_v33, %v379_v53 }
  0xfd   :  { %v627_v54 = vpop.permute.xlu1 %626  ;;  %v622_v55 = vpop.permute.xlu0 %621 }
  0xfe   :  { %v799_v56 = vmul.f32 %v12975_v35, %v627_v54  ;;  %v798_v58 = vmul.f32 %v12975_v35, %v622_v55  ;;  %317 = vperm.xlu1 %11578, %v921_v43   ;;  %312 = vperm.xlu0 %11577, %v508_v31  }
  0xff   :  { %10840 = vmatmul.mubr.msk.bf16.gmra.mrb[36].mxu0 %vm1403_vm1, %v13188_v52 }
 0x100   :  { %10843 = vmatprep.mubr.msk.bf16.mxu0 %vm12796_vm0, %v12795_v4  ;;  %v850_v63 = vadd.f32 %v799_v56, %v437_v60  ;;  %v849_v5 = vadd.f32 %v798_v58, %v436_v62  ;;  %v514_v60 = vld [vmem:[%s16357_s0 + $0x180] sm:$0xff] }
 0x101   :  { %v1040_v2 = vpop.permute.xlu1 %1039  ;;  %v1035_v3 = vpop.permute.xlu0 %1034 }
 0x102   :  { %v1212_v6 = vmul.f32 %v12983_v41, %v1040_v2  ;;  %v1211_v7 = vmul.f32 %v12983_v41, %v1035_v3  ;;  %736 = vperm.xlu1 %11578, %v510_v61   ;;  %731 = vperm.xlu0 %11577, %v921_v43  }
 0x104   :  { %v1263_v9 = vadd.f32 %v1212_v6, %v850_v63  ;;  %v1262_v10 = vadd.f32 %v1211_v7, %v849_v5  ;;  %v927_v7 = vld [vmem:[%s16357_s0 + $0x188] sm:$0xff] }
 0x105   :  { %v218_v12 = vpop.permute.xlu1 %217  ;;  %v213_v13 = vpop.permute.xlu0 %212 }
 0x106   :  { %v1314_v14 = vmax.f32 %v1263_v9, 0.0  ;;  %v1313_v15 = vmax.f32 %v1262_v10, 0.0  ;;  %1149 = vperm.xlu1 %11578, %v923_v8   ;;  %1144 = vperm.xlu0 %11577, %v510_v61   ;;  %v382_v16 = vmul.f32 %v12961_v29, %v218_v12  ;;  %v381_v18 = vmul.f32 %v12961_v29, %v213_v13 }
 0x108   :  { %v13208_v17 = vpack.c.bf16 %v1314_v14, %v1313_v15  ;;  %v439_v25 = vadd.f32 %v12969_v33, %v382_v16  ;;  %v438_v28 = vadd.f32 %v12969_v33, %v381_v18 }
 0x109   :  { %v637_v19 = vpop.permute.xlu1 %636  ;;  %v632_v20 = vpop.permute.xlu0 %631 }
 0x10a   :  { %v801_v23 = vmul.f32 %v12975_v35, %v637_v19  ;;  %v800_v24 = vmul.f32 %v12975_v35, %v632_v20  ;;  %327 = vperm.xlu1 %11578, %v923_v8   ;;  %322 = vperm.xlu0 %11577, %v510_v61  }
 0x10b   :  { %10844 = vmatmul.mubr.msk.bf16.gmra.mrb[40].mxu0 %vm1403_vm1, %v13208_v17 }
 0x10c   :  { %10847 = vmatprep.mubr.msk.bf16.mxu0 %vm12796_vm0, %v12795_v4  ;;  %v852_v31 = vadd.f32 %v801_v23, %v439_v25  ;;  %v851_v36 = vadd.f32 %v800_v24, %v438_v28 }
 0x10d   :  { %v1050_v32 = vpop.permute.xlu1 %1049  ;;  %v1045_v34 = vpop.permute.xlu0 %1044 }
 0x10e   :  { %v1214_v37 = vmul.f32 %v12983_v41, %v1050_v32  ;;  %v1213_v39 = vmul.f32 %v12983_v41, %v1045_v34  ;;  %746 = vperm.xlu1 %11578, %v512_v26   ;;  %741 = vperm.xlu0 %11577, %v923_v8  }
 0x110   :  { %v1265_v42 = vadd.f32 %v1214_v37, %v852_v31  ;;  %v1264_v43 = vadd.f32 %v1213_v39, %v851_v36  ;;  %v929_v39 = vld [vmem:[%s16357_s0 + $0x198] sm:$0xff] }
 0x111   :  { %v228_v44 = vpop.permute.xlu1 %227  ;;  %v223_v45 = vpop.permute.xlu0 %222 }
 0x112   :  { %v1316_v46 = vmax.f32 %v1265_v42, 0.0  ;;  %v1315_v47 = vmax.f32 %v1264_v43, 0.0  ;;  %1159 = vperm.xlu1 %11578, %v925_v40   ;;  %1154 = vperm.xlu0 %11577, %v512_v26   ;;  %v384_v48 = vmul.f32 %v12961_v29, %v228_v44  ;;  %v383_v51 = vmul.f32 %v12961_v29, %v223_v45 }
 0x114   :  { %v13232_v50 = vpack.c.bf16 %v1316_v46, %v1315_v47  ;;  %v441_v58 = vadd.f32 %v12969_v33, %v384_v48  ;;  %v440_v61 = vadd.f32 %v12969_v33, %v383_v51 }
 0x115   :  { %v647_v53 = vpop.permute.xlu1 %646  ;;  %v642_v54 = vpop.permute.xlu0 %641 }
 0x116   :  { %v803_v55 = vmul.f32 %v12975_v35, %v647_v53  ;;  %v802_v56 = vmul.f32 %v12975_v35, %v642_v54  ;;  %337 = vperm.xlu1 %11578, %v925_v40   ;;  %332 = vperm.xlu0 %11577, %v512_v26   ;;  %v516_v26 = vld [vmem:[%s16357_s0 + $0x190] sm:$0xff] }
 0x117   :  { %10848 = vmatmul.mubr.msk.bf16.gmra.mrb[44].mxu0 %vm1403_vm1, %v13232_v50 }
 0x118   :  { %10851 = vmatprep.mubr.msk.bf16.mxu0 %vm12796_vm0, %v12795_v4  ;;  %v854_v62 = vadd.f32 %v803_v55, %v441_v58  ;;  %v853_v3 = vadd.f32 %v802_v56, %v440_v61  ;;  %v930_v58 = vld [vmem:[%s16357_s0 + $0x1a0] sm:$0xff] }
 0x119   :  { %v1060_v63 = vpop.permute.xlu1 %1059  ;;  %v1055_v2 = vpop.permute.xlu0 %1054 }
 0x11a   :  { %v1216_v5 = vmul.f32 %v12983_v41, %v1060_v63  ;;  %v1215_v6 = vmul.f32 %v12983_v41, %v1055_v2  ;;  %756 = vperm.xlu1 %11578, %v514_v60   ;;  %751 = vperm.xlu0 %11577, %v925_v40  }
 0x11c   :  { %v1267_v8 = vadd.f32 %v1216_v5, %v854_v62  ;;  %v1266_v9 = vadd.f32 %v1215_v6, %v853_v3 }
 0x11d   :  { %v238_v10 = vpop.permute.xlu1 %237  ;;  %v233_v12 = vpop.permute.xlu0 %232 }
 0x11e   :  { %v1318_v13 = vmax.f32 %v1267_v8, 0.0  ;;  %v1317_v14 = vmax.f32 %v1266_v9, 0.0  ;;  %1169 = vperm.xlu1 %11578, %v927_v7   ;;  %1164 = vperm.xlu0 %11577, %v514_v60   ;;  %v386_v15 = vmul.f32 %v12961_v29, %v238_v10  ;;  %v385_v18 = vmul.f32 %v12961_v29, %v233_v12 }
 0x120   :  { %v13252_v16 = vpack.c.bf16 %v1318_v13, %v1317_v14  ;;  %v443_v25 = vadd.f32 %v12969_v33, %v386_v15  ;;  %v442_v28 = vadd.f32 %v12969_v33, %v385_v18 }
 0x121   :  { %v657_v19 = vpop.permute.xlu1 %656  ;;  %v652_v20 = vpop.permute.xlu0 %651 }
 0x122   :  { %v805_v23 = vmul.f32 %v12975_v35, %v657_v19  ;;  %v804_v24 = vmul.f32 %v12975_v35, %v652_v20  ;;  %347 = vperm.xlu1 %11578, %v927_v7   ;;  %342 = vperm.xlu0 %11577, %v514_v60  }
 0x123   :  { %10852 = vmatmul.mubr.msk.bf16.gmra.mrb[48].mxu0 %vm1403_vm1, %v13252_v16 }
 0x124   :  { %10855 = vmatprep.mubr.msk.bf16.mxu0 %vm12796_vm0, %v12795_v4  ;;  %v856_v30 = vadd.f32 %v805_v23, %v443_v25  ;;  %v855_v34 = vadd.f32 %v804_v24, %v442_v28 }
 0x125   :  { %v1070_v31 = vpop.permute.xlu1 %1069  ;;  %v1065_v32 = vpop.permute.xlu0 %1064 }
 0x126   :  { %v1218_v36 = vmul.f32 %v12983_v41, %v1070_v31  ;;  %v1217_v37 = vmul.f32 %v12983_v41, %v1065_v32  ;;  %766 = vperm.xlu1 %11578, %v516_v26   ;;  %761 = vperm.xlu0 %11577, %v927_v7  }
 0x128   :  { %v1269_v40 = vadd.f32 %v1218_v36, %v856_v30  ;;  %v1268_v42 = vadd.f32 %v1217_v37, %v855_v34 }
 0x129   :  { %v248_v43 = vpop.permute.xlu1 %247  ;;  %v243_v44 = vpop.permute.xlu0 %242 }
 0x12a   :  { %v1320_v45 = vmax.f32 %v1269_v40, 0.0  ;;  %v1319_v46 = vmax.f32 %v1268_v42, 0.0  ;;  %1179 = vperm.xlu1 %11578, %v929_v39   ;;  %1174 = vperm.xlu0 %11577, %v516_v26   ;;  %v388_v48 = vmul.f32 %v12961_v29, %v248_v43  ;;  %v387_v51 = vmul.f32 %v12961_v29, %v243_v44 }
 0x12c   :  { %v13271_v47 = vpack.c.bf16 %v1320_v45, %v1319_v46  ;;  %v445_v60 = vadd.f32 %v12969_v33, %v388_v48  ;;  %v444_v61 = vadd.f32 %v12969_v33, %v387_v51 }
 0x12d   :  { %v667_v53 = vpop.permute.xlu1 %666  ;;  %v662_v54 = vpop.permute.xlu0 %661 }
 0x12e   :  { %v807_v55 = vmul.f32 %v12975_v35, %v667_v53  ;;  %v806_v56 = vmul.f32 %v12975_v35, %v662_v54  ;;  %771 = vperm.xlu1 %11578, %v929_v39   ;;  %352 = vperm.xlu0 %11577, %v516_v26  }
 0x12f   :  { %10856 = vmatmul.mubr.msk.bf16.gmra.mrb[52].mxu0 %vm1403_vm1, %v13271_v47 }
 0x130   :  { %10859 = vmatprep.mubr.msk.bf16.mxu0 %vm12796_vm0, %v12795_v4  ;;  %v858_v2 = vadd.f32 %v807_v55, %v445_v60  ;;  %v857_v3 = vadd.f32 %v806_v56, %v444_v61 }
 0x131   :  { %v1080_v62 = vpop.permute.xlu1 %1079  ;;  %v1075_v63 = vpop.permute.xlu0 %1074 }
 0x132   :  { %v1220_v5 = vmul.f32 %v12983_v41, %v1080_v62  ;;  %v1219_v6 = vmul.f32 %v12983_v41, %v1075_v63  ;;  %1184 = vperm.xlu0 %11577, %v930_v58  }
 0x134   :  { %v1271_v7 = vadd.f32 %v1220_v5, %v858_v2  ;;  %v1270_v8 = vadd.f32 %v1219_v6, %v857_v3 }
 0x135   :  { %v258_v9 = vpop.permute.xlu1 %257  ;;  %v253_v10 = vpop.permute.xlu0 %252 }
 0x136   :  { %v1322_v12 = vmax.f32 %v1271_v7, 0.0  ;;  %v1321_v13 = vmax.f32 %v1270_v8, 0.0  ;;  %v390_v15 = vmul.f32 %v12961_v29, %v258_v9  ;;  %v389_v18 = vmul.f32 %v12961_v29, %v253_v10 }
 0x138   :  { %v13288_v14 = vpack.c.bf16 %v1322_v12, %v1321_v13  ;;  %v447_v25 = vadd.f32 %v12969_v33, %v390_v15  ;;  %v446_v26 = vadd.f32 %v12969_v33, %v389_v18 }
 0x139   :  { %v677_v19 = vpop.permute.xlu1 %676  ;;  %v672_v20 = vpop.permute.xlu0 %671 }
 0x13a   :  { %v809_v23 = vmul.f32 %v12975_v35, %v677_v19  ;;  %v808_v24 = vmul.f32 %v12975_v35, %v672_v20  ;;  %10860 = vmatmul.mubr.msk.bf16.gmra.mrb[56].mxu0 %vm1403_vm1, %v13288_v14  ;;  %v13339_v20 = vld [vmem:[%s16360_s2] ss:$0 sm:$0xff] }
 0x13b   :  { %10863 = vmatprep.mubr.msk.bf16.mxu0 %vm12796_vm0, %v12795_v4 }
 0x13c   :  { %v860_v31 = vadd.f32 %v809_v23, %v447_v25  ;;  %v859_v32 = vadd.f32 %v808_v24, %v446_v26 }
 0x13d   :  { %v1090_v28 = vpop.permute.xlu1 %1089  ;;  %v1085_v30 = vpop.permute.xlu0 %1084 }
 0x13e   :  { %v1222_v34 = vmul.f32 %v12983_v41, %v1090_v28  ;;  %v1221_v36 = vmul.f32 %v12983_v41, %v1085_v30 }
 0x140   :  { %v1273_v37 = vadd.f32 %v1222_v34, %v860_v31  ;;  %v1272_v39 = vadd.f32 %v1221_v36, %v859_v32  ;;  %v13346_v31 = vld [vmem:[%s16359_s1 + $0x2] ss:$0 sm:$0xff] }
 0x141   :  { %v268_v40 = vpop.permute.xlu1 %267  ;;  %v263_v42 = vpop.permute.xlu0 %262 }
 0x142   :  { %v1324_v43 = vmax.f32 %v1273_v37, 0.0  ;;  %v1323_v44 = vmax.f32 %v1272_v39, 0.0  ;;  %v392_v46 = vmul.f32 %v12961_v29, %v268_v40  ;;  %v391_v48 = vmul.f32 %v12961_v29, %v263_v42 }
 0x144   :  { %v13302_v45 = vpack.c.bf16 %v1324_v43, %v1323_v44  ;;  %v449_v56 = vadd.f32 %v12969_v33, %v392_v46  ;;  %v448_v58 = vadd.f32 %v12969_v33, %v391_v48  ;;  %v13321_v33 = vld [vmem:[%s16359_s1] ss:$0 sm:$0xff] }
 0x145   :  { %v687_v51 = vpop.permute.xlu1 %686  ;;  %v682_v53 = vpop.permute.xlu0 %681 }
 0x146   :  { %v811_v54 = vmul.f32 %v12975_v35, %v687_v51  ;;  %v810_v55 = vmul.f32 %v12975_v35, %v682_v53  ;;  %10864 = vmatmul.mubr.msk.bf16.gmra.mrb[60].mxu0 %vm1403_vm1, %v13302_v45 }
 0x147   :  { %10867 = vmatprep.mubr.msk.bf16.mxu0 %vm12796_vm0, %v12795_v4 }
 0x148   :  { %v862_v62 = vadd.f32 %v811_v54, %v449_v56  ;;  %v861_v29 = vadd.f32 %v810_v55, %v448_v58 }
 0x149   :  { %v1100_v60 = vpop.permute.xlu1 %1099  ;;  %v1095_v61 = vpop.permute.xlu0 %1094 }
 0x14a   :  { %v1224_v63 = vmul.f32 %v12983_v41, %v1100_v60  ;;  %v1223_v2 = vmul.f32 %v12983_v41, %v1095_v61  ;;  %v13328_v41 = vld [vmem:[%s16359_s1 + $0x1] ss:$0 sm:$0xff] }
 0x14c   :  { %v1275_v3 = vadd.f32 %v1224_v63, %v862_v62  ;;  %v1274_v35 = vadd.f32 %v1223_v2, %v861_v29 }
 0x14d   :  { %v278_v5 = vpop.permute.xlu1 %277  ;;  %v273_v6 = vpop.permute.xlu0 %272 }
 0x14e   :  { %v1326_v7 = vmax.f32 %v1275_v3, 0.0  ;;  %v1325_v8 = vmax.f32 %v1274_v35, 0.0  ;;  %v394_v10 = vmul.f32 %v13321_v33, %v278_v5  ;;  %v393_v12 = vmul.f32 %v13321_v33, %v273_v6 }
 0x150   :  { %v13316_v9 = vpack.c.bf16 %v1326_v7, %v1325_v8  ;;  %v451_v23 = vadd.f32 %v13339_v20, %v394_v10  ;;  %v450_v24 = vadd.f32 %v13339_v20, %v393_v12 }
 0x151   :  { %v697_v13 = vpop.permute.xlu1 %696  ;;  %v692_v15 = vpop.permute.xlu0 %691 }
 0x152   :  { %v813_v18 = vmul.f32 %v13328_v41, %v697_v13  ;;  %v812_v19 = vmul.f32 %v13328_v41, %v692_v15  ;;  %10868 = vmatmul.mubr.msk.bf16.gmra.mrb[64].mxu0 %vm1403_vm1, %v13316_v9 }
 0x153   :  { %10871 = vmatprep.mubr.msk.bf16.mxu0 %vm12796_vm0, %v12795_v4 }
 0x154   :  { %v864_v28 = vadd.f32 %v813_v18, %v451_v23  ;;  %v863_v30 = vadd.f32 %v812_v19, %v450_v24 }
 0x155   :  { %v1110_v25 = vpop.permute.xlu1 %1109  ;;  %v1105_v26 = vpop.permute.xlu0 %1104 }
 0x156   :  { %v1226_v32 = vmul.f32 %v13346_v31, %v1110_v25  ;;  %v1225_v34 = vmul.f32 %v13346_v31, %v1105_v26 }
 0x158   :  { %v1277_v36 = vadd.f32 %v1226_v32, %v864_v28  ;;  %v1276_v37 = vadd.f32 %v1225_v34, %v863_v30 }
 0x159   :  { %v288_v39 = vpop.permute.xlu1 %287  ;;  %v283_v40 = vpop.permute.xlu0 %282 }
 0x15a   :  { %v1328_v42 = vmax.f32 %v1277_v36, 0.0  ;;  %v1327_v43 = vmax.f32 %v1276_v37, 0.0  ;;  %v396_v46 = vmul.f32 %v13321_v33, %v288_v39  ;;  %v395_v48 = vmul.f32 %v13321_v33, %v283_v40 }
 0x15c   :  { %v13350_v44 = vpack.c.bf16 %v1328_v42, %v1327_v43  ;;  %v453_v56 = vadd.f32 %v13339_v20, %v396_v46  ;;  %v452_v58 = vadd.f32 %v13339_v20, %v395_v48 }
 0x15d   :  { %v707_v51 = vpop.permute.xlu1 %706  ;;  %v702_v53 = vpop.permute.xlu0 %701 }
 0x15e   :  { %v815_v54 = vmul.f32 %v13328_v41, %v707_v51  ;;  %v814_v55 = vmul.f32 %v13328_v41, %v702_v53  ;;  %10872 = vmatmul.mubr.msk.bf16.gmra.mrb[68].mxu0 %vm1403_vm1, %v13350_v44 }
 0x15f   :  { %10875 = vmatprep.mubr.msk.bf16.mxu0 %vm12796_vm0, %v12795_v4 }
 0x160   :  { %v866_v62 = vadd.f32 %v815_v54, %v453_v56  ;;  %v865_v29 = vadd.f32 %v814_v55, %v452_v58 }
 0x161   :  { %v1120_v60 = vpop.permute.xlu1 %1119  ;;  %v1115_v61 = vpop.permute.xlu0 %1114 }
 0x162   :  { %v1228_v63 = vmul.f32 %v13346_v31, %v1120_v60  ;;  %v1227_v2 = vmul.f32 %v13346_v31, %v1115_v61 }
 0x164   :  { %v1279_v3 = vadd.f32 %v1228_v63, %v866_v62  ;;  %v1278_v35 = vadd.f32 %v1227_v2, %v865_v29 }
 0x165   :  { %v298_v5 = vpop.permute.xlu1 %297  ;;  %v293_v6 = vpop.permute.xlu0 %292 }
 0x166   :  { %v1330_v7 = vmax.f32 %v1279_v3, 0.0  ;;  %v1329_v8 = vmax.f32 %v1278_v35, 0.0  ;;  %v398_v12 = vmul.f32 %v13321_v33, %v298_v5  ;;  %v397_v13 = vmul.f32 %v13321_v33, %v293_v6 }
 0x168   :  { %v13364_v10 = vpack.c.bf16 %v1330_v7, %v1329_v8  ;;  %v455_v24 = vadd.f32 %v13339_v20, %v398_v12  ;;  %v454_v25 = vadd.f32 %v13339_v20, %v397_v13 }
 0x169   :  { %v717_v15 = vpop.permute.xlu1 %716  ;;  %v712_v18 = vpop.permute.xlu0 %711 }
 0x16a   :  { %v817_v19 = vmul.f32 %v13328_v41, %v717_v15  ;;  %v816_v23 = vmul.f32 %v13328_v41, %v712_v18  ;;  %10876 = vmatmul.mubr.msk.bf16.gmra.mrb[72].mxu0 %vm1403_vm1, %v13364_v10 }
 0x16b   :  { %10879 = vmatprep.mubr.msk.bf16.mxu0 %vm12796_vm0, %v12795_v4 }
 0x16c   :  { %v868_v30 = vadd.f32 %v817_v19, %v455_v24  ;;  %v867_v32 = vadd.f32 %v816_v23, %v454_v25 }
 0x16d   :  { %v1130_v26 = vpop.permute.xlu1 %1129  ;;  %v1125_v28 = vpop.permute.xlu0 %1124 }
 0x16e   :  { %v1230_v34 = vmul.f32 %v13346_v31, %v1130_v26  ;;  %v1229_v36 = vmul.f32 %v13346_v31, %v1125_v28 }
 0x170   :  { %v1281_v37 = vadd.f32 %v1230_v34, %v868_v30  ;;  %v1280_v39 = vadd.f32 %v1229_v36, %v867_v32 }
 0x171   :  { %v308_v40 = vpop.permute.xlu1 %307  ;;  %v303_v42 = vpop.permute.xlu0 %302 }
 0x172   :  { %v1332_v43 = vmax.f32 %v1281_v37, 0.0  ;;  %v1331_v46 = vmax.f32 %v1280_v39, 0.0  ;;  %v400_v51 = vmul.f32 %v13321_v33, %v308_v40  ;;  %v399_v53 = vmul.f32 %v13321_v33, %v303_v42 }
 0x174   :  { %v13378_v48 = vpack.c.bf16 %v1332_v43, %v1331_v46  ;;  %v457_v60 = vadd.f32 %v13339_v20, %v400_v51  ;;  %v456_v61 = vadd.f32 %v13339_v20, %v399_v53 }
 0x175   :  { %v727_v54 = vpop.permute.xlu1 %726  ;;  %v722_v55 = vpop.permute.xlu0 %721 }
 0x176   :  { %v819_v56 = vmul.f32 %v13328_v41, %v727_v54  ;;  %v818_v58 = vmul.f32 %v13328_v41, %v722_v55  ;;  %10880 = vmatmul.mubr.msk.bf16.gmra.mrb[76].mxu0 %vm1403_vm1, %v13378_v48 }
 0x177   :  { %10883 = vmatprep.mubr.msk.bf16.mxu0 %vm12796_vm0, %v12795_v4 }
 0x178   :  { %v870_v63 = vadd.f32 %v819_v56, %v457_v60  ;;  %v869_v2 = vadd.f32 %v818_v58, %v456_v61 }
 0x179   :  { %v1140_v62 = vpop.permute.xlu1 %1139  ;;  %v1135_v29 = vpop.permute.xlu0 %1134 }
 0x17a   :  { %v1232_v3 = vmul.f32 %v13346_v31, %v1140_v62  ;;  %v1231_v35 = vmul.f32 %v13346_v31, %v1135_v29 }
 0x17c   :  { %v1283_v5 = vadd.f32 %v1232_v3, %v870_v63  ;;  %v1282_v6 = vadd.f32 %v1231_v35, %v869_v2 }
 0x17d   :  { %v318_v7 = vpop.permute.xlu1 %317  ;;  %v313_v8 = vpop.permute.xlu0 %312 }
 0x17e   :  { %v1334_v12 = vmax.f32 %v1283_v5, 0.0  ;;  %v1333_v13 = vmax.f32 %v1282_v6, 0.0  ;;  %v402_v18 = vmul.f32 %v13321_v33, %v318_v7  ;;  %v401_v19 = vmul.f32 %v13321_v33, %v313_v8 }
 0x180   :  { %v13392_v15 = vpack.c.bf16 %v1334_v12, %v1333_v13  ;;  %v459_v28 = vadd.f32 %v13339_v20, %v402_v18  ;;  %v458_v30 = vadd.f32 %v13339_v20, %v401_v19 }
 0x181   :  { %v737_v23 = vpop.permute.xlu1 %736  ;;  %v732_v24 = vpop.permute.xlu0 %731 }
 0x182   :  { %v821_v25 = vmul.f32 %v13328_v41, %v737_v23  ;;  %v820_v26 = vmul.f32 %v13328_v41, %v732_v24  ;;  %10884 = vmatmul.mubr.msk.bf16.gmra.mrb[80].mxu0 %vm1403_vm1, %v13392_v15 }
 0x183   :  { %10887 = vmatprep.mubr.msk.bf16.mxu0 %vm12796_vm0, %v12795_v4 }
 0x184   :  { %v872_v36 = vadd.f32 %v821_v25, %v459_v28  ;;  %v871_v37 = vadd.f32 %v820_v26, %v458_v30 }
 0x185   :  { %v1150_v32 = vpop.permute.xlu1 %1149  ;;  %v1145_v34 = vpop.permute.xlu0 %1144 }
 0x186   :  { %v1234_v39 = vmul.f32 %v13346_v31, %v1150_v32  ;;  %v1233_v40 = vmul.f32 %v13346_v31, %v1145_v34 }
 0x188   :  { %v1285_v42 = vadd.f32 %v1234_v39, %v872_v36  ;;  %v1284_v43 = vadd.f32 %v1233_v40, %v871_v37 }
 0x189   :  { %v328_v46 = vpop.permute.xlu1 %327  ;;  %v323_v51 = vpop.permute.xlu0 %322 }
 0x18a   :  { %v1336_v53 = vmax.f32 %v1285_v42, 0.0  ;;  %v1335_v54 = vmax.f32 %v1284_v43, 0.0  ;;  %v404_v56 = vmul.f32 %v13321_v33, %v328_v46  ;;  %v403_v58 = vmul.f32 %v13321_v33, %v323_v51 }
 0x18c   :  { %v13406_v55 = vpack.c.bf16 %v1336_v53, %v1335_v54  ;;  %v461_v63 = vadd.f32 %v13339_v20, %v404_v56  ;;  %v460_v2 = vadd.f32 %v13339_v20, %v403_v58 }
 0x18d   :  { %v747_v60 = vpop.permute.xlu1 %746  ;;  %v742_v61 = vpop.permute.xlu0 %741 }
 0x18e   :  { %v823_v62 = vmul.f32 %v13328_v41, %v747_v60  ;;  %v822_v29 = vmul.f32 %v13328_v41, %v742_v61  ;;  %10888 = vmatmul.mubr.msk.bf16.gmra.mrb[84].mxu0 %vm1403_vm1, %v13406_v55 }
 0x18f   :  { %10891 = vmatprep.mubr.msk.bf16.mxu0 %vm12796_vm0, %v12795_v4 }
 0x190   :  { %v874_v5 = vadd.f32 %v823_v62, %v461_v63  ;;  %v873_v6 = vadd.f32 %v822_v29, %v460_v2 }
 0x191   :  { %v1160_v3 = vpop.permute.xlu1 %1159  ;;  %v1155_v35 = vpop.permute.xlu0 %1154 }
 0x192   :  { %v1236_v7 = vmul.f32 %v13346_v31, %v1160_v3  ;;  %v1235_v8 = vmul.f32 %v13346_v31, %v1155_v35 }
 0x194   :  { %v1287_v12 = vadd.f32 %v1236_v7, %v874_v5  ;;  %v1286_v13 = vadd.f32 %v1235_v8, %v873_v6 }
 0x195   :  { %v338_v18 = vpop.permute.xlu1 %337  ;;  %v333_v19 = vpop.permute.xlu0 %332 }
 0x196   :  { %v1338_v23 = vmax.f32 %v1287_v12, 0.0  ;;  %v1337_v24 = vmax.f32 %v1286_v13, 0.0  ;;  %v406_v26 = vmul.f32 %v13321_v33, %v338_v18  ;;  %v405_v28 = vmul.f32 %v13321_v33, %v333_v19 }
 0x198   :  { %v13420_v25 = vpack.c.bf16 %v1338_v23, %v1337_v24  ;;  %v463_v37 = vadd.f32 %v13339_v20, %v406_v26  ;;  %v462_v39 = vadd.f32 %v13339_v20, %v405_v28 }
 0x199   :  { %v757_v30 = vpop.permute.xlu1 %756  ;;  %v752_v32 = vpop.permute.xlu0 %751 }
 0x19a   :  { %v825_v34 = vmul.f32 %v13328_v41, %v757_v30  ;;  %v824_v36 = vmul.f32 %v13328_v41, %v752_v32  ;;  %10892 = vmatmul.mubr.msk.bf16.gmra.mrb[88].mxu0 %vm1403_vm1, %v13420_v25  ;;  %v1801_v32 = vrot.slane %v12996_v59, 4  ;;  %v1804_v59 = vrot.slane %v13043_v49, 4 }
 0x19b   :  { %10895 = vmatprep.mubr.msk.bf16.mxu0 %vm12796_vm0, %v12795_v4 }
 0x19c   :  { %v876_v43 = vadd.f32 %v825_v34, %v463_v37  ;;  %v875_v46 = vadd.f32 %v824_v36, %v462_v39  ;;  %v11588_v36 = vld [vmem:[%s16358_s3 + $0x48] sm:$0xff]   ;;  %v11589_v37 = vld [vmem:[%s16358_s3 + $0x50] sm:$0xff]  }
 0x19d   :  { %v1170_v40 = vpop.permute.xlu1 %1169  ;;  %v1165_v42 = vpop.permute.xlu0 %1164 }
 0x19e   :  { %v1238_v51 = vmul.f32 %v13346_v31, %v1170_v40  ;;  %v1237_v53 = vmul.f32 %v13346_v31, %v1165_v42  ;;  %v1806_v40 = vrot.slane %v13064_v11, 4 }
 0x1a0   :  { %v1289_v54 = vadd.f32 %v1238_v51, %v876_v43  ;;  %v1288_v56 = vadd.f32 %v1237_v53, %v875_v46  ;;  %v1807_v42 = vsel %vm1800_vm2, %v1804_v59, %v1806_v40  ;;  %v11590_v43 = vld [vmem:[%s16358_s3 + $0x58] sm:$0xff]   ;;  %v1808_v46 = vrot.slane %v13084_v38, 4 }
 0x1a1   :  { %v348_v58 = vpop.permute.xlu1 %347  ;;  %v343_v60 = vpop.permute.xlu0 %342  ;;  %v1810_v53 = vrot.slane %v13104_v1, 4 }
 0x1a2   :  { %v1340_v61 = vmax.f32 %v1289_v54, 0.0  ;;  %v1339_v62 = vmax.f32 %v1288_v56, 0.0  ;;  %v408_v63 = vmul.f32 %v13321_v33, %v348_v58  ;;  %v407_v2 = vmul.f32 %v13321_v33, %v343_v60 }
 0x1a3   :  { %v1809_v51 = vsel %vm1800_vm2, %v1806_v40, %v1808_v46  ;;  %v1811_v54 = vsel %vm1800_vm2, %v1808_v46, %v1810_v53  ;;  %v1812_v56 = vrot.slane %v13124_v27, 4  ;;  %v1814_v60 = vrot.slane %v13148_v57, 4 }
 0x1a4   :  { %v13434_v29 = vpack.c.bf16 %v1340_v61, %v1339_v62  ;;  %v465_v7 = vadd.f32 %v13339_v20, %v408_v63  ;;  %v464_v8 = vadd.f32 %v13339_v20, %v407_v2  ;;  %v1802_v20 = vrot.slane %v13020_v21, 4 }
 0x1a5   :  { %v767_v3 = vpop.permute.xlu1 %766  ;;  %v762_v35 = vpop.permute.xlu0 %761  ;;  %v1813_v58 = vsel %vm1800_vm2, %v1810_v53, %v1812_v56  ;;  %v1815_v61 = vsel %vm1800_vm2, %v1812_v56, %v1814_v60  ;;  %v1816_v62 = vrot.slane %v13168_v22, 4  ;;  %v1818_v2 = vrot.slane %v13188_v52, 4  ;;  %v11603_v56 = vld [vmem:[%s16361_s5 + $0x40] ss:$8 sps:$4 sm:$0xff]  }
 0x1a6   :  { %v827_v5 = vmul.f32 %v13328_v41, %v767_v3  ;;  %v826_v6 = vmul.f32 %v13328_v41, %v762_v35  ;;  %10896 = vmatmul.mubr.msk.bf16.gmra.mrb[92].mxu0 %vm1403_vm1, %v13434_v29  ;;  %v1803_v34 = vsel %vm1800_vm2, %v1801_v32, %v1802_v20  ;;  %v1805_v39 = vsel %vm1800_vm2, %v1802_v20, %v1804_v59 }
 0x1a7   :  { %10899 = vmatprep.mubr.msk.bf16.mxu0 %vm12796_vm0, %v12795_v4  ;;  %v1817_v63 = vsel %vm1800_vm2, %v1814_v60, %v1816_v62  ;;  %v1819_v3 = vsel %vm1800_vm2, %v1816_v62, %v1818_v2  ;;  %v1820_v35 = vrot.slane %v13208_v17, 4  ;;  %v1836_v32 = vrot.slane %v13364_v10, 4  ;;  %v11606_v60 = vld [vmem:[%s16361_s5 + $0x50] ss:$8 sps:$4 sm:$0xff]   ;;  %v11614_v62 = vld [vmem:[%s16361_s5 + $0x74] ss:$8 sps:$4 sm:$0xff]  }
 0x1a8   :  { %v878_v18 = vadd.f32 %v827_v5, %v465_v7  ;;  %v877_v33 = vadd.f32 %v826_v6, %v464_v8  ;;  %v1822_v6 = vrot.slane %v13232_v50, 4  ;;  %v1824_v8 = vrot.slane %v13252_v16, 4 }
 0x1a9   :  { %v1180_v12 = vpop.permute.xlu1 %1179  ;;  %v1175_v13 = vpop.permute.xlu0 %1174  ;;  %v1821_v5 = vsel %vm1800_vm2, %v1818_v2, %v1820_v35  ;;  %v1840_v59 = vrot.slane %v13392_v15, 4  ;;  %v1846_v46 = vrot.slane %v13434_v29, 4  ;;  %v11648_v2 = vld [vmem:[%s16361_s5 + $0x724] ss:$8 sps:$4 sm:$0xff]  }
 0x1aa   :  { %v1240_v19 = vmul.f32 %v13346_v31, %v1180_v12  ;;  %v1239_v23 = vmul.f32 %v13346_v31, %v1175_v13  ;;  %v11587_v31 = vld [vmem:[%s16358_s3 + $0x40] sm:$0xff]   ;;  %v1823_v7 = vsel %vm1800_vm2, %v1820_v35, %v1822_v6  ;;  %v1825_v12 = vsel %vm1800_vm2, %v1822_v6, %v1824_v8  ;;  %v11654_v35 = vld [vmem:[%s16361_s5 + $0x734] ss:$8 sps:$4 sm:$0xff]  }
 0x1ab   :  { %v1826_v13 = vrot.slane %v13271_v47, 4  ;;  %v11662_v6 = vld [vmem:[%s16361_s5 + $0x740] ss:$8 sps:$4 sm:$0xff]  }
 0x1ac   :  { %v1291_v24 = vadd.f32 %v1240_v19, %v878_v18  ;;  %v1290_v41 = vadd.f32 %v1239_v23, %v877_v33  ;;  %v1828_v33 = vrot.slane %v13288_v14, 4  ;;  %v1830_v23 = vrot.slane %v13302_v45, 4 }
 0x1ad   :  { %v1827_v18 = vsel %vm1800_vm2, %v1824_v8, %v1826_v13  ;;  %v11672_v8 = vld [vmem:[%s16361_s5 + $0x764] ss:$8 sps:$4 sm:$0xff]  }
 0x1ae   :  { %v1342_v26 = vmax.f32 %v1291_v24, 0.0  ;;  %v1341_v28 = vmax.f32 %v1290_v41, 0.0  ;;  %v1829_v19 = vsel %vm1800_vm2, %v1826_v13, %v1828_v33  ;;  %v1831_v24 = vsel %vm1800_vm2, %v1828_v33, %v1830_v23  ;;  %v11678_v13 = vld [vmem:[%s16361_s5 + $0x774] ss:$8 sps:$4 sm:$0xff]  }
 0x1af   :  { %v1832_v41 = vrot.slane %v13316_v9, 4 }
 0x1b0   :  { %v13448_v30 = vpack.c.bf16 %v1342_v26, %v1341_v28  ;;  %v1834_v28 = vrot.slane %v13350_v44, 4 }
 0x1b1   :  { %v1833_v26 = vsel %vm1800_vm2, %v1830_v23, %v1832_v41 }
 0x1b2   :  { %10900 = vmatmul.mubr.msk.bf16.gmra.mrb[96].mxu0 %vm1403_vm1, %v13448_v30  ;;  %v1835_v20 = vsel %vm1800_vm2, %v1832_v41, %v1834_v28  ;;  %v1848_v53 = vrot.slane %v13448_v30, 4  ;;  %v12790_v41 = vld [vmem:[%s16359_s1 + $0x1] ss:$0 sm:$0xff] }
 0x1b3   :  { %10911 = vmatprep.mubr.msk.bf16.mxu0 %vm12796_vm0, %v12795_v4 }
 0x1ba   :  { %10912 = vmatmul.mubr.msk.bf16.vlgmr.msra.gmra.mrb[0].mxu0 %vm1403_vm1, %v1803_v34  ;;  %v1838_v34 = vrot.slane %v13378_v48, 4 }
 0x1bb   :  { %11012 = vmatpush3.bf16.msra.mxu0 %v11587_v31  ;;  %10915 = vmatprep.mubr.msk.bf16.mxu0 %vm12796_vm0, %v12795_v4  ;;  %v1837_v31 = vsel %vm1800_vm2, %v1834_v28, %v1836_v32  ;;  %v12791_v28 = vld [vmem:[%s16359_s1 + $0x2] ss:$0 sm:$0xff] }
 0x1bc   :  { %11013 = vmatprep.subr.bf16.mxu0 %v12795_v4 }
 0x1bf   :  { %11014 = vmatpush3.bf16.msra.mxu0 %v11588_v36  ;;  %v1839_v36 = vsel %vm1800_vm2, %v1836_v32, %v1838_v34 }
 0x1c0   :  { %11015 = vmatprep.subr.bf16.mxu0 %v12795_v4 }
 0x1c2   :  { %10916 = vmatmul.mubr.msk.bf16.gmra.mrb[4].mxu0 %vm1403_vm1, %v1805_v39  ;;  %v1842_v39 = vrot.slane %v13406_v55, 4 }
 0x1c3   :  { %10919 = vmatprep.mubr.msk.bf16.mxu0 %vm12796_vm0, %v12795_v4  ;;  %11016 = vmatpush3.bf16.msra.mxu0 %v11589_v37  ;;  %v1841_v37 = vsel %vm1800_vm2, %v1838_v34, %v1840_v59 }
 0x1c4   :  { %11017 = vmatprep.subr.bf16.mxu0 %v12795_v4  ;;  %v1843_v40 = vsel %vm1800_vm2, %v1840_v59, %v1842_v39 }
 0x1c7   :  { %11018 = vmatpush3.bf16.msra.mxu0 %v11590_v43 }
 0x1ca   :  { %10920 = vmatmul.mubr.msk.bf16.gmra.mrb[8].mxu0 %vm1403_vm1, %v1807_v42  ;;  %v1844_v42 = vrot.slane %v13420_v25, 4 }
 0x1cb   :  { %10923 = vmatprep.mubr.msk.bf16.mxu0 %vm12796_vm0, %v12795_v4 }
 0x1cc   :  { %v1845_v43 = vsel %vm1800_vm2, %v1842_v39, %v1844_v42 }
 0x1d2   :  { %10924 = vmatmul.mubr.msk.bf16.gmra.mrb[12].mxu0 %vm1403_vm1, %v1809_v51  ;;  %v1847_v51 = vsel %vm1800_vm2, %v1844_v42, %v1846_v46  ;;  %v11615_v42 = vld [vmem:[%s16361_s5 + $0x80] ss:$8 sps:$4 sm:$0xff]  }
 0x1d3   :  { %10927 = vmatprep.mubr.msk.bf16.mxu0 %vm12796_vm0, %v12795_v4 }
 0x1da   :  { %10928 = vmatmul.mubr.msk.bf16.gmra.mrb[16].mxu0 %vm1403_vm1, %v1811_v54  ;;  %v1849_v54 = vsel %vm1800_vm2, %v1846_v46, %v1848_v53 }
 0x1db   :  { %10931 = vmatprep.mubr.msk.bf16.mxu0 %vm12796_vm0, %v12795_v4 }
 0x1e2   :  { %10932 = vmatmul.mubr.msk.bf16.gmra.mrb[20].mxu0 %vm1403_vm1, %v1813_v58  ;;  %v11608_v58 = vld [vmem:[%s16361_s5 + $0x54] ss:$8 sps:$4 sm:$0xff]  }
 0x1e3   :  { %10935 = vmatprep.mubr.msk.bf16.mxu0 %vm12796_vm0, %v12795_v4 }
 0x1ea   :  { %10936 = vmatmul.mubr.msk.bf16.gmra.mrb[24].mxu0 %vm1403_vm1, %v1815_v61  ;;  %v11609_v61 = vld [vmem:[%s16361_s5 + $0x60] ss:$8 sps:$4 sm:$0xff]  }
 0x1eb   :  { %10939 = vmatprep.mubr.msk.bf16.mxu0 %vm12796_vm0, %v12795_v4 }
 0x1f2   :  { %10940 = vmatmul.mubr.msk.bf16.gmra.mrb[28].mxu0 %vm1403_vm1, %v1817_v63  ;;  %v11617_v63 = vld [vmem:[%s16361_s5 + $0x84] ss:$8 sps:$4 sm:$0xff]  }
 0x1f3   :  { %10943 = vmatprep.mubr.msk.bf16.mxu0 %vm12796_vm0, %v12795_v4 }
 0x1fa   :  { %10944 = vmatmul.mubr.msk.bf16.gmra.mrb[32].mxu0 %vm1403_vm1, %v1819_v3  ;;  %v11650_v3 = vld [vmem:[%s16361_s5 + $0x720] ss:$8 sps:$4 sm:$0xff]  }
 0x1fb   :  { %10947 = vmatprep.mubr.msk.bf16.mxu0 %vm12796_vm0, %v12795_v4 }
 0x202   :  { %10948 = vmatmul.mubr.msk.bf16.gmra.mrb[36].mxu0 %vm1403_vm1, %v1821_v5  ;;  %v11660_v5 = vld [vmem:[%s16361_s5 + $0x744] ss:$8 sps:$4 sm:$0xff]  }
 0x203   :  { %10951 = vmatprep.mubr.msk.bf16.mxu0 %vm12796_vm0, %v12795_v4 }
 0x20a   :  { %10952 = vmatmul.mubr.msk.bf16.gmra.mrb[40].mxu0 %vm1403_vm1, %v1823_v7  ;;  %v11666_v7 = vld [vmem:[%s16361_s5 + $0x754] ss:$8 sps:$4 sm:$0xff]  }
 0x20b   :  { %10955 = vmatprep.mubr.msk.bf16.mxu0 %vm12796_vm0, %v12795_v4 }
 0x212   :  { %10956 = vmatmul.mubr.msk.bf16.gmra.mrb[44].mxu0 %vm1403_vm1, %v1825_v12  ;;  %v11674_v12 = vld [vmem:[%s16361_s5 + $0x760] ss:$8 sps:$4 sm:$0xff]  }
 0x213   :  { %10959 = vmatprep.mubr.msk.bf16.mxu0 %vm12796_vm0, %v12795_v4 }
 0x21a   :  { %10960 = vmatmul.mubr.msk.bf16.gmra.mrb[48].mxu0 %vm1403_vm1, %v1827_v18  ;;  %v11686_v18 = vld [vmem:[%s16361_s5 + $0x784] ss:$8 sps:$4 sm:$0xff]  }
 0x21b   :  { %10963 = vmatprep.mubr.msk.bf16.mxu0 %vm12796_vm0, %v12795_v4 }
 0x222   :  { %10964 = vmatmul.mubr.msk.bf16.gmra.mrb[52].mxu0 %vm1403_vm1, %v1829_v19  ;;  %v772_v19 = vpop.permute.xlu1 %771 }
 0x223   :  { %10967 = vmatprep.mubr.msk.bf16.mxu0 %vm12796_vm0, %v12795_v4 }
 0x22a   :  { %10968 = vmatmul.mubr.msk.bf16.gmra.mrb[56].mxu0 %vm1403_vm1, %v1831_v24 }
 0x22b   :  { %10971 = vmatprep.mubr.msk.bf16.mxu0 %vm12796_vm0, %v12795_v4 }
 0x232   :  { %10972 = vmatmul.mubr.msk.bf16.gmra.mrb[60].mxu0 %vm1403_vm1, %v1833_v26 }
 0x233   :  { %10975 = vmatprep.mubr.msk.bf16.mxu0 %vm12796_vm0, %v12795_v4 }
 0x23a   :  { %10976 = vmatmul.mubr.msk.bf16.gmra.mrb[64].mxu0 %vm1403_vm1, %v1835_v20 }
 0x23b   :  { %10979 = vmatprep.mubr.msk.bf16.mxu0 %vm12796_vm0, %v12795_v4 }
 0x242   :  { %10980 = vmatmul.mubr.msk.bf16.gmra.mrb[68].mxu0 %vm1403_vm1, %v1837_v31 }
 0x243   :  { %10983 = vmatprep.mubr.msk.bf16.mxu0 %vm12796_vm0, %v12795_v4 }
 0x24a   :  { %10984 = vmatmul.mubr.msk.bf16.gmra.mrb[72].mxu0 %vm1403_vm1, %v1839_v36 }
 0x24b   :  { %10987 = vmatprep.mubr.msk.bf16.mxu0 %vm12796_vm0, %v12795_v4 }
 0x252   :  { %10988 = vmatmul.mubr.msk.bf16.gmra.mrb[76].mxu0 %vm1403_vm1, %v1841_v37 }
 0x253   :  { %10991 = vmatprep.mubr.msk.bf16.mxu0 %vm12796_vm0, %v12795_v4 }
 0x25a   :  { %10992 = vmatmul.mubr.msk.bf16.gmra.mrb[80].mxu0 %vm1403_vm1, %v1843_v40 }
 0x25b   :  { %10995 = vmatprep.mubr.msk.bf16.mxu0 %vm12796_vm0, %v12795_v4 }
 0x262   :  { %10996 = vmatmul.mubr.msk.bf16.gmra.mrb[84].mxu0 %vm1403_vm1, %v1845_v43 }
 0x263   :  { %10999 = vmatprep.mubr.msk.bf16.mxu0 %vm12796_vm0, %v12795_v4 }
 0x26a   :  { %11000 = vmatmul.mubr.msk.bf16.gmra.mrb[88].mxu0 %vm1403_vm1, %v1847_v51 }
 0x26b   :  { %11003 = vmatprep.mubr.msk.bf16.mxu0 %vm12796_vm0, %v12795_v4 }
 0x272   :  { %11004 = vmatmul.mubr.msk.bf16.gmra.mrb[92].mxu0 %vm1403_vm1, %v1849_v54 }
 0x273   :  { %11007 = vmatprep.mubr.msk.bf16.mxu0 %vm12796_vm0, %v12795_v4 }
 0x27a   :  { %11008 = vmatmul.mubr.msk.bf16.gmra.mrb[96].mxu0 %vm1403_vm1, %v1848_v53  ;;  %v11620_v53 = vld [vmem:[%s16361_s5 + $0x94] ss:$8 sps:$4 sm:$0xff]  }
 0x27b   :  { %11019 = vmatprep.mubr.msk.bf16.mxu0 %vm12796_vm0, %v12795_v4 }
 0x282   :  { %11020 = vmatmul.mubr.msk.bf16.vlgmr.msra.gmra.mrb[0].mxu0 %vm1403_vm1, %v13020_v21  ;;  %v11591_v21 = vld [vmem:[%s16361_s5] ss:$8 sps:$4 sm:$0xff]  }
 0x283   :  { %11023 = vmatprep.mubr.msk.bf16.mxu0 %vm12796_vm0, %v12795_v4 }
 0x28a   :  { %11024 = vmatmul.mubr.msk.bf16.gmra.mrb[4].mxu0 %vm1403_vm1, %v13043_v49  ;;  %v11593_v49 = vld [vmem:[%s16361_s5 + $0x4] ss:$8 sps:$4 sm:$0xff]  }
 0x28b   :  { %11027 = vmatprep.mubr.msk.bf16.mxu0 %vm12796_vm0, %v12795_v4  ;;  %2718 = vmatprep.subr.bf16.mxu0 %v11593_v49 }
 0x28c   :  { %2719 = vmatpush1.bf16.msra.mxu0 %v11591_v21  ;;  %v11618_v21 = vld [vmem:[%s16361_s5 + $0x90] ss:$8 sps:$4 sm:$0xff]  }
 0x292   :  { %11028 = vmatmul.mubr.msk.bf16.gmra.mrb[8].mxu0 %vm1403_vm1, %v13064_v11  ;;  %v11594_v11 = vld [vmem:[%s16361_s5 + $0x10] ss:$8 sps:$4 sm:$0xff]  }
 0x293   :  { %11031 = vmatprep.mubr.msk.bf16.mxu0 %vm12796_vm0, %v12795_v4 }
 0x29a   :  { %11032 = vmatmul.mubr.msk.bf16.gmra.mrb[12].mxu0 %vm1403_vm1, %v13084_v38  ;;  %v11596_v38 = vld [vmem:[%s16361_s5 + $0x14] ss:$8 sps:$4 sm:$0xff]  }
 0x29b   :  { %11035 = vmatprep.mubr.msk.bf16.mxu0 %vm12796_vm0, %v12795_v4  ;;  %2720 = vmatprep.subr.bf16.mxu0 %v11596_v38 }
 0x29c   :  { %2721 = vmatpush1.bf16.msra.mxu0 %v11594_v11 }
 0x2a2   :  { %11036 = vmatmul.mubr.msk.bf16.gmra.mrb[16].mxu0 %vm1403_vm1, %v13104_v1  ;;  %v11599_v1 = vld [vmem:[%s16361_s5 + $0x24] ss:$8 sps:$4 sm:$0xff]  }
 0x2a3   :  { %11039 = vmatprep.mubr.msk.bf16.mxu0 %vm12796_vm0, %v12795_v4  ;;  %2722 = vmatprep.subr.bf16.mxu0 %v11599_v1 }
 0x2aa   :  { %11040 = vmatmul.mubr.msk.bf16.gmra.mrb[20].mxu0 %vm1403_vm1, %v13124_v27  ;;  %v11597_v27 = vld [vmem:[%s16361_s5 + $0x20] ss:$8 sps:$4 sm:$0xff]  }
 0x2ab   :  { %11043 = vmatprep.mubr.msk.bf16.mxu0 %vm12796_vm0, %v12795_v4  ;;  %2723 = vmatpush1.bf16.msra.mxu0 %v11597_v27 }
 0x2b2   :  { %11044 = vmatmul.mubr.msk.bf16.gmra.mrb[24].mxu0 %vm1403_vm1, %v13148_v57  ;;  %v11602_v57 = vld [vmem:[%s16361_s5 + $0x34] ss:$8 sps:$4 sm:$0xff]  }
 0x2b3   :  { %11047 = vmatprep.mubr.msk.bf16.mxu0 %vm12796_vm0, %v12795_v4  ;;  %2724 = vmatprep.subr.bf16.mxu0 %v11602_v57  ;;  %v11623_v57 = vld [vmem:[%s16361_s5 + $0xa4] ss:$8 sps:$4 sm:$0xff]  }
 0x2ba   :  { %11048 = vmatmul.mubr.msk.bf16.gmra.mrb[28].mxu0 %vm1403_vm1, %v13168_v22  ;;  %v11600_v22 = vld [vmem:[%s16361_s5 + $0x30] ss:$8 sps:$4 sm:$0xff]  }
 0x2bb   :  { %11051 = vmatprep.mubr.msk.bf16.mxu0 %vm12796_vm0, %v12795_v4  ;;  %2725 = vmatpush1.bf16.msra.mxu0 %v11600_v22  ;;  %v11621_v22 = vld [vmem:[%s16361_s5 + $0xa0] ss:$8 sps:$4 sm:$0xff]  }
 0x2c2   :  { %11052 = vmatmul.mubr.msk.bf16.gmra.mrb[32].mxu0 %vm1403_vm1, %v13188_v52  ;;  %v11605_v52 = vld [vmem:[%s16361_s5 + $0x44] ss:$8 sps:$4 sm:$0xff]  }
 0x2c3   :  { %11055 = vmatprep.mubr.msk.bf16.mxu0 %vm12796_vm0, %v12795_v4  ;;  %2726 = vmatprep.subr.bf16.mxu0 %v11605_v52 }
 0x2c4   :  { %2727 = vmatpush1.bf16.msra.mxu0 %v11603_v56 }
 0x2c5   :  { %2728 = vmatprep.subr.bf16.mxu0 %v11608_v58 }
 0x2c8   :  { %2729 = vmatpush1.bf16.msra.mxu0 %v11606_v60  ;;  %v11626_v60 = vld [vmem:[%s16361_s5 + $0xb4] ss:$8 sps:$4 sm:$0xff]  }
 0x2ca   :  { %11056 = vmatmul.mubr.msk.bf16.gmra.mrb[36].mxu0 %vm1403_vm1, %v13208_v17  ;;  %v11611_v17 = vld [vmem:[%s16361_s5 + $0x64] ss:$8 sps:$4 sm:$0xff]  }
 0x2cb   :  { %11059 = vmatprep.mubr.msk.bf16.mxu0 %vm12796_vm0, %v12795_v4  ;;  %2730 = vmatprep.subr.bf16.mxu0 %v11611_v17 }
 0x2cc   :  { %2731 = vmatpush1.bf16.msra.mxu0 %v11609_v61  ;;  %v11624_v61 = vld [vmem:[%s16361_s5 + $0xb0] ss:$8 sps:$4 sm:$0xff]  }
 0x2cd   :  { %2732 = vmatprep.subr.bf16.mxu0 %v11614_v62 }
 0x2d2   :  { %11060 = vmatmul.mubr.msk.bf16.gmra.mrb[40].mxu0 %vm1403_vm1, %v13232_v50  ;;  %v11612_v50 = vld [vmem:[%s16361_s5 + $0x70] ss:$8 sps:$4 sm:$0xff]  }
 0x2d3   :  { %11063 = vmatprep.mubr.msk.bf16.mxu0 %vm12796_vm0, %v12795_v4  ;;  %2733 = vmatpush1.bf16.msra.mxu0 %v11612_v50 }
 0x2d4   :  { %2871 = vmatprep.subr.bf16.mxu0 %v11617_v63 }
 0x2da   :  { %11064 = vmatmul.mubr.msk.bf16.gmra.mrb[44].mxu0 %vm1403_vm1, %v13252_v16  ;;  %v11636_v16 = vld [vmem:[%s16361_s5 + $0x704] ss:$8 sps:$4 sm:$0xff]  }
 0x2db   :  { %11067 = vmatprep.mubr.msk.bf16.mxu0 %vm12796_vm0, %v12795_v4  ;;  %4696 = vmatprep.subr.bf16.mxu1 %v11636_v16 }
 0x2e2   :  { %11068 = vmatmul.mubr.msk.bf16.gmra.mrb[48].mxu0 %vm1403_vm1, %v13271_v47  ;;  %v11638_v47 = vld [vmem:[%s16361_s5 + $0x700] ss:$8 sps:$4 sm:$0xff]  }
 0x2e3   :  { %11071 = vmatprep.mubr.msk.bf16.mxu0 %vm12796_vm0, %v12795_v4  ;;  %4697 = vmatpush1.bf16.msra.mxu1 %v11638_v47 }
 0x2ea   :  { %11072 = vmatmul.mubr.msk.bf16.gmra.mrb[52].mxu0 %vm1403_vm1, %v13288_v14  ;;  %v11642_v14 = vld [vmem:[%s16361_s5 + $0x714] ss:$8 sps:$4 sm:$0xff]  }
 0x2eb   :  { %11075 = vmatprep.mubr.msk.bf16.mxu0 %vm12796_vm0, %v12795_v4  ;;  %4698 = vmatprep.subr.bf16.mxu1 %v11642_v14  ;;  %v11629_v14 = vld [vmem:[%s16361_s5 + $0xc4] ss:$8 sps:$4 sm:$0xff]  }
 0x2f2   :  { %11076 = vmatmul.mubr.msk.bf16.gmra.mrb[56].mxu0 %vm1403_vm1, %v13302_v45  ;;  %v11644_v45 = vld [vmem:[%s16361_s5 + $0x710] ss:$8 sps:$4 sm:$0xff]  }
 0x2f3   :  { %11079 = vmatprep.mubr.msk.bf16.mxu0 %vm12796_vm0, %v12795_v4  ;;  %4699 = vmatpush1.bf16.msra.mxu1 %v11644_v45  ;;  %v11627_v45 = vld [vmem:[%s16361_s5 + $0xc0] ss:$8 sps:$4 sm:$0xff]  }
 0x2f4   :  { %4700 = vmatprep.subr.bf16.mxu1 %v11648_v2 }
 0x2f7   :  { %4701 = vmatpush1.bf16.msra.mxu1 %v11650_v3 }
 0x2f8   :  { %4702 = vmatprep.subr.bf16.mxu1 %v11654_v35 }
 0x2fa   :  { %11080 = vmatmul.mubr.msk.bf16.gmra.mrb[60].mxu0 %vm1403_vm1, %v13316_v9  ;;  %v11656_v9 = vld [vmem:[%s16361_s5 + $0x730] ss:$8 sps:$4 sm:$0xff]  }
 0x2fb   :  { %11083 = vmatprep.mubr.msk.bf16.mxu0 %vm12796_vm0, %v12795_v4  ;;  %4703 = vmatpush1.bf16.msra.mxu1 %v11656_v9  ;;  %v11632_v9 = vld [vmem:[%s16361_s5 + $0xd4] ss:$8 sps:$4 sm:$0xff]  }
 0x2fc   :  { %4704 = vmatprep.subr.bf16.mxu1 %v11660_v5 }
 0x2ff   :  { %4705 = vmatpush1.bf16.msra.mxu1 %v11662_v6  ;;  %v11630_v6 = vld [vmem:[%s16361_s5 + $0xd0] ss:$8 sps:$4 sm:$0xff]  }
 0x300   :  { %4706 = vmatprep.subr.bf16.mxu1 %v11666_v7 }
 0x302   :  { %11084 = vmatmul.mubr.msk.bf16.gmra.mrb[64].mxu0 %vm1403_vm1, %v13350_v44  ;;  %v11668_v44 = vld [vmem:[%s16361_s5 + $0x750] ss:$8 sps:$4 sm:$0xff]  }
 0x303   :  { %11087 = vmatprep.mubr.msk.bf16.mxu0 %vm12796_vm0, %v12795_v4  ;;  %4707 = vmatpush1.bf16.msra.mxu1 %v11668_v44 }
 0x304   :  { %4708 = vmatprep.subr.bf16.mxu1 %v11672_v8 }
 0x307   :  { %4709 = vmatpush1.bf16.msra.mxu1 %v11674_v12 }
 0x308   :  { %4710 = vmatprep.subr.bf16.mxu1 %v11678_v13 }
 0x30a   :  { %11088 = vmatmul.mubr.msk.bf16.gmra.mrb[68].mxu0 %vm1403_vm1, %v13364_v10  ;;  %v11680_v10 = vld [vmem:[%s16361_s5 + $0x770] ss:$8 sps:$4 sm:$0xff]  }
 0x30b   :  { %11091 = vmatprep.mubr.msk.bf16.mxu0 %vm12796_vm0, %v12795_v4  ;;  %4711 = vmatpush1.bf16.msra.mxu1 %v11680_v10  ;;  %v11635_v10 = vld [vmem:[%s16361_s5 + $0xe4] ss:$8 sps:$4 sm:$0xff]  }
 0x30c   :  { %4838 = vmatprep.subr.bf16.mxu1 %v11686_v18  ;;  %v11633_v18 = vld [vmem:[%s16361_s5 + $0xe0] ss:$8 sps:$4 sm:$0xff]  }
 0x312   :  { %11092 = vmatmul.mubr.msk.bf16.gmra.mrb[72].mxu0 %vm1403_vm1, %v13378_v48  ;;  %v353_v48 = vpop.permute.xlu0 %352 }
 0x313   :  { %11095 = vmatprep.mubr.msk.bf16.mxu0 %vm12796_vm0, %v12795_v4 }
 0x316   :  { %v1185_v24 = vpop.permute.xlu0 %1184 }
 0x317   :  { %v1241_v20 = vmul.f32 %v12791_v28, %v1185_v24 }
 0x31a   :  { %11096 = vmatmul.mubr.msk.bf16.gmra.mrb[76].mxu0 %vm1403_vm1, %v13392_v15  ;;  %v12788_v15 = vld [vmem:[%s16359_s1] ss:$0 sm:$0xff] }
 0x31b   :  { %11099 = vmatprep.mubr.msk.bf16.mxu0 %vm12796_vm0, %v12795_v4  ;;  %v409_v33 = vmul.f32 %v12788_v15, %v353_v48 }
 0x322   :  { %11100 = vmatmul.mubr.msk.bf16.gmra.mrb[80].mxu0 %vm1403_vm1, %v13406_v55  ;;  %v12789_v55 = vld [vmem:[%s16360_s2] ss:$0 sm:$0xff] }
 0x323   :  { %11103 = vmatprep.mubr.msk.bf16.mxu0 %vm12796_vm0, %v12795_v4  ;;  %v466_v23 = vadd.f32 %v12789_v55, %v409_v33 }
 0x32a   :  { %11104 = vmatmul.mubr.msk.bf16.gmra.mrb[84].mxu0 %vm1403_vm1, %v13420_v25  ;;  %v828_v25 = vmul.f32 %v12790_v41, %v772_v19  ;;  %v11641_v19 = vld [vmem:[%s16361_s5 + $0xf4] ss:$8 sps:$4 sm:$0xff]  }
 0x32b   :  { %11107 = vmatprep.mubr.msk.bf16.mxu0 %vm12796_vm0, %v12795_v4 }
 0x32c   :  { %v879_v26 = vadd.f32 %v828_v25, %v466_v23  ;;  %v11639_v23 = vld [vmem:[%s16361_s5 + $0xf0] ss:$8 sps:$4 sm:$0xff]  }
 0x32e   :  { %v1292_v32 = vadd.f32 %v1241_v20, %v879_v26  ;;  %v11647_v20 = vld [vmem:[%s16361_s5 + $0x104] ss:$8 sps:$4 sm:$0xff]  }
 0x330   :  { %v1343_v31 = vmax.f32 %v1292_v32, 0.0  ;;  %v11645_v32 = vld [vmem:[%s16361_s5 + $0x100] ss:$8 sps:$4 sm:$0xff]  }
 0x332   :  { %11108 = vmatmul.mubr.msk.bf16.gmra.mrb[88].mxu0 %vm1403_vm1, %v13434_v29  ;;  %v1369_v34 = vpack.c.bf16 %v1343_v31, %v1343_v31  ;;  %v13808_v29 = vld [vmem:[%s16362_s4] ss:$0 sm:$0xff] }
 0x333   :  { %11111 = vmatprep.mubr.msk.bf16.mxu0 %vm12796_vm0, %v12795_v4 }
 0x33a   :  { %11112 = vmatmul.mubr.msk.bf16.gmra.mrb[92].mxu0 %vm1403_vm1, %v13448_v30 }
 0x33b   :  { %11115 = vmatprep.mubr.msk.bf16.mxu0 %vm12796_vm0, %v12795_v4 }
 0x342   :  { %11116 = vmatmul.mubr.msk.bf16.gmra.mrb[96].mxu0 %vm1403_vm1, %v1369_v34 }
 0x343   :  { %2750 = vmatprep.mubr.bf16.mxu0 %v12794_v0 }
 0x355   :  { %v2300_v36 = vpop.f32.mrb[0].mxu0 }
 0x356   :  { %v11133_v59 = vadd.f32 %v13808_v29, %v2300_v36  ;;  %v11021_v37 = vpop.f32.mrb[1].mxu0 }
 0x357   :  { %v2303_v39 = vpop.f32.mrb[2].mxu0  ;;  %v11653_v37 = vld [vmem:[%s16361_s5 + $0x114] ss:$8 sps:$4 sm:$0xff]  }
 0x358   :  { %v11134_v30 = vadd.f32 %v13808_v29, %v2303_v39  ;;  %v11022_v40 = vpop.f32.mrb[3].mxu0  ;;  %v2547_v43 = vmax.f32 %v11133_v59, 0.0 }
 0x35a   :  { %v2548_v46 = vmax.f32 %v11134_v30, 0.0  ;;  %v11651_v30 = vld [vmem:[%s16361_s5 + $0x110] ss:$8 sps:$4 sm:$0xff]  }
 0x35c   :  { %v13815_v51 = vpack.c.bf16 %v2548_v46, %v2547_v43 }
 0x35d   :  { %v2308_v54 = vpop.f32.mrb[4].mxu0 }
 0x35e   :  { %v11135_v49 = vadd.f32 %v13808_v29, %v2308_v54  ;;  %v11025_v11 = vpop.f32.mrb[5].mxu0  ;;  %2751 = vmatmul.mubr.bf16.vlgmr.msra.gmra.mrb[100].mxu0 %v13815_v51  ;;  %v2789_v36 = vrot.slane %v13815_v51, 4  ;;  %v11657_v54 = vld [vmem:[%s16361_s5 + $0x120] ss:$8 sps:$4 sm:$0xff]  }
 0x35f   :  { %2872 = vmatpush1.bf16.msra.mxu0 %v11615_v42  ;;  %v2311_v38 = vpop.f32.mrb[6].mxu0  ;;  %2903 = vmatprep.mubr.bf16.mxu0 %v12794_v0 }
 0x360   :  { %v11136_v1 = vadd.f32 %v13808_v29, %v2311_v38  ;;  %v11026_v27 = vpop.f32.mrb[7].mxu0  ;;  %2873 = vmatprep.subr.bf16.mxu0 %v11620_v53  ;;  %v2549_v52 = vmax.f32 %v11135_v49, 0.0  ;;  %v11659_v53 = vld [vmem:[%s16361_s5 + $0x124] ss:$8 sps:$4 sm:$0xff]   ;;  %v11665_v38 = vld [vmem:[%s16361_s5 + $0x134] ss:$8 sps:$4 sm:$0xff]  }
 0x361   :  { %v11663_v27 = vld [vmem:[%s16361_s5 + $0x130] ss:$8 sps:$4 sm:$0xff]  }
 0x362   :  { %v2550_v56 = vmax.f32 %v11136_v1, 0.0 }
 0x363   :  { %2874 = vmatpush1.bf16.msra.mxu0 %v11618_v21 }
 0x364   :  { %v13833_v58 = vpack.c.bf16 %v2550_v56, %v2549_v52  ;;  %2875 = vmatprep.subr.bf16.mxu0 %v11623_v57 }
 0x365   :  { %v2316_v17 = vpop.f32.mrb[8].mxu0 }
 0x366   :  { %v11137_v62 = vadd.f32 %v13808_v29, %v2316_v17  ;;  %v11029_v50 = vpop.f32.mrb[9].mxu0  ;;  %v11671_v17 = vld [vmem:[%s16361_s5 + $0x144] ss:$8 sps:$4 sm:$0xff]  }
 0x367   :  { %2876 = vmatpush1.bf16.msra.mxu0 %v11621_v22  ;;  %v2319_v63 = vpop.f32.mrb[10].mxu0 }
 0x368   :  { %v11138_v16 = vadd.f32 %v13808_v29, %v2319_v63  ;;  %v11030_v47 = vpop.f32.mrb[11].mxu0  ;;  %2877 = vmatprep.subr.bf16.mxu0 %v11626_v60  ;;  %v2551_v2 = vmax.f32 %v11137_v62, 0.0 }
 0x36a   :  { %v2552_v3 = vmax.f32 %v11138_v16, 0.0  ;;  %v11677_v16 = vld [vmem:[%s16361_s5 + $0x154] ss:$8 sps:$4 sm:$0xff]  }
 0x36b   :  { %2878 = vmatpush1.bf16.msra.mxu0 %v11624_v61  ;;  %v11669_v61 = vld [vmem:[%s16361_s5 + $0x140] ss:$8 sps:$4 sm:$0xff]  }
 0x36c   :  { %v13849_v35 = vpack.c.bf16 %v2552_v3, %v2551_v2  ;;  %2879 = vmatprep.subr.bf16.mxu0 %v11629_v14  ;;  %v11675_v14 = vld [vmem:[%s16361_s5 + $0x150] ss:$8 sps:$4 sm:$0xff]  }
 0x36d   :  { %v2324_v5 = vpop.f32.mrb[12].mxu0 }
 0x36e   :  { %v11139_v7 = vadd.f32 %v13808_v29, %v2324_v5  ;;  %v11033_v44 = vpop.f32.mrb[13].mxu0 }
 0x36f   :  { %2880 = vmatpush1.bf16.msra.mxu0 %v11627_v45  ;;  %v2327_v8 = vpop.f32.mrb[14].mxu0  ;;  %v11684_v44 = vld [vmem:[%s16361_s5 + $0x780] ss:$8 sps:$4 sm:$0xff]  }
 0x370   :  { %v11140_v12 = vadd.f32 %v13808_v29, %v2327_v8  ;;  %v11034_v13 = vpop.f32.mrb[15].mxu0  ;;  %2881 = vmatprep.subr.bf16.mxu0 %v11632_v9  ;;  %v2553_v48 = vmax.f32 %v11139_v7, 0.0  ;;  %v11681_v7 = vld [vmem:[%s16361_s5 + $0x160] ss:$8 sps:$4 sm:$0xff]  }
 0x372   :  { %v2554_v15 = vmax.f32 %v11140_v12, 0.0 }
 0x373   :  { %2882 = vmatpush1.bf16.msra.mxu0 %v11630_v6  ;;  %v11683_v6 = vld [vmem:[%s16361_s5 + $0x164] ss:$8 sps:$4 sm:$0xff]  }
 0x374   :  { %v13865_v33 = vpack.c.bf16 %v2554_v15, %v2553_v48  ;;  %2883 = vmatprep.subr.bf16.mxu0 %v11635_v10  ;;  %v11689_v10 = vld [vmem:[%s16361_s5 + $0x174] ss:$8 sps:$4 sm:$0xff]   ;;  %v11687_v15 = vld [vmem:[%s16361_s5 + $0x170] ss:$8 sps:$4 sm:$0xff]  }
 0x375   :  { %v2332_v55 = vpop.f32.mrb[16].mxu0 }
 0x376   :  { %v11141_v24 = vadd.f32 %v13808_v29, %v2332_v55  ;;  %v11037_v41 = vpop.f32.mrb[17].mxu0 }
 0x377   :  { %2884 = vmatpush1.bf16.msra.mxu0 %v11633_v18  ;;  %v2335_v25 = vpop.f32.mrb[18].mxu0  ;;  %v11692_v18 = vld [vmem:[%s16361_s5 + $0x794] ss:$8 sps:$4 sm:$0xff]  }
 0x378   :  { %v11142_v26 = vadd.f32 %v13808_v29, %v2335_v25  ;;  %v11038_v28 = vpop.f32.mrb[19].mxu0  ;;  %2885 = vmatprep.subr.bf16.mxu0 %v11641_v19  ;;  %v2555_v31 = vmax.f32 %v11141_v24, 0.0  ;;  %v11690_v19 = vld [vmem:[%s16361_s5 + $0x790] ss:$8 sps:$4 sm:$0xff]  }
 0x379   :  { %v11698_v28 = vld [vmem:[%s16361_s5 + $0x7a4] ss:$8 sps:$4 sm:$0xff]  }
 0x37a   :  { %v2556_v34 = vmax.f32 %v11142_v26, 0.0  ;;  %v11695_v26 = vld [vmem:[%s16361_s5 + $0x184] ss:$8 sps:$4 sm:$0xff]  }
 0x37b   :  { %2886 = vmatpush1.bf16.msra.mxu0 %v11639_v23 }
 0x37c   :  { %v13882_v59 = vpack.c.bf16 %v2556_v34, %v2555_v31  ;;  %3010 = vmatprep.subr.bf16.mxu0 %v11647_v20  ;;  %v11693_v20 = vld [vmem:[%s16361_s5 + $0x180] ss:$8 sps:$4 sm:$0xff]  }
 0x37d   :  { %v2340_v39 = vpop.f32.mrb[20].mxu0 }
 0x37e   :  { %v11143_v40 = vadd.f32 %v13808_v29, %v2340_v39  ;;  %2904 = vmatmul.mubr.bf16.vlgmr.msra.gmra.mrb[100].mxu0 %v2789_v36  ;;  %v11041_v42 = vpop.f32.mrb[21].mxu0  ;;  %v11704_v39 = vld [vmem:[%s16361_s5 + $0x7b4] ss:$8 sps:$4 sm:$0xff]  }
 0x37f   :  { %3011 = vmatpush1.bf16.msra.mxu0 %v11645_v32  ;;  %v2343_v43 = vpop.f32.mrb[22].mxu0  ;;  %3042 = vmatprep.mubr.bf16.mxu0 %v12794_v0  ;;  %v11696_v32 = vld [vmem:[%s16361_s5 + $0x7a0] ss:$8 sps:$4 sm:$0xff]  }
 0x380   :  { %v11144_v46 = vadd.f32 %v13808_v29, %v2343_v43  ;;  %v11042_v51 = vpop.f32.mrb[23].mxu0  ;;  %3012 = vmatprep.subr.bf16.mxu0 %v11653_v37  ;;  %v2557_v21 = vmax.f32 %v11143_v40, 0.0  ;;  %v11701_v37 = vld [vmem:[%s16361_s5 + $0x194] ss:$8 sps:$4 sm:$0xff]  }
 0x381   :  { %v11702_v51 = vld [vmem:[%s16361_s5 + $0x7b0] ss:$8 sps:$4 sm:$0xff]  }
 0x382   :  { %v2558_v49 = vmax.f32 %v11144_v46, 0.0  ;;  %v11699_v46 = vld [vmem:[%s16361_s5 + $0x190] ss:$8 sps:$4 sm:$0xff]  }
 0x383   :  { %3013 = vmatpush1.bf16.msra.mxu0 %v11651_v30 }
 0x384   :  { %v13899_v11 = vpack.c.bf16 %v2558_v49, %v2557_v21  ;;  %3014 = vmatprep.subr.bf16.mxu0 %v11659_v53  ;;  %v11707_v21 = vld [vmem:[%s16361_s5 + $0x1a4] ss:$8 sps:$4 sm:$0xff]  }
 0x385   :  { %v2348_v1 = vpop.f32.mrb[24].mxu0  ;;  %v11710_v49 = vld [vmem:[%s16361_s5 + $0x7c4] ss:$8 sps:$4 sm:$0xff]  }
 0x386   :  { %v11145_v57 = vadd.f32 %v13808_v29, %v2348_v1  ;;  %v11045_v22 = vpop.f32.mrb[25].mxu0 }
 0x387   :  { %3015 = vmatpush1.bf16.msra.mxu0 %v11657_v54  ;;  %v2351_v52 = vpop.f32.mrb[26].mxu0 }
 0x388   :  { %v11146_v56 = vadd.f32 %v13808_v29, %v2351_v52  ;;  %v11046_v60 = vpop.f32.mrb[27].mxu0  ;;  %3016 = vmatprep.subr.bf16.mxu0 %v11665_v38  ;;  %v2559_v62 = vmax.f32 %v11145_v57, 0.0  ;;  %v11708_v57 = vld [vmem:[%s16361_s5 + $0x7c0] ss:$8 sps:$4 sm:$0xff]   ;;  %v11713_v52 = vld [vmem:[%s16361_s5 + $0x1b4] ss:$8 sps:$4 sm:$0xff]  }
 0x38a   :  { %v2560_v50 = vmax.f32 %v11146_v56, 0.0  ;;  %v11716_v56 = vld [vmem:[%s16361_s5 + $0x7d4] ss:$8 sps:$4 sm:$0xff]  }
 0x38b   :  { %3017 = vmatpush1.bf16.msra.mxu0 %v11663_v27  ;;  %v11705_v27 = vld [vmem:[%s16361_s5 + $0x1a0] ss:$8 sps:$4 sm:$0xff]  }
 0x38c   :  { %v13915_v63 = vpack.c.bf16 %v2560_v50, %v2559_v62  ;;  %3018 = vmatprep.subr.bf16.mxu0 %v11671_v17  ;;  %v11711_v50 = vld [vmem:[%s16361_s5 + $0x1b0] ss:$8 sps:$4 sm:$0xff]  }
 0x38d   :  { %v2356_v47 = vpop.f32.mrb[28].mxu0 }
 0x38e   :  { %v11147_v45 = vadd.f32 %v13808_v29, %v2356_v47  ;;  %v11049_v2 = vpop.f32.mrb[29].mxu0 }
 0x38f   :  { %3019 = vmatpush1.bf16.msra.mxu0 %v11669_v61  ;;  %v2359_v3 = vpop.f32.mrb[30].mxu0  ;;  %v11722_v2 = vld [vmem:[%s16361_s5 + $0x7e4] ss:$8 sps:$4 sm:$0xff]  }
 0x390   :  { %v11148_v9 = vadd.f32 %v13808_v29, %v2359_v3  ;;  %v11050_v5 = vpop.f32.mrb[31].mxu0  ;;  %3020 = vmatprep.subr.bf16.mxu0 %v11677_v16  ;;  %v2561_v8 = vmax.f32 %v11147_v45, 0.0  ;;  %v11714_v16 = vld [vmem:[%s16361_s5 + $0x7d0] ss:$8 sps:$4 sm:$0xff]   ;;  %v11719_v45 = vld [vmem:[%s16361_s5 + $0x1c4] ss:$8 sps:$4 sm:$0xff]  }
 0x391   :  { %v11717_v5 = vld [vmem:[%s16361_s5 + $0x1c0] ss:$8 sps:$4 sm:$0xff]  }
 0x392   :  { %v2562_v12 = vmax.f32 %v11148_v9, 0.0 }
 0x393   :  { %3021 = vmatpush1.bf16.msra.mxu0 %v11675_v14 }
 0x394   :  { %v13934_v13 = vpack.c.bf16 %v2562_v12, %v2561_v8  ;;  %3022 = vmatprep.subr.bf16.mxu0 %v11683_v6  ;;  %v11720_v6 = vld [vmem:[%s16361_s5 + $0x7e0] ss:$8 sps:$4 sm:$0xff]   ;;  %v11728_v8 = vld [vmem:[%s16361_s5 + $0x7f4] ss:$8 sps:$4 sm:$0xff]  }
 0x395   :  { %v2364_v48 = vpop.f32.mrb[32].mxu0 }
 0x396   :  { %v11149_v55 = vadd.f32 %v13808_v29, %v2364_v48  ;;  %v11053_v23 = vpop.f32.mrb[33].mxu0  ;;  %4729 = vmatmul.mubr.bf16.vlgmr.msra.gmra.mrb[0].mxu1 %v13934_v13 }
 0x397   :  { %3023 = vmatpush1.bf16.msra.mxu0 %v11681_v7  ;;  %4839 = vmatpush1.bf16.msra.mxu1 %v11684_v44  ;;  %v2367_v24 = vpop.f32.mrb[34].mxu0  ;;  %v11725_v44 = vld [vmem:[%s16361_s5 + $0x1d4] ss:$8 sps:$4 sm:$0xff]  }
 0x398   :  { %v11150_v41 = vadd.f32 %v13808_v29, %v2367_v24  ;;  %v11054_v25 = vpop.f32.mrb[35].mxu0  ;;  %3024 = vmatprep.subr.bf16.mxu0 %v11689_v10  ;;  %4840 = vmatprep.subr.bf16.mxu1 %v11692_v18  ;;  %v2563_v31 = vmax.f32 %v11149_v55, 0.0  ;;  %v11731_v24 = vld [vmem:[%s16361_s5 + $0x1e4] ss:$8 sps:$4 sm:$0xff]  }
 0x399   :  { %4870 = vmatprep.mubr.bf16.mxu1 %v12794_v0  ;;  %v11729_v25 = vld [vmem:[%s16361_s5 + $0x1e0] ss:$8 sps:$4 sm:$0xff]  }
 0x39a   :  { %v2564_v34 = vmax.f32 %v11150_v41, 0.0  ;;  %v11734_v41 = vld [vmem:[%s16361_s5 + $0x804] ss:$8 sps:$4 sm:$0xff]  }
 0x39b   :  { %3025 = vmatpush1.bf16.msra.mxu0 %v11687_v15  ;;  %4841 = vmatpush1.bf16.msra.mxu1 %v11690_v19  ;;  %v11723_v15 = vld [vmem:[%s16361_s5 + $0x1d0] ss:$8 sps:$4 sm:$0xff]  }
 0x39c   :  { %v13964_v36 = vpack.c.bf16 %v2564_v34, %v2563_v31  ;;  %3152 = vmatprep.subr.bf16.mxu0 %v11695_v26  ;;  %4842 = vmatprep.subr.bf16.mxu1 %v11698_v28  ;;  %v11726_v19 = vld [vmem:[%s16361_s5 + $0x7f0] ss:$8 sps:$4 sm:$0xff]   ;;  %v4756_v31 = vrot.slane %v13934_v13, 4 }
 0x39d   :  { %v2372_v30 = vpop.f32.mrb[36].mxu0  ;;  %v11735_v13 = vld [vmem:[%s16361_s5 + $0x1f0] ss:$8 sps:$4 sm:$0xff]  }
 0x39e   :  { %v11151_v40 = vadd.f32 %v13808_v29, %v2372_v30  ;;  %3043 = vmatmul.mubr.bf16.vlgmr.msra.gmra.mrb[100].mxu0 %v13833_v58  ;;  %v11057_v42 = vpop.f32.mrb[37].mxu0 }
 0x39f   :  { %3153 = vmatpush1.bf16.msra.mxu0 %v11693_v20  ;;  %4843 = vmatpush1.bf16.msra.mxu1 %v11696_v32  ;;  %v2375_v43 = vpop.f32.mrb[38].mxu0  ;;  %v11732_v20 = vld [vmem:[%s16361_s5 + $0x800] ss:$8 sps:$4 sm:$0xff]   ;;  %v11737_v32 = vld [vmem:[%s16361_s5 + $0x1f4] ss:$8 sps:$4 sm:$0xff]  }
 0x3a0   :  { %v11152_v53 = vadd.f32 %v13808_v29, %v2375_v43  ;;  %v11058_v54 = vpop.f32.mrb[39].mxu0  ;;  %3154 = vmatprep.subr.bf16.mxu0 %v11701_v37  ;;  %4844 = vmatprep.subr.bf16.mxu1 %v11704_v39  ;;  %v2565_v38 = vmax.f32 %v11151_v40, 0.0  ;;  %v11740_v37 = vld [vmem:[%s16361_s5 + $0x814] ss:$8 sps:$4 sm:$0xff]   ;;  %v11738_v43 = vld [vmem:[%s16361_s5 + $0x810] ss:$8 sps:$4 sm:$0xff]  }
 0x3a1   :  { %3184 = vmatprep.mubr.bf16.mxu0 %v12794_v0  ;;  %v11746_v54 = vld [vmem:[%s16361_s5 + $0x824] ss:$8 sps:$4 sm:$0xff]  }
 0x3a2   :  { %v2566_v1 = vmax.f32 %v11152_v53, 0.0  ;;  %v11743_v53 = vld [vmem:[%s16361_s5 + $0x204] ss:$8 sps:$4 sm:$0xff]  }
 0x3a3   :  { %3155 = vmatpush1.bf16.msra.mxu0 %v11699_v46  ;;  %4845 = vmatpush1.bf16.msra.mxu1 %v11702_v51 }
 0x3a4   :  { %v13994_v22 = vpack.c.bf16 %v2566_v1, %v2565_v38  ;;  %3156 = vmatprep.subr.bf16.mxu0 %v11707_v21  ;;  %4846 = vmatprep.subr.bf16.mxu1 %v11710_v49  ;;  %v11741_v21 = vld [vmem:[%s16361_s5 + $0x200] ss:$8 sps:$4 sm:$0xff]  }
 0x3a5   :  { %v2380_v60 = vpop.f32.mrb[40].mxu0  ;;  %v11744_v49 = vld [vmem:[%s16361_s5 + $0x820] ss:$8 sps:$4 sm:$0xff]  }
 0x3a6   :  { %v11153_v17 = vadd.f32 %v13808_v29, %v2380_v60  ;;  %v11061_v61 = vpop.f32.mrb[41].mxu0 }
 0x3a7   :  { %3157 = vmatpush1.bf16.msra.mxu0 %v11705_v27  ;;  %4847 = vmatpush1.bf16.msra.mxu1 %v11708_v57  ;;  %v2383_v62 = vpop.f32.mrb[42].mxu0  ;;  %v3070_v27 = vrot.slane %v13833_v58, 4 }
 0x3a8   :  { %v11154_v47 = vadd.f32 %v13808_v29, %v2383_v62  ;;  %v11062_v14 = vpop.f32.mrb[43].mxu0  ;;  %3158 = vmatprep.subr.bf16.mxu0 %v11713_v52  ;;  %4848 = vmatprep.subr.bf16.mxu1 %v11716_v56  ;;  %v2567_v3 = vmax.f32 %v11153_v17, 0.0  ;;  %v11749_v52 = vld [vmem:[%s16361_s5 + $0x214] ss:$8 sps:$4 sm:$0xff]   ;;  %v11747_v62 = vld [vmem:[%s16361_s5 + $0x210] ss:$8 sps:$4 sm:$0xff]  }
 0x3a9   :  { %v11752_v56 = vld [vmem:[%s16361_s5 + $0x834] ss:$8 sps:$4 sm:$0xff]   ;;  %v11755_v14 = vld [vmem:[%s16361_s5 + $0x224] ss:$8 sps:$4 sm:$0xff]  }
 0x3aa   :  { %v2568_v9 = vmax.f32 %v11154_v47, 0.0 }
 0x3ab   :  { %3159 = vmatpush1.bf16.msra.mxu0 %v11711_v50  ;;  %4849 = vmatpush1.bf16.msra.mxu1 %v11714_v16  ;;  %v11750_v50 = vld [vmem:[%s16361_s5 + $0x830] ss:$8 sps:$4 sm:$0xff]  }
 0x3ac   :  { %v14022_v7 = vpack.c.bf16 %v2568_v9, %v2567_v3  ;;  %3160 = vmatprep.subr.bf16.mxu0 %v11719_v45  ;;  %4850 = vmatprep.subr.bf16.mxu1 %v11722_v2  ;;  %v11758_v45 = vld [vmem:[%s16361_s5 + $0x844] ss:$8 sps:$4 sm:$0xff]   ;;  %v11756_v9 = vld [vmem:[%s16361_s5 + $0x840] ss:$8 sps:$4 sm:$0xff]  }
 0x3ad   :  { %v2388_v12 = vpop.f32.mrb[44].mxu0 }
 0x3ae   :  { %v11155_v10 = vadd.f32 %v13808_v29, %v2388_v12  ;;  %v11065_v18 = vpop.f32.mrb[45].mxu0  ;;  %v14121_v12 = vld [vmem:[%s16362_s4] ss:$0 sm:$0xff] }
 0x3af   :  { %3161 = vmatpush1.bf16.msra.mxu0 %v11717_v5  ;;  %4851 = vmatpush1.bf16.msra.mxu1 %v11720_v6  ;;  %v2391_v48 = vpop.f32.mrb[46].mxu0  ;;  %v11761_v6 = vld [vmem:[%s16361_s5 + $0x234] ss:$8 sps:$4 sm:$0xff]  }
 0x3b0   :  { %v11156_v55 = vadd.f32 %v13808_v29, %v2391_v48  ;;  %v11066_v23 = vpop.f32.mrb[47].mxu0  ;;  %3162 = vmatprep.subr.bf16.mxu0 %v11725_v44  ;;  %4852 = vmatprep.subr.bf16.mxu1 %v11728_v8  ;;  %v2569_v26 = vmax.f32 %v11155_v10, 0.0  ;;  %v11764_v44 = vld [vmem:[%s16361_s5 + $0x854] ss:$8 sps:$4 sm:$0xff]  }
 0x3b2   :  { %v2570_v28 = vmax.f32 %v11156_v55, 0.0 }
 0x3b3   :  { %3163 = vmatpush1.bf16.msra.mxu0 %v11723_v15  ;;  %4853 = vmatpush1.bf16.msra.mxu1 %v11726_v19  ;;  %v11759_v15 = vld [vmem:[%s16361_s5 + $0x230] ss:$8 sps:$4 sm:$0xff]  }
 0x3b4   :  { %v14054_v34 = vpack.c.bf16 %v2570_v28, %v2569_v26  ;;  %3164 = vmatprep.subr.bf16.mxu0 %v11731_v24  ;;  %4977 = vmatprep.subr.bf16.mxu1 %v11734_v41  ;;  %v11762_v19 = vld [vmem:[%s16361_s5 + $0x850] ss:$8 sps:$4 sm:$0xff]   ;;  %v11767_v24 = vld [vmem:[%s16361_s5 + $0x244] ss:$8 sps:$4 sm:$0xff]   ;;  %v11765_v28 = vld [vmem:[%s16361_s5 + $0x240] ss:$8 sps:$4 sm:$0xff]  }
 0x3b5   :  { %v2396_v39 = vpop.f32.mrb[48].mxu0  ;;  %v11770_v41 = vld [vmem:[%s16361_s5 + $0x864] ss:$8 sps:$4 sm:$0xff]  }
 0x3b6   :  { %v11157_v30 = vadd.f32 %v13808_v29, %v2396_v39  ;;  %4871 = vmatmul.mubr.bf16.vlgmr.msra.gmra.mrb[0].mxu1 %v4756_v31  ;;  %v11069_v40 = vpop.f32.mrb[49].mxu0  ;;  %v11773_v31 = vld [vmem:[%s16361_s5 + $0x254] ss:$8 sps:$4 sm:$0xff]  }
 0x3b7   :  { %3165 = vmatpush1.bf16.msra.mxu0 %v11729_v25  ;;  %4978 = vmatpush1.bf16.msra.mxu1 %v11732_v20  ;;  %v2399_v42 = vpop.f32.mrb[50].mxu0  ;;  %v11768_v20 = vld [vmem:[%s16361_s5 + $0x860] ss:$8 sps:$4 sm:$0xff]  }
 0x3b8   :  { %v11158_v46 = vadd.f32 %v13808_v29, %v2399_v42  ;;  %v11070_v51 = vpop.f32.mrb[51].mxu0  ;;  %3166 = vmatprep.subr.bf16.mxu0 %v11737_v32  ;;  %4979 = vmatprep.subr.bf16.mxu1 %v11740_v37  ;;  %v2571_v38 = vmax.f32 %v11157_v30, 0.0  ;;  %v11776_v37 = vld [vmem:[%s16361_s5 + $0x874] ss:$8 sps:$4 sm:$0xff]  }
 0x3b9   :  { %5009 = vmatprep.mubr.bf16.mxu1 %v12794_v0 }
 0x3ba   :  { %v2572_v1 = vmax.f32 %v11158_v46, 0.0 }
 0x3bb   :  { %3167 = vmatpush1.bf16.msra.mxu0 %v11735_v13  ;;  %4980 = vmatpush1.bf16.msra.mxu1 %v11738_v43  ;;  %v11771_v13 = vld [vmem:[%s16361_s5 + $0x250] ss:$8 sps:$4 sm:$0xff]  }
 0x3bc   :  { %v14081_v57 = vpack.c.bf16 %v2572_v1, %v2571_v38  ;;  %3291 = vmatprep.subr.bf16.mxu0 %v11743_v53  ;;  %4981 = vmatprep.subr.bf16.mxu1 %v11746_v54  ;;  %v11774_v43 = vld [vmem:[%s16361_s5 + $0x870] ss:$8 sps:$4 sm:$0xff]   ;;  %v11779_v53 = vld [vmem:[%s16361_s5 + $0x264] ss:$8 sps:$4 sm:$0xff]   ;;  %v11780_v1 = vld [vmem:[%s16361_s5 + $0x880] ss:$8 sps:$4 sm:$0xff]  }
 0x3bd   :  { %v2404_v60 = vpop.f32.mrb[52].mxu0  ;;  %v11782_v54 = vld [vmem:[%s16361_s5 + $0x884] ss:$8 sps:$4 sm:$0xff]  }
 0x3be   :  { %v11159_v17 = vadd.f32 %v13808_v29, %v2404_v60  ;;  %3185 = vmatmul.mubr.bf16.vlgmr.msra.gmra.mrb[100].mxu0 %v3070_v27  ;;  %v11073_v61 = vpop.f32.mrb[53].mxu0  ;;  %v11785_v27 = vld [vmem:[%s16361_s5 + $0x274] ss:$8 sps:$4 sm:$0xff]  }
 0x3bf   :  { %3292 = vmatpush1.bf16.msra.mxu0 %v11741_v21  ;;  %4982 = vmatpush1.bf16.msra.mxu1 %v11744_v49  ;;  %v2407_v58 = vpop.f32.mrb[54].mxu0  ;;  %v11777_v21 = vld [vmem:[%s16361_s5 + $0x260] ss:$8 sps:$4 sm:$0xff]  }
 0x3c0   :  { %v11160_v16 = vadd.f32 %v13808_v29, %v2407_v58  ;;  %v11074_v47 = vpop.f32.mrb[55].mxu0  ;;  %3293 = vmatprep.subr.bf16.mxu0 %v11749_v52  ;;  %4983 = vmatprep.subr.bf16.mxu1 %v11752_v56  ;;  %v2573_v2 = vmax.f32 %v11159_v17, 0.0  ;;  %v11753_v29 = vld [vmem:[%s16361_s5 + $0x220] ss:$8 sps:$4 sm:$0xff]   ;;  %v11788_v56 = vld [vmem:[%s16361_s5 + $0x894] ss:$8 sps:$4 sm:$0xff]  }
 0x3c1   :  { %3323 = vmatprep.mubr.bf16.mxu0 %v12794_v0 }
 0x3c2   :  { %v2574_v3 = vmax.f32 %v11160_v16, 0.0 }
 0x3c3   :  { %3294 = vmatpush1.bf16.msra.mxu0 %v11747_v62  ;;  %4984 = vmatpush1.bf16.msra.mxu1 %v11750_v50  ;;  %v11783_v62 = vld [vmem:[%s16361_s5 + $0x270] ss:$8 sps:$4 sm:$0xff]  }
 0x3c4   :  { %v14110_v5 = vpack.c.bf16 %v2574_v3, %v2573_v2  ;;  %3295 = vmatprep.subr.bf16.mxu0 %v11755_v14  ;;  %4985 = vmatprep.subr.bf16.mxu1 %v11758_v45  ;;  %v11786_v50 = vld [vmem:[%s16361_s5 + $0x890] ss:$8 sps:$4 sm:$0xff]   ;;  %v11791_v14 = vld [vmem:[%s16361_s5 + $0x284] ss:$8 sps:$4 sm:$0xff]   ;;  %v11789_v2 = vld [vmem:[%s16361_s5 + $0x280] ss:$8 sps:$4 sm:$0xff]  }
 0x3c5   :  { %v2412_v8 = vpop.f32.mrb[56].mxu0  ;;  %v11794_v45 = vld [vmem:[%s16361_s5 + $0x8a4] ss:$8 sps:$4 sm:$0xff]   ;;  %v11792_v3 = vld [vmem:[%s16361_s5 + $0x8a0] ss:$8 sps:$4 sm:$0xff]  }
 0x3c6   :  { %v11161_v10 = vadd.f32 %v14121_v12, %v2412_v8  ;;  %v11077_v18 = vpop.f32.mrb[57].mxu0  ;;  %v11800_v8 = vld [vmem:[%s16361_s5 + $0x8b4] ss:$8 sps:$4 sm:$0xff]  }
 0x3c7   :  { %3296 = vmatpush1.bf16.msra.mxu0 %v11753_v29  ;;  %4986 = vmatpush1.bf16.msra.mxu1 %v11756_v9  ;;  %v2415_v48 = vpop.f32.mrb[58].mxu0 }
 0x3c8   :  { %v11162_v55 = vadd.f32 %v14121_v12, %v2415_v48  ;;  %v11078_v23 = vpop.f32.mrb[59].mxu0  ;;  %3297 = vmatprep.subr.bf16.mxu0 %v11761_v6  ;;  %4987 = vmatprep.subr.bf16.mxu1 %v11764_v44  ;;  %v2575_v25 = vmax.f32 %v11161_v10, 0.0  ;;  %v11797_v44 = vld [vmem:[%s16361_s5 + $0x294] ss:$8 sps:$4 sm:$0xff]  }
 0x3ca   :  { %v2576_v26 = vmax.f32 %v11162_v55, 0.0  ;;  %v11798_v55 = vld [vmem:[%s16361_s5 + $0x8b0] ss:$8 sps:$4 sm:$0xff]  }
 0x3cb   :  { %3298 = vmatpush1.bf16.msra.mxu0 %v11759_v15  ;;  %4988 = vmatpush1.bf16.msra.mxu1 %v11762_v19  ;;  %v11795_v19 = vld [vmem:[%s16361_s5 + $0x290] ss:$8 sps:$4 sm:$0xff]  }
 0x3cc   :  { %v14143_v32 = vpack.c.bf16 %v2576_v26, %v2575_v25  ;;  %3299 = vmatprep.subr.bf16.mxu0 %v11767_v24  ;;  %4989 = vmatprep.subr.bf16.mxu1 %v11770_v41  ;;  %v11803_v41 = vld [vmem:[%s16361_s5 + $0x2a4] ss:$8 sps:$4 sm:$0xff]  }
 0x3cd   :  { %v2420_v39 = vpop.f32.mrb[60].mxu0  ;;  %v11806_v25 = vld [vmem:[%s16361_s5 + $0x8c4] ss:$8 sps:$4 sm:$0xff]  }
 0x3ce   :  { %v11163_v30 = vadd.f32 %v14121_v12, %v2420_v39  ;;  %v11081_v40 = vpop.f32.mrb[61].mxu0  ;;  %v11809_v39 = vld [vmem:[%s16361_s5 + $0x2b4] ss:$8 sps:$4 sm:$0xff]  }
 0x3cf   :  { %3300 = vmatpush1.bf16.msra.mxu0 %v11765_v28  ;;  %4990 = vmatpush1.bf16.msra.mxu1 %v11768_v20  ;;  %v2423_v42 = vpop.f32.mrb[62].mxu0  ;;  %v11801_v20 = vld [vmem:[%s16361_s5 + $0x2a0] ss:$8 sps:$4 sm:$0xff]  }
 0x3d0   :  { %v11164_v46 = vadd.f32 %v14121_v12, %v2423_v42  ;;  %v11082_v51 = vpop.f32.mrb[63].mxu0  ;;  %3301 = vmatprep.subr.bf16.mxu0 %v11773_v31  ;;  %4991 = vmatprep.subr.bf16.mxu1 %v11776_v37  ;;  %v2577_v49 = vmax.f32 %v11163_v30, 0.0  ;;  %v11804_v31 = vld [vmem:[%s16361_s5 + $0x8c0] ss:$8 sps:$4 sm:$0xff]   ;;  %v11812_v30 = vld [vmem:[%s16361_s5 + $0x8d4] ss:$8 sps:$4 sm:$0xff]  }
 0x3d1   :  { %v11810_v51 = vld [vmem:[%s16361_s5 + $0x8d0] ss:$8 sps:$4 sm:$0xff]  }
 0x3d2   :  { %v2578_v38 = vmax.f32 %v11164_v46, 0.0  ;;  %v11807_v46 = vld [vmem:[%s16361_s5 + $0x2b0] ss:$8 sps:$4 sm:$0xff]  }
 0x3d3   :  { %3302 = vmatpush1.bf16.msra.mxu0 %v11771_v13  ;;  %4992 = vmatpush1.bf16.msra.mxu1 %v11774_v43 }
 0x3d4   :  { %v14174_v52 = vpack.c.bf16 %v2578_v38, %v2577_v49  ;;  %3303 = vmatprep.subr.bf16.mxu0 %v11779_v53  ;;  %5119 = vmatprep.subr.bf16.mxu1 %v11782_v54  ;;  %v11818_v49 = vld [vmem:[%s16361_s5 + $0x8e4] ss:$8 sps:$4 sm:$0xff]  }
 0x3d5   :  { %v2428_v60 = vpop.f32.mrb[64].mxu0 }
 0x3d6   :  { %v11165_v17 = vadd.f32 %v14121_v12, %v2428_v60  ;;  %5010 = vmatmul.mubr.bf16.vlgmr.msra.gmra.mrb[0].mxu1 %v13964_v36  ;;  %v11085_v61 = vpop.f32.mrb[65].mxu0 }
 0x3d7   :  { %3304 = vmatpush1.bf16.msra.mxu0 %v11777_v21  ;;  %5120 = vmatpush1.bf16.msra.mxu1 %v11780_v1  ;;  %v2431_v58 = vpop.f32.mrb[66].mxu0  ;;  %v11815_v21 = vld [vmem:[%s16361_s5 + $0x2c4] ss:$8 sps:$4 sm:$0xff]   ;;  %v11824_v61 = vld [vmem:[%s16361_s5 + $0x8f4] ss:$8 sps:$4 sm:$0xff]  }
 0x3d8   :  { %v11166_v16 = vadd.f32 %v14121_v12, %v2431_v58  ;;  %v11086_v47 = vpop.f32.mrb[67].mxu0  ;;  %3305 = vmatprep.subr.bf16.mxu0 %v11785_v27  ;;  %5121 = vmatprep.subr.bf16.mxu1 %v11788_v56  ;;  %v2579_v29 = vmax.f32 %v11165_v17, 0.0  ;;  %v11813_v27 = vld [vmem:[%s16361_s5 + $0x2c0] ss:$8 sps:$4 sm:$0xff]   ;;  %v11821_v17 = vld [vmem:[%s16361_s5 + $0x2d4] ss:$8 sps:$4 sm:$0xff]  }
 0x3d9   :  { %5151 = vmatprep.mubr.bf16.mxu1 %v12794_v0  ;;  %v11816_v56 = vld [vmem:[%s16361_s5 + $0x8e0] ss:$8 sps:$4 sm:$0xff]   ;;  %v11819_v47 = vld [vmem:[%s16361_s5 + $0x2d0] ss:$8 sps:$4 sm:$0xff]  }
 0x3da   :  { %v2580_v9 = vmax.f32 %v11166_v16, 0.0 }
 0x3db   :  { %3306 = vmatpush1.bf16.msra.mxu0 %v11783_v62  ;;  %5122 = vmatpush1.bf16.msra.mxu1 %v11786_v50 }
 0x3dc   :  { %v14201_v6 = vpack.c.bf16 %v2580_v9, %v2579_v29  ;;  %3433 = vmatprep.subr.bf16.mxu0 %v11791_v14  ;;  %5123 = vmatprep.subr.bf16.mxu1 %v11794_v45  ;;  %v11822_v14 = vld [vmem:[%s16361_s5 + $0x8f0] ss:$8 sps:$4 sm:$0xff]   ;;  %v11830_v29 = vld [vmem:[%s16361_s5 + $0x904] ss:$8 sps:$4 sm:$0xff]   ;;  %v11825_v9 = vld [vmem:[%s16361_s5 + $0x2e0] ss:$8 sps:$4 sm:$0xff]  }
 0x3dd   :  { %v2436_v10 = vpop.f32.mrb[68].mxu0 }
 0x3de   :  { %v11167_v18 = vadd.f32 %v14121_v12, %v2436_v10  ;;  %3324 = vmatmul.mubr.bf16.vlgmr.msra.gmra.mrb[100].mxu0 %v13849_v35  ;;  %v11089_v48 = vpop.f32.mrb[69].mxu0  ;;  %v11828_v10 = vld [vmem:[%s16361_s5 + $0x900] ss:$8 sps:$4 sm:$0xff]  }
 0x3df   :  { %3434 = vmatpush1.bf16.msra.mxu0 %v11789_v2  ;;  %5124 = vmatpush1.bf16.msra.mxu1 %v11792_v3  ;;  %v2439_v15 = vpop.f32.mrb[70].mxu0  ;;  %v11827_v3 = vld [vmem:[%s16361_s5 + $0x2e4] ss:$8 sps:$4 sm:$0xff]   ;;  %v5037_v48 = vrot.slane %v13964_v36, 4  ;;  %v11831_v36 = vld [vmem:[%s16361_s5 + $0x2f0] ss:$8 sps:$4 sm:$0xff]  }
 0x3e0   :  { %v11168_v23 = vadd.f32 %v14121_v12, %v2439_v15  ;;  %v11090_v24 = vpop.f32.mrb[71].mxu0  ;;  %3435 = vmatprep.subr.bf16.mxu0 %v11797_v44  ;;  %5125 = vmatprep.subr.bf16.mxu1 %v11800_v8  ;;  %v2581_v26 = vmax.f32 %v11167_v18, 0.0  ;;  %v11833_v18 = vld [vmem:[%s16361_s5 + $0x2f4] ss:$8 sps:$4 sm:$0xff]  }
 0x3e1   :  { %3465 = vmatprep.mubr.bf16.mxu0 %v12794_v0 }
 0x3e2   :  { %v2582_v28 = vmax.f32 %v11168_v23, 0.0 }
 0x3e3   :  { %3436 = vmatpush1.bf16.msra.mxu0 %v11795_v19  ;;  %5126 = vmatpush1.bf16.msra.mxu1 %v11798_v55  ;;  %v11836_v19 = vld [vmem:[%s16361_s5 + $0x914] ss:$8 sps:$4 sm:$0xff]  }
 0x3e4   :  { %v14231_v37 = vpack.c.bf16 %v2582_v28, %v2581_v26  ;;  %3437 = vmatprep.subr.bf16.mxu0 %v11803_v41  ;;  %5127 = vmatprep.subr.bf16.mxu1 %v11806_v25  ;;  %v11834_v25 = vld [vmem:[%s16361_s5 + $0x910] ss:$8 sps:$4 sm:$0xff]  }
 0x3e5   :  { %v2444_v40 = vpop.f32.mrb[72].mxu0 }
 0x3e6   :  { %v11169_v42 = vadd.f32 %v14121_v12, %v2444_v40  ;;  %v11093_v13 = vpop.f32.mrb[73].mxu0 }
 0x3e7   :  { %3438 = vmatpush1.bf16.msra.mxu0 %v11801_v20  ;;  %5128 = vmatpush1.bf16.msra.mxu1 %v11804_v31  ;;  %v2447_v43 = vpop.f32.mrb[74].mxu0  ;;  %v11839_v20 = vld [vmem:[%s16361_s5 + $0x304] ss:$8 sps:$4 sm:$0xff]   ;;  %v3351_v13 = vrot.slane %v13849_v35, 4 }
 0x3e8   :  { %v11170_v53 = vadd.f32 %v14121_v12, %v2447_v43  ;;  %v11094_v54 = vpop.f32.mrb[75].mxu0  ;;  %3439 = vmatprep.subr.bf16.mxu0 %v11809_v39  ;;  %5129 = vmatprep.subr.bf16.mxu1 %v11812_v30  ;;  %v2583_v38 = vmax.f32 %v11169_v42, 0.0  ;;  %v11842_v31 = vld [vmem:[%s16361_s5 + $0x924] ss:$8 sps:$4 sm:$0xff]   ;;  %v11837_v39 = vld [vmem:[%s16361_s5 + $0x300] ss:$8 sps:$4 sm:$0xff]  }
 0x3e9   :  { %v11840_v30 = vld [vmem:[%s16361_s5 + $0x920] ss:$8 sps:$4 sm:$0xff]  }
 0x3ea   :  { %v2584_v1 = vmax.f32 %v11170_v53, 0.0 }
 0x3eb   :  { %3440 = vmatpush1.bf16.msra.mxu0 %v11807_v46  ;;  %5130 = vmatpush1.bf16.msra.mxu1 %v11810_v51  ;;  %v11845_v46 = vld [vmem:[%s16361_s5 + $0x314] ss:$8 sps:$4 sm:$0xff]  }
 0x3ec   :  { %v14259_v60 = vpack.c.bf16 %v2584_v1, %v2583_v38  ;;  %3441 = vmatprep.subr.bf16.mxu0 %v11815_v21  ;;  %5131 = vmatprep.subr.bf16.mxu1 %v11818_v49  ;;  %v11848_v51 = vld [vmem:[%s16361_s5 + $0x934] ss:$8 sps:$4 sm:$0xff]   ;;  %v11843_v49 = vld [vmem:[%s16361_s5 + $0x310] ss:$8 sps:$4 sm:$0xff]  }
 0x3ed   :  { %v2452_v58 = vpop.f32.mrb[76].mxu0  ;;  %v11846_v38 = vld [vmem:[%s16361_s5 + $0x930] ss:$8 sps:$4 sm:$0xff]  }
 0x3ee   :  { %v11171_v62 = vadd.f32 %v14121_v12, %v2452_v58  ;;  %v11097_v50 = vpop.f32.mrb[77].mxu0 }
 0x3ef   :  { %3442 = vmatpush1.bf16.msra.mxu0 %v11813_v27  ;;  %5132 = vmatpush1.bf16.msra.mxu1 %v11816_v56  ;;  %v2455_v16 = vpop.f32.mrb[78].mxu0  ;;  %v11851_v56 = vld [vmem:[%s16361_s5 + $0x324] ss:$8 sps:$4 sm:$0xff]   ;;  %v11852_v50 = vld [vmem:[%s16361_s5 + $0x940] ss:$8 sps:$4 sm:$0xff]  }
 0x3f0   :  { %v11172_v45 = vadd.f32 %v14121_v12, %v2455_v16  ;;  %v11098_v2 = vpop.f32.mrb[79].mxu0  ;;  %3443 = vmatprep.subr.bf16.mxu0 %v11821_v17  ;;  %5133 = vmatprep.subr.bf16.mxu1 %v11824_v61  ;;  %v2585_v44 = vmax.f32 %v11171_v62, 0.0  ;;  %v11854_v17 = vld [vmem:[%s16361_s5 + $0x944] ss:$8 sps:$4 sm:$0xff]   ;;  %v11849_v62 = vld [vmem:[%s16361_s5 + $0x320] ss:$8 sps:$4 sm:$0xff]  }
 0x3f2   :  { %v2586_v8 = vmax.f32 %v11172_v45, 0.0 }
 0x3f3   :  { %3444 = vmatpush1.bf16.msra.mxu0 %v11819_v47  ;;  %5134 = vmatpush1.bf16.msra.mxu1 %v11822_v14  ;;  %v11857_v47 = vld [vmem:[%s16361_s5 + $0x334] ss:$8 sps:$4 sm:$0xff]  }
 0x3f4   :  { %v14291_v15 = vpack.c.bf16 %v2586_v8, %v2585_v44  ;;  %3445 = vmatprep.subr.bf16.mxu0 %v11827_v3  ;;  %5258 = vmatprep.subr.bf16.mxu1 %v11830_v29  ;;  %v11860_v14 = vld [vmem:[%s16361_s5 + $0x954] ss:$8 sps:$4 sm:$0xff]   ;;  %v11858_v44 = vld [vmem:[%s16361_s5 + $0x950] ss:$8 sps:$4 sm:$0xff]  }
 0x3f5   :  { %v2460_v55 = vpop.f32.mrb[80].mxu0 }
 0x3f6   :  { %v11173_v23 = vadd.f32 %v14121_v12, %v2460_v55  ;;  %5152 = vmatmul.mubr.bf16.vlgmr.msra.gmra.mrb[0].mxu1 %v5037_v48  ;;  %v11101_v24 = vpop.f32.mrb[81].mxu0  ;;  %v11866_v48 = vld [vmem:[%s16361_s5 + $0x964] ss:$8 sps:$4 sm:$0xff]  }
 0x3f7   :  { %3446 = vmatpush1.bf16.msra.mxu0 %v11825_v9  ;;  %5259 = vmatpush1.bf16.msra.mxu1 %v11828_v10  ;;  %v2463_v41 = vpop.f32.mrb[82].mxu0  ;;  %v11855_v9 = vld [vmem:[%s16361_s5 + $0x330] ss:$8 sps:$4 sm:$0xff]   ;;  %v11864_v24 = vld [vmem:[%s16361_s5 + $0x960] ss:$8 sps:$4 sm:$0xff]  }
 0x3f8   :  { %v11174_v26 = vadd.f32 %v14121_v12, %v2463_v41  ;;  %v11102_v28 = vpop.f32.mrb[83].mxu0  ;;  %3447 = vmatprep.subr.bf16.mxu0 %v11833_v18  ;;  %5260 = vmatprep.subr.bf16.mxu1 %v11836_v19  ;;  %v2587_v40 = vmax.f32 %v11173_v23, 0.0  ;;  %v11863_v18 = vld [vmem:[%s16361_s5 + $0x344] ss:$8 sps:$4 sm:$0xff]   ;;  %v11861_v23 = vld [vmem:[%s16361_s5 + $0x340] ss:$8 sps:$4 sm:$0xff]  }
 0x3f9   :  { %5290 = vmatprep.mubr.bf16.mxu1 %v12794_v0 }
 0x3fa   :  { %v2588_v42 = vmax.f32 %v11174_v26, 0.0 }
 0x3fb   :  { %3448 = vmatpush1.bf16.msra.mxu0 %v11831_v36  ;;  %5261 = vmatpush1.bf16.msra.mxu1 %v11834_v25  ;;  %v11869_v36 = vld [vmem:[%s16361_s5 + $0x354] ss:$8 sps:$4 sm:$0xff]  }
 0x3fc   :  { %v14318_v43 = vpack.c.bf16 %v2588_v42, %v2587_v40  ;;  %3572 = vmatprep.subr.bf16.mxu0 %v11839_v20  ;;  %5262 = vmatprep.subr.bf16.mxu1 %v11842_v31  ;;  %v11872_v25 = vld [vmem:[%s16361_s5 + $0x974] ss:$8 sps:$4 sm:$0xff]  }
 0x3fd   :  { %v2468_v53 = vpop.f32.mrb[84].mxu0 }
 0x3fe   :  { %v11175_v54 = vadd.f32 %v14121_v12, %v2468_v53  ;;  %3466 = vmatmul.mubr.bf16.vlgmr.msra.gmra.mrb[100].mxu0 %v3351_v13  ;;  %v11105_v21 = vpop.f32.mrb[85].mxu0  ;;  %v11875_v13 = vld [vmem:[%s16361_s5 + $0x364] ss:$8 sps:$4 sm:$0xff]  }
 0x3ff   :  { %3573 = vmatpush1.bf16.msra.mxu0 %v11837_v39  ;;  %5263 = vmatpush1.bf16.msra.mxu1 %v11840_v30  ;;  %v2471_v35 = vpop.f32.mrb[86].mxu0  ;;  %v11867_v39 = vld [vmem:[%s16361_s5 + $0x350] ss:$8 sps:$4 sm:$0xff]   ;;  %v11881_v21 = vld [vmem:[%s16361_s5 + $0x374] ss:$8 sps:$4 sm:$0xff]  }
 0x400   :  { %v11176_v1 = vadd.f32 %v14121_v12, %v2471_v35  ;;  %v11106_v27 = vpop.f32.mrb[87].mxu0  ;;  %3574 = vmatprep.subr.bf16.mxu0 %v11845_v46  ;;  %5264 = vmatprep.subr.bf16.mxu1 %v11848_v51  ;;  %v2589_v61 = vmax.f32 %v11175_v54, 0.0  ;;  %v11870_v30 = vld [vmem:[%s16361_s5 + $0x970] ss:$8 sps:$4 sm:$0xff]   ;;  %v11878_v46 = vld [vmem:[%s16361_s5 + $0x984] ss:$8 sps:$4 sm:$0xff]  }
 0x401   :  { %3604 = vmatprep.mubr.bf16.mxu0 %v12794_v0  ;;  %v11873_v51 = vld [vmem:[%s16361_s5 + $0x360] ss:$8 sps:$4 sm:$0xff]  }
 0x402   :  { %v2590_v58 = vmax.f32 %v11176_v1, 0.0 }
 0x403   :  { %3575 = vmatpush1.bf16.msra.mxu0 %v11843_v49  ;;  %5265 = vmatpush1.bf16.msra.mxu1 %v11846_v38  ;;  %v11884_v49 = vld [vmem:[%s16361_s5 + $0x994] ss:$8 sps:$4 sm:$0xff]  }
 0x404   :  { %v14347_v16 = vpack.c.bf16 %v2590_v58, %v2589_v61  ;;  %3576 = vmatprep.subr.bf16.mxu0 %v11851_v56  ;;  %5266 = vmatprep.subr.bf16.mxu1 %v11854_v17  ;;  %v11879_v56 = vld [vmem:[%s16361_s5 + $0x370] ss:$8 sps:$4 sm:$0xff]   ;;  %v11887_v58 = vld [vmem:[%s16361_s5 + $0x384] ss:$8 sps:$4 sm:$0xff]  }
 0x405   :  { %v2476_v45 = vpop.f32.mrb[88].mxu0  ;;  %v11882_v17 = vld [vmem:[%s16361_s5 + $0x990] ss:$8 sps:$4 sm:$0xff]  }
 0x406   :  { %v11177_v2 = vadd.f32 %v14121_v12, %v2476_v45  ;;  %v11109_v3 = vpop.f32.mrb[89].mxu0  ;;  %v11896_v45 = vld [vmem:[%s16361_s5 + $0x9b4] ss:$8 sps:$4 sm:$0xff]  }
 0x407   :  { %3577 = vmatpush1.bf16.msra.mxu0 %v11849_v62  ;;  %5267 = vmatpush1.bf16.msra.mxu1 %v11852_v50  ;;  %v2479_v29 = vpop.f32.mrb[90].mxu0  ;;  %v11890_v62 = vld [vmem:[%s16361_s5 + $0x9a4] ss:$8 sps:$4 sm:$0xff]   ;;  %v11885_v50 = vld [vmem:[%s16361_s5 + $0x380] ss:$8 sps:$4 sm:$0xff]  }
 0x408   :  { %v11178_v8 = vadd.f32 %v14121_v12, %v2479_v29  ;;  %v11110_v10 = vpop.f32.mrb[91].mxu0  ;;  %3578 = vmatprep.subr.bf16.mxu0 %v11857_v47  ;;  %5268 = vmatprep.subr.bf16.mxu1 %v11860_v14  ;;  %v2591_v19 = vmax.f32 %v11177_v2, 0.0  ;;  %v11888_v47 = vld [vmem:[%s16361_s5 + $0x9a0] ss:$8 sps:$4 sm:$0xff]   ;;  %v11893_v14 = vld [vmem:[%s16361_s5 + $0x394] ss:$8 sps:$4 sm:$0xff]  }
 0x409   :  { %v11891_v2 = vld [vmem:[%s16361_s5 + $0x390] ss:$8 sps:$4 sm:$0xff]   ;;  %v11899_v29 = vld [vmem:[%s16361_s5 + $0x3a4] ss:$8 sps:$4 sm:$0xff]   ;;  %v11905_v10 = vld [vmem:[%s16361_s5 + $0x3b4] ss:$8 sps:$4 sm:$0xff]  }
 0x40a   :  { %v2592_v55 = vmax.f32 %v11178_v8, 0.0  ;;  %v11894_v3 = vld [vmem:[%s16361_s5 + $0x9b0] ss:$8 sps:$4 sm:$0xff]   ;;  %v11900_v8 = vld [vmem:[%s16361_s5 + $0x9c0] ss:$8 sps:$4 sm:$0xff]  }
 0x40b   :  { %3579 = vmatpush1.bf16.msra.mxu0 %v11855_v9  ;;  %5269 = vmatpush1.bf16.msra.mxu1 %v11858_v44  ;;  %v11902_v9 = vld [vmem:[%s16361_s5 + $0x9c4] ss:$8 sps:$4 sm:$0xff]   ;;  %v11897_v44 = vld [vmem:[%s16361_s5 + $0x3a0] ss:$8 sps:$4 sm:$0xff]  }
 0x40c   :  { %v14375_v41 = vpack.c.bf16 %v2592_v55, %v2591_v19  ;;  %3580 = vmatprep.subr.bf16.mxu0 %v11863_v18  ;;  %5270 = vmatprep.subr.bf16.mxu1 %v11866_v48  ;;  %v11908_v18 = vld [vmem:[%s16361_s5 + $0x9d4] ss:$8 sps:$4 sm:$0xff]   ;;  %v11903_v48 = vld [vmem:[%s16361_s5 + $0x3b0] ss:$8 sps:$4 sm:$0xff]   ;;  %v11911_v55 = vld [vmem:[%s16361_s5 + $0x3c4] ss:$8 sps:$4 sm:$0xff]  }
 0x40d   :  { %v2484_v26 = vpop.f32.mrb[92].mxu0  ;;  %v11906_v19 = vld [vmem:[%s16361_s5 + $0x9d0] ss:$8 sps:$4 sm:$0xff]  }
 0x40e   :  { %v11179_v28 = vadd.f32 %v14121_v12, %v2484_v26  ;;  %v11113_v20 = vpop.f32.mrb[93].mxu0  ;;  %v11920_v26 = vld [vmem:[%s16361_s5 + $0x9f4] ss:$8 sps:$4 sm:$0xff]  }
 0x40f   :  { %3581 = vmatpush1.bf16.msra.mxu0 %v11861_v23  ;;  %5271 = vmatpush1.bf16.msra.mxu1 %v11864_v24  ;;  %v2487_v31 = vpop.f32.mrb[94].mxu0  ;;  %v11914_v23 = vld [vmem:[%s16361_s5 + $0x9e4] ss:$8 sps:$4 sm:$0xff]   ;;  %v11909_v24 = vld [vmem:[%s16361_s5 + $0x3c0] ss:$8 sps:$4 sm:$0xff]  }
 0x410   :  { %v11180_v40 = vadd.f32 %v14121_v12, %v2487_v31  ;;  %v11114_v42 = vpop.f32.mrb[95].mxu0  ;;  %3582 = vmatprep.subr.bf16.mxu0 %v11869_v36  ;;  %5272 = vmatprep.subr.bf16.mxu1 %v11872_v25  ;;  %v2593_v53 = vmax.f32 %v11179_v28, 0.0  ;;  %v11876_v12 = vld [vmem:[%s16361_s5 + $0x980] ss:$8 sps:$4 sm:$0xff]   ;;  %v11917_v25 = vld [vmem:[%s16361_s5 + $0x3d4] ss:$8 sps:$4 sm:$0xff]  }
 0x411   :  { %v11912_v36 = vld [vmem:[%s16361_s5 + $0x9e0] ss:$8 sps:$4 sm:$0xff]   ;;  %v11915_v28 = vld [vmem:[%s16361_s5 + $0x3d0] ss:$8 sps:$4 sm:$0xff]   ;;  %v11923_v31 = vld [vmem:[%s16361_s5 + $0x3e4] ss:$8 sps:$4 sm:$0xff]  }
 0x412   :  { %v2594_v54 = vmax.f32 %v11180_v40, 0.0  ;;  %v11918_v20 = vld [vmem:[%s16361_s5 + $0x9f0] ss:$8 sps:$4 sm:$0xff]   ;;  %v11924_v40 = vld [vmem:[%s16361_s5 + $0xa00] ss:$8 sps:$4 sm:$0xff]  }
 0x413   :  { %3583 = vmatpush1.bf16.msra.mxu0 %v11867_v39  ;;  %5273 = vmatpush1.bf16.msra.mxu1 %v11870_v30  ;;  %v11926_v39 = vld [vmem:[%s16361_s5 + $0xa04] ss:$8 sps:$4 sm:$0xff]   ;;  %v11921_v30 = vld [vmem:[%s16361_s5 + $0x3e0] ss:$8 sps:$4 sm:$0xff]   ;;  %v11929_v42 = vld [vmem:[%s16361_s5 + $0x3f4] ss:$8 sps:$4 sm:$0xff]  }
 0x414   :  { %v14406_v35 = vpack.c.bf16 %v2594_v54, %v2593_v53  ;;  %3584 = vmatprep.subr.bf16.mxu0 %v11875_v13  ;;  %5400 = vmatprep.subr.bf16.mxu1 %v11878_v46  ;;  %v5318_v13 = vrot.slane %v13994_v22, 4  ;;  %v11932_v46 = vld [vmem:[%s16361_s5 + $0xa14] ss:$8 sps:$4 sm:$0xff]   ;;  %v11930_v53 = vld [vmem:[%s16361_s5 + $0xa10] ss:$8 sps:$4 sm:$0xff]  }
 0x415   :  { %v14411_v38 = vpop.f32.mrb[96].mxu0  ;;  %v11938_v54 = vld [vmem:[%s16361_s5 + $0xa24] ss:$8 sps:$4 sm:$0xff]  }
 0x416   :  { %5291 = vmatmul.mubr.bf16.vlgmr.msra.gmra.mrb[0].mxu1 %v13994_v22  ;;  %v11117_v1 = vpop.f32.mrb[97].mxu0  ;;  %v11935_v22 = vld [vmem:[%s16361_s5 + $0x404] ss:$8 sps:$4 sm:$0xff]  }
 0x417   :  { %3585 = vmatpush1.bf16.msra.mxu0 %v11873_v51  ;;  %5401 = vmatpush1.bf16.msra.mxu1 %v11876_v12  ;;  %v2495_v27 = vpop.f32.mrb[98].mxu0  ;;  %v11927_v51 = vld [vmem:[%s16361_s5 + $0x3f0] ss:$8 sps:$4 sm:$0xff]   ;;  %v11933_v12 = vld [vmem:[%s16361_s5 + $0x400] ss:$8 sps:$4 sm:$0xff]  }
 0x418   :  { %v11118_v61 = vpop.f32.mrb[99].mxu0  ;;  %3586 = vmatprep.subr.bf16.mxu0 %v11881_v21  ;;  %5402 = vmatprep.subr.bf16.mxu1 %v11884_v49  ;;  %v11936_v21 = vld [vmem:[%s16361_s5 + $0xa20] ss:$8 sps:$4 sm:$0xff]   ;;  %v3632_v49 = vrot.slane %v13865_v33, 4  ;;  %v11941_v1 = vld [vmem:[%s16361_s5 + $0x414] ss:$8 sps:$4 sm:$0xff]  }
 0x419   :  { %5432 = vmatprep.mubr.bf16.mxu1 %v12794_v0  ;;  %v11944_v27 = vld [vmem:[%s16361_s5 + $0xa34] ss:$8 sps:$4 sm:$0xff]   ;;  %v11950_v61 = vld [vmem:[%s16361_s5 + $0xa44] ss:$8 sps:$4 sm:$0xff]  }
 0x41b   :  { %3587 = vmatpush1.bf16.msra.mxu0 %v11879_v56  ;;  %5403 = vmatpush1.bf16.msra.mxu1 %v11882_v17  ;;  %v11939_v56 = vld [vmem:[%s16361_s5 + $0x410] ss:$8 sps:$4 sm:$0xff]   ;;  %v11947_v17 = vld [vmem:[%s16361_s5 + $0x424] ss:$8 sps:$4 sm:$0xff]  }
 0x41c   :  { %3714 = vmatprep.subr.bf16.mxu0 %v11887_v58  ;;  %5404 = vmatprep.subr.bf16.mxu1 %v11890_v62  ;;  %v11945_v58 = vld [vmem:[%s16361_s5 + $0x420] ss:$8 sps:$4 sm:$0xff]  }
 0x41d   :  { %v11948_v62 = vld [vmem:[%s16361_s5 + $0xa40] ss:$8 sps:$4 sm:$0xff]  }
 0x41e   :  { %3605 = vmatmul.mubr.bf16.vlgmr.msra.gmra.mrb[100].mxu0 %v13865_v33  ;;  %v11942_v33 = vld [vmem:[%s16361_s5 + $0xa30] ss:$8 sps:$4 sm:$0xff]  }
 0x41f   :  { %3715 = vmatpush1.bf16.msra.mxu0 %v11885_v50  ;;  %5405 = vmatpush1.bf16.msra.mxu1 %v11888_v47  ;;  %v11953_v50 = vld [vmem:[%s16361_s5 + $0x434] ss:$8 sps:$4 sm:$0xff]  }
 0x420   :  { %3716 = vmatprep.subr.bf16.mxu0 %v11893_v14  ;;  %5406 = vmatprep.subr.bf16.mxu1 %v11896_v45  ;;  %v11956_v47 = vld [vmem:[%s16361_s5 + $0xa54] ss:$8 sps:$4 sm:$0xff]   ;;  %v11951_v14 = vld [vmem:[%s16361_s5 + $0x430] ss:$8 sps:$4 sm:$0xff]  }
 0x421   :  { %3746 = vmatprep.mubr.bf16.mxu0 %v12794_v0  ;;  %v11954_v45 = vld [vmem:[%s16361_s5 + $0xa50] ss:$8 sps:$4 sm:$0xff]  }
 0x423   :  { %3717 = vmatpush1.bf16.msra.mxu0 %v11891_v2  ;;  %5407 = vmatpush1.bf16.msra.mxu1 %v11894_v3  ;;  %v11959_v2 = vld [vmem:[%s16361_s5 + $0x444] ss:$8 sps:$4 sm:$0xff]  }
 0x424   :  { %3718 = vmatprep.subr.bf16.mxu0 %v11899_v29  ;;  %5408 = vmatprep.subr.bf16.mxu1 %v11902_v9  ;;  %v11962_v3 = vld [vmem:[%s16361_s5 + $0xa64] ss:$8 sps:$4 sm:$0xff]   ;;  %v11957_v29 = vld [vmem:[%s16361_s5 + $0x440] ss:$8 sps:$4 sm:$0xff]  }
 0x425   :  { %v11960_v9 = vld [vmem:[%s16361_s5 + $0xa60] ss:$8 sps:$4 sm:$0xff]  }
 0x427   :  { %3719 = vmatpush1.bf16.msra.mxu0 %v11897_v44  ;;  %5409 = vmatpush1.bf16.msra.mxu1 %v11900_v8  ;;  %v11965_v44 = vld [vmem:[%s16361_s5 + $0x454] ss:$8 sps:$4 sm:$0xff]  }
 0x428   :  { %3720 = vmatprep.subr.bf16.mxu0 %v11905_v10  ;;  %5410 = vmatprep.subr.bf16.mxu1 %v11908_v18  ;;  %v11968_v8 = vld [vmem:[%s16361_s5 + $0xa74] ss:$8 sps:$4 sm:$0xff]   ;;  %v11963_v10 = vld [vmem:[%s16361_s5 + $0x450] ss:$8 sps:$4 sm:$0xff]  }
 0x429   :  { %v11966_v18 = vld [vmem:[%s16361_s5 + $0xa70] ss:$8 sps:$4 sm:$0xff]  }
 0x42b   :  { %3721 = vmatpush1.bf16.msra.mxu0 %v11903_v48  ;;  %5411 = vmatpush1.bf16.msra.mxu1 %v11906_v19  ;;  %v11971_v48 = vld [vmem:[%s16361_s5 + $0x464] ss:$8 sps:$4 sm:$0xff]  }
 0x42c   :  { %3722 = vmatprep.subr.bf16.mxu0 %v11911_v55  ;;  %5412 = vmatprep.subr.bf16.mxu1 %v11914_v23  ;;  %v11974_v19 = vld [vmem:[%s16361_s5 + $0xa84] ss:$8 sps:$4 sm:$0xff]   ;;  %v11969_v55 = vld [vmem:[%s16361_s5 + $0x460] ss:$8 sps:$4 sm:$0xff]  }
 0x42d   :  { %v11972_v23 = vld [vmem:[%s16361_s5 + $0xa80] ss:$8 sps:$4 sm:$0xff]  }
 0x42f   :  { %3723 = vmatpush1.bf16.msra.mxu0 %v11909_v24  ;;  %5413 = vmatpush1.bf16.msra.mxu1 %v11912_v36  ;;  %v11977_v24 = vld [vmem:[%s16361_s5 + $0x474] ss:$8 sps:$4 sm:$0xff]  }
 0x430   :  { %3724 = vmatprep.subr.bf16.mxu0 %v11917_v25  ;;  %5414 = vmatprep.subr.bf16.mxu1 %v11920_v26  ;;  %v11980_v36 = vld [vmem:[%s16361_s5 + $0xa94] ss:$8 sps:$4 sm:$0xff]   ;;  %v11975_v25 = vld [vmem:[%s16361_s5 + $0x470] ss:$8 sps:$4 sm:$0xff]  }
 0x431   :  { %v11978_v26 = vld [vmem:[%s16361_s5 + $0xa90] ss:$8 sps:$4 sm:$0xff]  }
 0x433   :  { %3725 = vmatpush1.bf16.msra.mxu0 %v11915_v28  ;;  %5415 = vmatpush1.bf16.msra.mxu1 %v11918_v20  ;;  %v11983_v28 = vld [vmem:[%s16361_s5 + $0x484] ss:$8 sps:$4 sm:$0xff]  }
 0x434   :  { %3726 = vmatprep.subr.bf16.mxu0 %v11923_v31  ;;  %5539 = vmatprep.subr.bf16.mxu1 %v11926_v39  ;;  %v11986_v20 = vld [vmem:[%s16361_s5 + $0xaa4] ss:$8 sps:$4 sm:$0xff]   ;;  %v11981_v31 = vld [vmem:[%s16361_s5 + $0x480] ss:$8 sps:$4 sm:$0xff]  }
 0x435   :  { %v11984_v39 = vld [vmem:[%s16361_s5 + $0xaa0] ss:$8 sps:$4 sm:$0xff]  }
 0x436   :  { %5433 = vmatmul.mubr.bf16.vlgmr.msra.gmra.mrb[0].mxu1 %v5318_v13  ;;  %v11990_v13 = vld [vmem:[%s16361_s5 + $0xab0] ss:$8 sps:$4 sm:$0xff]  }
 0x437   :  { %3727 = vmatpush1.bf16.msra.mxu0 %v11921_v30  ;;  %5540 = vmatpush1.bf16.msra.mxu1 %v11924_v40  ;;  %v11989_v30 = vld [vmem:[%s16361_s5 + $0x494] ss:$8 sps:$4 sm:$0xff]  }
 0x438   :  { %3728 = vmatprep.subr.bf16.mxu0 %v11929_v42  ;;  %5541 = vmatprep.subr.bf16.mxu1 %v11932_v46  ;;  %v11992_v40 = vld [vmem:[%s16361_s5 + $0xab4] ss:$8 sps:$4 sm:$0xff]   ;;  %v11987_v42 = vld [vmem:[%s16361_s5 + $0x490] ss:$8 sps:$4 sm:$0xff]   ;;  %v11995_v46 = vld [vmem:[%s16361_s5 + $0x4a4] ss:$8 sps:$4 sm:$0xff]  }
 0x439   :  { %5571 = vmatprep.mubr.bf16.mxu1 %v12794_v0 }
 0x43b   :  { %3729 = vmatpush1.bf16.msra.mxu0 %v11927_v51  ;;  %5542 = vmatpush1.bf16.msra.mxu1 %v11930_v53  ;;  %v11998_v51 = vld [vmem:[%s16361_s5 + $0xac4] ss:$8 sps:$4 sm:$0xff]   ;;  %v11993_v53 = vld [vmem:[%s16361_s5 + $0x4a0] ss:$8 sps:$4 sm:$0xff]  }
 0x43c   :  { %3853 = vmatprep.subr.bf16.mxu0 %v11935_v22  ;;  %5543 = vmatprep.subr.bf16.mxu1 %v11938_v54  ;;  %v11996_v22 = vld [vmem:[%s16361_s5 + $0xac0] ss:$8 sps:$4 sm:$0xff]   ;;  %v12001_v54 = vld [vmem:[%s16361_s5 + $0x4b4] ss:$8 sps:$4 sm:$0xff]  }
 0x43e   :  { %3747 = vmatmul.mubr.bf16.vlgmr.msra.gmra.mrb[100].mxu0 %v3632_v49  ;;  %v12002_v49 = vld [vmem:[%s16361_s5 + $0xad0] ss:$8 sps:$4 sm:$0xff]  }
 0x43f   :  { %3854 = vmatpush1.bf16.msra.mxu0 %v11933_v12  ;;  %5544 = vmatpush1.bf16.msra.mxu1 %v11936_v21  ;;  %v12004_v12 = vld [vmem:[%s16361_s5 + $0xad4] ss:$8 sps:$4 sm:$0xff]   ;;  %v11999_v21 = vld [vmem:[%s16361_s5 + $0x4b0] ss:$8 sps:$4 sm:$0xff]  }
 0x440   :  { %3855 = vmatprep.subr.bf16.mxu0 %v11941_v1  ;;  %5545 = vmatprep.subr.bf16.mxu1 %v11944_v27  ;;  %v12007_v1 = vld [vmem:[%s16361_s5 + $0x4c4] ss:$8 sps:$4 sm:$0xff]  }
 0x441   :  { %3885 = vmatprep.mubr.bf16.mxu0 %v12794_v0  ;;  %v12010_v27 = vld [vmem:[%s16361_s5 + $0xae4] ss:$8 sps:$4 sm:$0xff]  }
 0x443   :  { %3856 = vmatpush1.bf16.msra.mxu0 %v11939_v56  ;;  %5546 = vmatpush1.bf16.msra.mxu1 %v11942_v33  ;;  %v12005_v56 = vld [vmem:[%s16361_s5 + $0x4c0] ss:$8 sps:$4 sm:$0xff]  }
 0x444   :  { %3857 = vmatprep.subr.bf16.mxu0 %v11947_v17  ;;  %5547 = vmatprep.subr.bf16.mxu1 %v11950_v61  ;;  %v12008_v33 = vld [vmem:[%s16361_s5 + $0xae0] ss:$8 sps:$4 sm:$0xff]   ;;  %v12013_v17 = vld [vmem:[%s16361_s5 + $0x4d4] ss:$8 sps:$4 sm:$0xff]  }
 0x445   :  { %v12016_v61 = vld [vmem:[%s16361_s5 + $0xaf4] ss:$8 sps:$4 sm:$0xff]  }
 0x447   :  { %3858 = vmatpush1.bf16.msra.mxu0 %v11945_v58  ;;  %5548 = vmatpush1.bf16.msra.mxu1 %v11948_v62  ;;  %v12011_v58 = vld [vmem:[%s16361_s5 + $0x4d0] ss:$8 sps:$4 sm:$0xff]  }
 0x448   :  { %3859 = vmatprep.subr.bf16.mxu0 %v11953_v50  ;;  %5549 = vmatprep.subr.bf16.mxu1 %v11956_v47  ;;  %v12014_v62 = vld [vmem:[%s16361_s5 + $0xaf0] ss:$8 sps:$4 sm:$0xff]   ;;  %v12019_v50 = vld [vmem:[%s16361_s5 + $0x4e4] ss:$8 sps:$4 sm:$0xff]  }
 0x449   :  { %v12022_v47 = vld [vmem:[%s16361_s5 + $0xb04] ss:$8 sps:$4 sm:$0xff]  }
 0x44b   :  { %3860 = vmatpush1.bf16.msra.mxu0 %v11951_v14  ;;  %5550 = vmatpush1.bf16.msra.mxu1 %v11954_v45  ;;  %v12017_v14 = vld [vmem:[%s16361_s5 + $0x4e0] ss:$8 sps:$4 sm:$0xff]  }
 0x44c   :  { %3861 = vmatprep.subr.bf16.mxu0 %v11959_v2  ;;  %5551 = vmatprep.subr.bf16.mxu1 %v11962_v3  ;;  %v12020_v45 = vld [vmem:[%s16361_s5 + $0xb00] ss:$8 sps:$4 sm:$0xff]   ;;  %v5599_v2 = vrot.slane %v14022_v7, 4  ;;  %v12025_v3 = vld [vmem:[%s16361_s5 + $0x4f4] ss:$8 sps:$4 sm:$0xff]  }
 0x44f   :  { %3862 = vmatpush1.bf16.msra.mxu0 %v11957_v29  ;;  %5552 = vmatpush1.bf16.msra.mxu1 %v11960_v9  ;;  %v12028_v29 = vld [vmem:[%s16361_s5 + $0xb14] ss:$8 sps:$4 sm:$0xff]   ;;  %v12023_v9 = vld [vmem:[%s16361_s5 + $0x4f0] ss:$8 sps:$4 sm:$0xff]  }
 0x450   :  { %3863 = vmatprep.subr.bf16.mxu0 %v11965_v44  ;;  %5553 = vmatprep.subr.bf16.mxu1 %v11968_v8  ;;  %v12031_v44 = vld [vmem:[%s16361_s5 + $0x504] ss:$8 sps:$4 sm:$0xff]  }
 0x451   :  { %v12034_v8 = vld [vmem:[%s16361_s5 + $0xb24] ss:$8 sps:$4 sm:$0xff]  }
 0x453   :  { %3864 = vmatpush1.bf16.msra.mxu0 %v11963_v10  ;;  %5554 = vmatpush1.bf16.msra.mxu1 %v11966_v18  ;;  %v12029_v10 = vld [vmem:[%s16361_s5 + $0x500] ss:$8 sps:$4 sm:$0xff]  }
 0x454   :  { %3865 = vmatprep.subr.bf16.mxu0 %v11971_v48  ;;  %5681 = vmatprep.subr.bf16.mxu1 %v11974_v19  ;;  %v12032_v18 = vld [vmem:[%s16361_s5 + $0xb20] ss:$8 sps:$4 sm:$0xff]   ;;  %v3913_v48 = vrot.slane %v13882_v59, 4  ;;  %v12037_v19 = vld [vmem:[%s16361_s5 + $0x514] ss:$8 sps:$4 sm:$0xff]  }
 0x456   :  { %5572 = vmatmul.mubr.bf16.vlgmr.msra.gmra.mrb[0].mxu1 %v14022_v7  ;;  %v12026_v7 = vld [vmem:[%s16361_s5 + $0xb10] ss:$8 sps:$4 sm:$0xff]  }
 0x457   :  { %3866 = vmatpush1.bf16.msra.mxu0 %v11969_v55  ;;  %5682 = vmatpush1.bf16.msra.mxu1 %v11972_v23  ;;  %v12040_v55 = vld [vmem:[%s16361_s5 + $0xb34] ss:$8 sps:$4 sm:$0xff]   ;;  %v12035_v23 = vld [vmem:[%s16361_s5 + $0x510] ss:$8 sps:$4 sm:$0xff]  }
 0x458   :  { %3867 = vmatprep.subr.bf16.mxu0 %v11977_v24  ;;  %5683 = vmatprep.subr.bf16.mxu1 %v11980_v36  ;;  %v12043_v24 = vld [vmem:[%s16361_s5 + $0x524] ss:$8 sps:$4 sm:$0xff]  }
 0x459   :  { %5713 = vmatprep.mubr.bf16.mxu1 %v12794_v0  ;;  %v12046_v36 = vld [vmem:[%s16361_s5 + $0xb44] ss:$8 sps:$4 sm:$0xff]  }
 0x45b   :  { %3868 = vmatpush1.bf16.msra.mxu0 %v11975_v25  ;;  %5684 = vmatpush1.bf16.msra.mxu1 %v11978_v26  ;;  %v12041_v25 = vld [vmem:[%s16361_s5 + $0x520] ss:$8 sps:$4 sm:$0xff]  }
 0x45c   :  { %3995 = vmatprep.subr.bf16.mxu0 %v11983_v28  ;;  %5685 = vmatprep.subr.bf16.mxu1 %v11986_v20  ;;  %v12044_v26 = vld [vmem:[%s16361_s5 + $0xb40] ss:$8 sps:$4 sm:$0xff]   ;;  %v12049_v28 = vld [vmem:[%s16361_s5 + $0x534] ss:$8 sps:$4 sm:$0xff]  }
 0x45d   :  { %v12052_v20 = vld [vmem:[%s16361_s5 + $0xb54] ss:$8 sps:$4 sm:$0xff]  }
 0x45e   :  { %3886 = vmatmul.mubr.bf16.vlgmr.msra.gmra.mrb[100].mxu0 %v13882_v59  ;;  %v12038_v59 = vld [vmem:[%s16361_s5 + $0xb30] ss:$8 sps:$4 sm:$0xff]  }
 0x45f   :  { %3996 = vmatpush1.bf16.msra.mxu0 %v11981_v31  ;;  %5686 = vmatpush1.bf16.msra.mxu1 %v11984_v39  ;;  %v12047_v31 = vld [vmem:[%s16361_s5 + $0x530] ss:$8 sps:$4 sm:$0xff]  }
 0x460   :  { %3997 = vmatprep.subr.bf16.mxu0 %v11989_v30  ;;  %5687 = vmatprep.subr.bf16.mxu1 %v11992_v40  ;;  %v12050_v39 = vld [vmem:[%s16361_s5 + $0xb50] ss:$8 sps:$4 sm:$0xff]   ;;  %v12055_v30 = vld [vmem:[%s16361_s5 + $0x544] ss:$8 sps:$4 sm:$0xff]  }
 0x461   :  { %4027 = vmatprep.mubr.bf16.mxu0 %v12794_v0  ;;  %v12058_v40 = vld [vmem:[%s16361_s5 + $0xb64] ss:$8 sps:$4 sm:$0xff]  }
 0x463   :  { %3998 = vmatpush1.bf16.msra.mxu0 %v11987_v42  ;;  %5688 = vmatpush1.bf16.msra.mxu1 %v11990_v13  ;;  %v12053_v42 = vld [vmem:[%s16361_s5 + $0x540] ss:$8 sps:$4 sm:$0xff]  }
 0x464   :  { %3999 = vmatprep.subr.bf16.mxu0 %v11995_v46  ;;  %5689 = vmatprep.subr.bf16.mxu1 %v11998_v51  ;;  %v12056_v13 = vld [vmem:[%s16361_s5 + $0xb60] ss:$8 sps:$4 sm:$0xff]   ;;  %v12061_v46 = vld [vmem:[%s16361_s5 + $0x554] ss:$8 sps:$4 sm:$0xff]  }
 0x465   :  { %v12064_v51 = vld [vmem:[%s16361_s5 + $0xb74] ss:$8 sps:$4 sm:$0xff]  }
 0x467   :  { %4000 = vmatpush1.bf16.msra.mxu0 %v11993_v53  ;;  %5690 = vmatpush1.bf16.msra.mxu1 %v11996_v22  ;;  %v12059_v53 = vld [vmem:[%s16361_s5 + $0x550] ss:$8 sps:$4 sm:$0xff]  }
 0x468   :  { %4001 = vmatprep.subr.bf16.mxu0 %v12001_v54  ;;  %5691 = vmatprep.subr.bf16.mxu1 %v12004_v12  ;;  %v12062_v22 = vld [vmem:[%s16361_s5 + $0xb70] ss:$8 sps:$4 sm:$0xff]   ;;  %v12067_v54 = vld [vmem:[%s16361_s5 + $0x564] ss:$8 sps:$4 sm:$0xff]  }
 0x469   :  { %v12070_v12 = vld [vmem:[%s16361_s5 + $0xb84] ss:$8 sps:$4 sm:$0xff]  }
 0x46b   :  { %4002 = vmatpush1.bf16.msra.mxu0 %v11999_v21  ;;  %5692 = vmatpush1.bf16.msra.mxu1 %v12002_v49  ;;  %v12065_v21 = vld [vmem:[%s16361_s5 + $0x560] ss:$8 sps:$4 sm:$0xff]  }
 0x46c   :  { %4003 = vmatprep.subr.bf16.mxu0 %v12007_v1  ;;  %5693 = vmatprep.subr.bf16.mxu1 %v12010_v27  ;;  %v12068_v49 = vld [vmem:[%s16361_s5 + $0xb80] ss:$8 sps:$4 sm:$0xff]   ;;  %v12073_v1 = vld [vmem:[%s16361_s5 + $0x574] ss:$8 sps:$4 sm:$0xff]  }
 0x46d   :  { %v12076_v27 = vld [vmem:[%s16361_s5 + $0xb94] ss:$8 sps:$4 sm:$0xff]  }
 0x46f   :  { %4004 = vmatpush1.bf16.msra.mxu0 %v12005_v56  ;;  %5694 = vmatpush1.bf16.msra.mxu1 %v12008_v33  ;;  %v12071_v56 = vld [vmem:[%s16361_s5 + $0x570] ss:$8 sps:$4 sm:$0xff]  }
 0x470   :  { %4005 = vmatprep.subr.bf16.mxu0 %v12013_v17  ;;  %5695 = vmatprep.subr.bf16.mxu1 %v12016_v61  ;;  %v12074_v33 = vld [vmem:[%s16361_s5 + $0xb90] ss:$8 sps:$4 sm:$0xff]   ;;  %v12079_v17 = vld [vmem:[%s16361_s5 + $0x584] ss:$8 sps:$4 sm:$0xff]  }
 0x471   :  { %v12082_v61 = vld [vmem:[%s16361_s5 + $0xba4] ss:$8 sps:$4 sm:$0xff]  }
 0x473   :  { %4006 = vmatpush1.bf16.msra.mxu0 %v12011_v58  ;;  %5696 = vmatpush1.bf16.msra.mxu1 %v12014_v62  ;;  %v12077_v58 = vld [vmem:[%s16361_s5 + $0x580] ss:$8 sps:$4 sm:$0xff]  }
 0x474   :  { %4007 = vmatprep.subr.bf16.mxu0 %v12019_v50  ;;  %5820 = vmatprep.subr.bf16.mxu1 %v12022_v47  ;;  %v12080_v62 = vld [vmem:[%s16361_s5 + $0xba0] ss:$8 sps:$4 sm:$0xff]   ;;  %v12085_v50 = vld [vmem:[%s16361_s5 + $0x594] ss:$8 sps:$4 sm:$0xff]  }
 0x475   :  { %v12088_v47 = vld [vmem:[%s16361_s5 + $0xbb4] ss:$8 sps:$4 sm:$0xff]  }
 0x476   :  { %5714 = vmatmul.mubr.bf16.vlgmr.msra.gmra.mrb[0].mxu1 %v5599_v2  ;;  %v12091_v2 = vld [vmem:[%s16361_s5 + $0x5a4] ss:$8 sps:$4 sm:$0xff]  }
 0x477   :  { %4008 = vmatpush1.bf16.msra.mxu0 %v12017_v14  ;;  %5821 = vmatpush1.bf16.msra.mxu1 %v12020_v45  ;;  %v12083_v14 = vld [vmem:[%s16361_s5 + $0x590] ss:$8 sps:$4 sm:$0xff]  }
 0x478   :  { %4009 = vmatprep.subr.bf16.mxu0 %v12025_v3  ;;  %5822 = vmatprep.subr.bf16.mxu1 %v12028_v29  ;;  %v12086_v45 = vld [vmem:[%s16361_s5 + $0xbb0] ss:$8 sps:$4 sm:$0xff]   ;;  %v12094_v3 = vld [vmem:[%s16361_s5 + $0xbc4] ss:$8 sps:$4 sm:$0xff]   ;;  %v12089_v29 = vld [vmem:[%s16361_s5 + $0x5a0] ss:$8 sps:$4 sm:$0xff]  }
 0x479   :  { %5852 = vmatprep.mubr.bf16.mxu1 %v12794_v0 }
 0x47b   :  { %4010 = vmatpush1.bf16.msra.mxu0 %v12023_v9  ;;  %5823 = vmatpush1.bf16.msra.mxu1 %v12026_v7  ;;  %v12092_v9 = vld [vmem:[%s16361_s5 + $0xbc0] ss:$8 sps:$4 sm:$0xff]   ;;  %v12097_v7 = vld [vmem:[%s16361_s5 + $0x5b4] ss:$8 sps:$4 sm:$0xff]  }
 0x47c   :  { %4134 = vmatprep.subr.bf16.mxu0 %v12031_v44  ;;  %5824 = vmatprep.subr.bf16.mxu1 %v12034_v8  ;;  %v12100_v44 = vld [vmem:[%s16361_s5 + $0xbd4] ss:$8 sps:$4 sm:$0xff]   ;;  %v12095_v8 = vld [vmem:[%s16361_s5 + $0x5b0] ss:$8 sps:$4 sm:$0xff]  }
 0x47e   :  { %4028 = vmatmul.mubr.bf16.vlgmr.msra.gmra.mrb[100].mxu0 %v3913_v48  ;;  %v12106_v48 = vld [vmem:[%s16361_s5 + $0xbe4] ss:$8 sps:$4 sm:$0xff]  }
 0x47f   :  { %4135 = vmatpush1.bf16.msra.mxu0 %v12029_v10  ;;  %5825 = vmatpush1.bf16.msra.mxu1 %v12032_v18  ;;  %v12098_v10 = vld [vmem:[%s16361_s5 + $0xbd0] ss:$8 sps:$4 sm:$0xff]   ;;  %v12103_v18 = vld [vmem:[%s16361_s5 + $0x5c4] ss:$8 sps:$4 sm:$0xff]  }
 0x480   :  { %4136 = vmatprep.subr.bf16.mxu0 %v12037_v19  ;;  %5826 = vmatprep.subr.bf16.mxu1 %v12040_v55  ;;  %v12101_v19 = vld [vmem:[%s16361_s5 + $0x5c0] ss:$8 sps:$4 sm:$0xff]  }
 0x481   :  { %4166 = vmatprep.mubr.bf16.mxu0 %v12794_v0  ;;  %v12104_v55 = vld [vmem:[%s16361_s5 + $0xbe0] ss:$8 sps:$4 sm:$0xff]  }
 0x483   :  { %4137 = vmatpush1.bf16.msra.mxu0 %v12035_v23  ;;  %5827 = vmatpush1.bf16.msra.mxu1 %v12038_v59  ;;  %v12109_v23 = vld [vmem:[%s16361_s5 + $0x5d4] ss:$8 sps:$4 sm:$0xff]  }
 0x484   :  { %4138 = vmatprep.subr.bf16.mxu0 %v12043_v24  ;;  %5828 = vmatprep.subr.bf16.mxu1 %v12046_v36  ;;  %v12112_v59 = vld [vmem:[%s16361_s5 + $0xbf4] ss:$8 sps:$4 sm:$0xff]   ;;  %v12107_v24 = vld [vmem:[%s16361_s5 + $0x5d0] ss:$8 sps:$4 sm:$0xff]  }
 0x485   :  { %v12110_v36 = vld [vmem:[%s16361_s5 + $0xbf0] ss:$8 sps:$4 sm:$0xff]  }
 0x487   :  { %4139 = vmatpush1.bf16.msra.mxu0 %v12041_v25  ;;  %5829 = vmatpush1.bf16.msra.mxu1 %v12044_v26  ;;  %v12115_v25 = vld [vmem:[%s16361_s5 + $0x5e4] ss:$8 sps:$4 sm:$0xff]  }
 0x488   :  { %4140 = vmatprep.subr.bf16.mxu0 %v12049_v28  ;;  %5830 = vmatprep.subr.bf16.mxu1 %v12052_v20  ;;  %v12118_v26 = vld [vmem:[%s16361_s5 + $0xc04] ss:$8 sps:$4 sm:$0xff]   ;;  %v12113_v28 = vld [vmem:[%s16361_s5 + $0x5e0] ss:$8 sps:$4 sm:$0xff]  }
 0x489   :  { %v12116_v20 = vld [vmem:[%s16361_s5 + $0xc00] ss:$8 sps:$4 sm:$0xff]  }
 0x48b   :  { %4141 = vmatpush1.bf16.msra.mxu0 %v12047_v31  ;;  %5831 = vmatpush1.bf16.msra.mxu1 %v12050_v39  ;;  %v5880_v31 = vrot.slane %v14054_v34, 4  ;;  %v12121_v39 = vld [vmem:[%s16361_s5 + $0x5f4] ss:$8 sps:$4 sm:$0xff]  }
 0x48c   :  { %4142 = vmatprep.subr.bf16.mxu0 %v12055_v30  ;;  %5832 = vmatprep.subr.bf16.mxu1 %v12058_v40  ;;  %v12124_v30 = vld [vmem:[%s16361_s5 + $0xc14] ss:$8 sps:$4 sm:$0xff]   ;;  %v12119_v40 = vld [vmem:[%s16361_s5 + $0x5f0] ss:$8 sps:$4 sm:$0xff]  }
 0x48f   :  { %4143 = vmatpush1.bf16.msra.mxu0 %v12053_v42  ;;  %5833 = vmatpush1.bf16.msra.mxu1 %v12056_v13  ;;  %v12127_v42 = vld [vmem:[%s16361_s5 + $0x604] ss:$8 sps:$4 sm:$0xff]  }
 0x490   :  { %4144 = vmatprep.subr.bf16.mxu0 %v12061_v46  ;;  %5834 = vmatprep.subr.bf16.mxu1 %v12064_v51  ;;  %v12130_v13 = vld [vmem:[%s16361_s5 + $0xc24] ss:$8 sps:$4 sm:$0xff]   ;;  %v12125_v46 = vld [vmem:[%s16361_s5 + $0x600] ss:$8 sps:$4 sm:$0xff]  }
 0x491   :  { %v12128_v51 = vld [vmem:[%s16361_s5 + $0xc20] ss:$8 sps:$4 sm:$0xff]  }
 0x493   :  { %4145 = vmatpush1.bf16.msra.mxu0 %v12059_v53  ;;  %5835 = vmatpush1.bf16.msra.mxu1 %v12062_v22  ;;  %v4194_v53 = vrot.slane %v13899_v11, 4  ;;  %v12133_v22 = vld [vmem:[%s16361_s5 + $0x614] ss:$8 sps:$4 sm:$0xff]  }
 0x494   :  { %4146 = vmatprep.subr.bf16.mxu0 %v12067_v54  ;;  %5962 = vmatprep.subr.bf16.mxu1 %v12070_v12  ;;  %v12136_v54 = vld [vmem:[%s16361_s5 + $0xc34] ss:$8 sps:$4 sm:$0xff]   ;;  %v12131_v12 = vld [vmem:[%s16361_s5 + $0x610] ss:$8 sps:$4 sm:$0xff]  }
 0x496   :  { %5853 = vmatmul.mubr.bf16.vlgmr.msra.gmra.mrb[0].mxu1 %v14054_v34  ;;  %v12122_v34 = vld [vmem:[%s16361_s5 + $0xc10] ss:$8 sps:$4 sm:$0xff]  }
 0x497   :  { %4147 = vmatpush1.bf16.msra.mxu0 %v12065_v21  ;;  %5963 = vmatpush1.bf16.msra.mxu1 %v12068_v49  ;;  %v12139_v21 = vld [vmem:[%s16361_s5 + $0x624] ss:$8 sps:$4 sm:$0xff]  }
 0x498   :  { %4148 = vmatprep.subr.bf16.mxu0 %v12073_v1  ;;  %5964 = vmatprep.subr.bf16.mxu1 %v12076_v27  ;;  %v12142_v49 = vld [vmem:[%s16361_s5 + $0xc44] ss:$8 sps:$4 sm:$0xff]   ;;  %v12137_v1 = vld [vmem:[%s16361_s5 + $0x620] ss:$8 sps:$4 sm:$0xff]  }
 0x499   :  { %5994 = vmatprep.mubr.bf16.mxu1 %v12794_v0  ;;  %v12140_v27 = vld [vmem:[%s16361_s5 + $0xc40] ss:$8 sps:$4 sm:$0xff]  }
 0x49b   :  { %4149 = vmatpush1.bf16.msra.mxu0 %v12071_v56  ;;  %5965 = vmatpush1.bf16.msra.mxu1 %v12074_v33  ;;  %v12145_v56 = vld [vmem:[%s16361_s5 + $0x634] ss:$8 sps:$4 sm:$0xff]  }
 0x49c   :  { %4276 = vmatprep.subr.bf16.mxu0 %v12079_v17  ;;  %5966 = vmatprep.subr.bf16.mxu1 %v12082_v61  ;;  %v12148_v33 = vld [vmem:[%s16361_s5 + $0xc54] ss:$8 sps:$4 sm:$0xff]   ;;  %v12143_v17 = vld [vmem:[%s16361_s5 + $0x630] ss:$8 sps:$4 sm:$0xff]  }
 0x49d   :  { %v12146_v61 = vld [vmem:[%s16361_s5 + $0xc50] ss:$8 sps:$4 sm:$0xff]  }
 0x49e   :  { %4167 = vmatmul.mubr.bf16.vlgmr.msra.gmra.mrb[100].mxu0 %v13899_v11  ;;  %v12134_v11 = vld [vmem:[%s16361_s5 + $0xc30] ss:$8 sps:$4 sm:$0xff]  }
 0x49f   :  { %4277 = vmatpush1.bf16.msra.mxu0 %v12077_v58  ;;  %5967 = vmatpush1.bf16.msra.mxu1 %v12080_v62  ;;  %v12151_v58 = vld [vmem:[%s16361_s5 + $0x644] ss:$8 sps:$4 sm:$0xff]  }
 0x4a0   :  { %4278 = vmatprep.subr.bf16.mxu0 %v12085_v50  ;;  %5968 = vmatprep.subr.bf16.mxu1 %v12088_v47  ;;  %v12154_v62 = vld [vmem:[%s16361_s5 + $0xc64] ss:$8 sps:$4 sm:$0xff]   ;;  %v12149_v50 = vld [vmem:[%s16361_s5 + $0x640] ss:$8 sps:$4 sm:$0xff]  }
 0x4a1   :  { %4308 = vmatprep.mubr.bf16.mxu0 %v12794_v0  ;;  %v12152_v47 = vld [vmem:[%s16361_s5 + $0xc60] ss:$8 sps:$4 sm:$0xff]  }
 0x4a3   :  { %4279 = vmatpush1.bf16.msra.mxu0 %v12083_v14  ;;  %5969 = vmatpush1.bf16.msra.mxu1 %v12086_v45  ;;  %v12157_v14 = vld [vmem:[%s16361_s5 + $0x654] ss:$8 sps:$4 sm:$0xff]  }
 0x4a4   :  { %4280 = vmatprep.subr.bf16.mxu0 %v12091_v2  ;;  %5970 = vmatprep.subr.bf16.mxu1 %v12094_v3  ;;  %v12160_v45 = vld [vmem:[%s16361_s5 + $0xc74] ss:$8 sps:$4 sm:$0xff]   ;;  %v12155_v2 = vld [vmem:[%s16361_s5 + $0x650] ss:$8 sps:$4 sm:$0xff]  }
 0x4a5   :  { %v12158_v3 = vld [vmem:[%s16361_s5 + $0xc70] ss:$8 sps:$4 sm:$0xff]  }
 0x4a7   :  { %4281 = vmatpush1.bf16.msra.mxu0 %v12089_v29  ;;  %5971 = vmatpush1.bf16.msra.mxu1 %v12092_v9  ;;  %v12163_v29 = vld [vmem:[%s16361_s5 + $0x664] ss:$8 sps:$4 sm:$0xff]  }
 0x4a8   :  { %4282 = vmatprep.subr.bf16.mxu0 %v12097_v7  ;;  %5972 = vmatprep.subr.bf16.mxu1 %v12100_v44  ;;  %v12166_v9 = vld [vmem:[%s16361_s5 + $0xc84] ss:$8 sps:$4 sm:$0xff]   ;;  %v12161_v7 = vld [vmem:[%s16361_s5 + $0x660] ss:$8 sps:$4 sm:$0xff]  }
 0x4a9   :  { %v12164_v44 = vld [vmem:[%s16361_s5 + $0xc80] ss:$8 sps:$4 sm:$0xff]  }
 0x4ab   :  { %4283 = vmatpush1.bf16.msra.mxu0 %v12095_v8  ;;  %5973 = vmatpush1.bf16.msra.mxu1 %v12098_v10  ;;  %v12169_v8 = vld [vmem:[%s16361_s5 + $0x674] ss:$8 sps:$4 sm:$0xff]  }
 0x4ac   :  { %4284 = vmatprep.subr.bf16.mxu0 %v12103_v18  ;;  %5974 = vmatprep.subr.bf16.mxu1 %v12106_v48  ;;  %v12172_v10 = vld [vmem:[%s16361_s5 + $0xc94] ss:$8 sps:$4 sm:$0xff]   ;;  %v12167_v18 = vld [vmem:[%s16361_s5 + $0x670] ss:$8 sps:$4 sm:$0xff]  }
 0x4ad   :  { %v12170_v48 = vld [vmem:[%s16361_s5 + $0xc90] ss:$8 sps:$4 sm:$0xff]  }
 0x4af   :  { %4285 = vmatpush1.bf16.msra.mxu0 %v12101_v19  ;;  %5975 = vmatpush1.bf16.msra.mxu1 %v12104_v55  ;;  %v12175_v19 = vld [vmem:[%s16361_s5 + $0x684] ss:$8 sps:$4 sm:$0xff]  }
 0x4b0   :  { %4286 = vmatprep.subr.bf16.mxu0 %v12109_v23  ;;  %5976 = vmatprep.subr.bf16.mxu1 %v12112_v59  ;;  %v12178_v55 = vld [vmem:[%s16361_s5 + $0xca4] ss:$8 sps:$4 sm:$0xff]   ;;  %v12173_v23 = vld [vmem:[%s16361_s5 + $0x680] ss:$8 sps:$4 sm:$0xff]  }
 0x4b1   :  { %v12176_v59 = vld [vmem:[%s16361_s5 + $0xca0] ss:$8 sps:$4 sm:$0xff]  }
 0x4b3   :  { %4287 = vmatpush1.bf16.msra.mxu0 %v12107_v24  ;;  %5977 = vmatpush1.bf16.msra.mxu1 %v12110_v36  ;;  %v12181_v24 = vld [vmem:[%s16361_s5 + $0x694] ss:$8 sps:$4 sm:$0xff]  }
 0x4b4   :  { %4288 = vmatprep.subr.bf16.mxu0 %v12115_v25  ;;  %6101 = vmatprep.subr.bf16.mxu1 %v12118_v26  ;;  %v12184_v36 = vld [vmem:[%s16361_s5 + $0xcb4] ss:$8 sps:$4 sm:$0xff]   ;;  %v12179_v25 = vld [vmem:[%s16361_s5 + $0x690] ss:$8 sps:$4 sm:$0xff]  }
 0x4b5   :  { %v12182_v26 = vld [vmem:[%s16361_s5 + $0xcb0] ss:$8 sps:$4 sm:$0xff]  }
 0x4b6   :  { %5995 = vmatmul.mubr.bf16.vlgmr.msra.gmra.mrb[0].mxu1 %v5880_v31  ;;  %v12185_v31 = vld [vmem:[%s16361_s5 + $0x6a0] ss:$8 sps:$4 sm:$0xff]  }
 0x4b7   :  { %4289 = vmatpush1.bf16.msra.mxu0 %v12113_v28  ;;  %6102 = vmatpush1.bf16.msra.mxu1 %v12116_v20  ;;  %v12187_v28 = vld [vmem:[%s16361_s5 + $0x6a4] ss:$8 sps:$4 sm:$0xff]  }
 0x4b8   :  { %4290 = vmatprep.subr.bf16.mxu0 %v12121_v39  ;;  %6103 = vmatprep.subr.bf16.mxu1 %v12124_v30  ;;  %v12190_v20 = vld [vmem:[%s16361_s5 + $0xcc4] ss:$8 sps:$4 sm:$0xff]   ;;  %v12188_v39 = vld [vmem:[%s16361_s5 + $0xcc0] ss:$8 sps:$4 sm:$0xff]   ;;  %v12193_v30 = vld [vmem:[%s16361_s5 + $0x6b4] ss:$8 sps:$4 sm:$0xff]  }
 0x4b9   :  { %6133 = vmatprep.mubr.bf16.mxu1 %v12794_v0 }
 0x4bb   :  { %4291 = vmatpush1.bf16.msra.mxu0 %v12119_v40  ;;  %6104 = vmatpush1.bf16.msra.mxu1 %v12122_v34  ;;  %v12196_v40 = vld [vmem:[%s16361_s5 + $0xcd4] ss:$8 sps:$4 sm:$0xff]   ;;  %v12191_v34 = vld [vmem:[%s16361_s5 + $0x6b0] ss:$8 sps:$4 sm:$0xff]  }
 0x4bc   :  { %4415 = vmatprep.subr.bf16.mxu0 %v12127_v42  ;;  %6105 = vmatprep.subr.bf16.mxu1 %v12130_v13  ;;  %v12194_v42 = vld [vmem:[%s16361_s5 + $0xcd0] ss:$8 sps:$4 sm:$0xff]   ;;  %v12199_v13 = vld [vmem:[%s16361_s5 + $0x6c4] ss:$8 sps:$4 sm:$0xff]  }
 0x4be   :  { %4309 = vmatmul.mubr.bf16.vlgmr.msra.gmra.mrb[100].mxu0 %v4194_v53  ;;  %v12200_v53 = vld [vmem:[%s16361_s5 + $0xce0] ss:$8 sps:$4 sm:$0xff]  }
 0x4bf   :  { %4416 = vmatpush1.bf16.msra.mxu0 %v12125_v46  ;;  %6106 = vmatpush1.bf16.msra.mxu1 %v12128_v51  ;;  %v12202_v46 = vld [vmem:[%s16361_s5 + $0xce4] ss:$8 sps:$4 sm:$0xff]   ;;  %v12197_v51 = vld [vmem:[%s16361_s5 + $0x6c0] ss:$8 sps:$4 sm:$0xff]  }
 0x4c0   :  { %4417 = vmatprep.subr.bf16.mxu0 %v12133_v22  ;;  %6107 = vmatprep.subr.bf16.mxu1 %v12136_v54  ;;  %v12205_v22 = vld [vmem:[%s16361_s5 + $0x6d4] ss:$8 sps:$4 sm:$0xff]  }
 0x4c1   :  { %4447 = vmatprep.mubr.bf16.mxu0 %v12794_v0  ;;  %v12208_v54 = vld [vmem:[%s16361_s5 + $0xcf4] ss:$8 sps:$4 sm:$0xff]  }
 0x4c3   :  { %4418 = vmatpush1.bf16.msra.mxu0 %v12131_v12  ;;  %6108 = vmatpush1.bf16.msra.mxu1 %v12134_v11  ;;  %v12203_v12 = vld [vmem:[%s16361_s5 + $0x6d0] ss:$8 sps:$4 sm:$0xff]  }
 0x4c4   :  { %4419 = vmatprep.subr.bf16.mxu0 %v12139_v21  ;;  %6109 = vmatprep.subr.bf16.mxu1 %v12142_v49  ;;  %v12206_v11 = vld [vmem:[%s16361_s5 + $0xcf0] ss:$8 sps:$4 sm:$0xff]   ;;  %v12211_v21 = vld [vmem:[%s16361_s5 + $0x6e4] ss:$8 sps:$4 sm:$0xff]  }
 0x4c5   :  { %v12214_v49 = vld [vmem:[%s16361_s5 + $0xd04] ss:$8 sps:$4 sm:$0xff]  }
 0x4c7   :  { %4420 = vmatpush1.bf16.msra.mxu0 %v12137_v1  ;;  %6110 = vmatpush1.bf16.msra.mxu1 %v12140_v27  ;;  %v12209_v1 = vld [vmem:[%s16361_s5 + $0x6e0] ss:$8 sps:$4 sm:$0xff]  }
 0x4c8   :  { %4421 = vmatprep.subr.bf16.mxu0 %v12145_v56  ;;  %6111 = vmatprep.subr.bf16.mxu1 %v12148_v33  ;;  %v12212_v27 = vld [vmem:[%s16361_s5 + $0xd00] ss:$8 sps:$4 sm:$0xff]   ;;  %v6161_v56 = vrot.slane %v14081_v57, 4  ;;  %v12217_v33 = vld [vmem:[%s16361_s5 + $0x6f4] ss:$8 sps:$4 sm:$0xff]  }
 0x4cb   :  { %4422 = vmatpush1.bf16.msra.mxu0 %v12143_v17  ;;  %6112 = vmatpush1.bf16.msra.mxu1 %v12146_v61  ;;  %v12220_v17 = vld [vmem:[%s16361_s5 + $0xd14] ss:$8 sps:$4 sm:$0xff]   ;;  %v12215_v61 = vld [vmem:[%s16361_s5 + $0x6f0] ss:$8 sps:$4 sm:$0xff]  }
 0x4cc   :  { %4423 = vmatprep.subr.bf16.mxu0 %v12151_v58  ;;  %6113 = vmatprep.subr.bf16.mxu1 %v12154_v62  ;;  %v12223_v58 = vld [vmem:[%s16361_s5 + $0xd24] ss:$8 sps:$4 sm:$0xff]   ;;  %v12221_v62 = vld [vmem:[%s16361_s5 + $0xd20] ss:$8 sps:$4 sm:$0xff]  }
 0x4cf   :  { %4424 = vmatpush1.bf16.msra.mxu0 %v12149_v50  ;;  %6114 = vmatpush1.bf16.msra.mxu1 %v12152_v47  ;;  %v4475_v50 = vrot.slane %v13915_v63, 4  ;;  %v12226_v47 = vld [vmem:[%s16361_s5 + $0xd34] ss:$8 sps:$4 sm:$0xff]  }
 0x4d0   :  { %4425 = vmatprep.subr.bf16.mxu0 %v12157_v14  ;;  %6115 = vmatprep.subr.bf16.mxu1 %v12160_v45  ;;  %v12224_v14 = vld [vmem:[%s16361_s5 + $0xd30] ss:$8 sps:$4 sm:$0xff]   ;;  %v12229_v45 = vld [vmem:[%s16361_s5 + $0xd44] ss:$8 sps:$4 sm:$0xff]  }
 0x4d3   :  { %4426 = vmatpush1.bf16.msra.mxu0 %v12155_v2  ;;  %6116 = vmatpush1.bf16.msra.mxu1 %v12158_v3  ;;  %v12232_v2 = vld [vmem:[%s16361_s5 + $0xd54] ss:$8 sps:$4 sm:$0xff]   ;;  %v12230_v3 = vld [vmem:[%s16361_s5 + $0xd50] ss:$8 sps:$4 sm:$0xff]  }
 0x4d4   :  { %4427 = vmatprep.subr.bf16.mxu0 %v12163_v29  ;;  %6243 = vmatprep.subr.bf16.mxu1 %v12166_v9  ;;  %v12235_v29 = vld [vmem:[%s16361_s5 + $0xd64] ss:$8 sps:$4 sm:$0xff]   ;;  %v12233_v9 = vld [vmem:[%s16361_s5 + $0xd60] ss:$8 sps:$4 sm:$0xff]  }
 0x4d6   :  { %6134 = vmatmul.mubr.bf16.vlgmr.msra.gmra.mrb[0].mxu1 %v14081_v57  ;;  %v12218_v57 = vld [vmem:[%s16361_s5 + $0xd10] ss:$8 sps:$4 sm:$0xff]  }
 0x4d7   :  { %4428 = vmatpush1.bf16.msra.mxu0 %v12161_v7  ;;  %6244 = vmatpush1.bf16.msra.mxu1 %v12164_v44  ;;  %v12238_v7 = vld [vmem:[%s16361_s5 + $0xd74] ss:$8 sps:$4 sm:$0xff]   ;;  %v12236_v44 = vld [vmem:[%s16361_s5 + $0xd70] ss:$8 sps:$4 sm:$0xff]  }
 0x4d8   :  { %4429 = vmatprep.subr.bf16.mxu0 %v12169_v8  ;;  %6245 = vmatprep.subr.bf16.mxu1 %v12172_v10  ;;  %v12241_v8 = vld [vmem:[%s16361_s5 + $0xd84] ss:$8 sps:$4 sm:$0xff]   ;;  %v12239_v10 = vld [vmem:[%s16361_s5 + $0xd80] ss:$8 sps:$4 sm:$0xff]  }
 0x4d9   :  { %6275 = vmatprep.mubr.bf16.mxu1 %v12794_v0 }
 0x4db   :  { %4430 = vmatpush1.bf16.msra.mxu0 %v12167_v18  ;;  %6246 = vmatpush1.bf16.msra.mxu1 %v12170_v48  ;;  %v12244_v18 = vld [vmem:[%s16361_s5 + $0xd94] ss:$8 sps:$4 sm:$0xff]   ;;  %v12242_v48 = vld [vmem:[%s16361_s5 + $0xd90] ss:$8 sps:$4 sm:$0xff]  }
 0x4dc   :  { %4557 = vmatprep.subr.bf16.mxu0 %v12175_v19  ;;  %6247 = vmatprep.subr.bf16.mxu1 %v12178_v55  ;;  %v12247_v19 = vld [vmem:[%s16361_s5 + $0xda4] ss:$8 sps:$4 sm:$0xff]   ;;  %v12245_v55 = vld [vmem:[%s16361_s5 + $0xda0] ss:$8 sps:$4 sm:$0xff]  }
 0x4de   :  { %4448 = vmatmul.mubr.bf16.vlgmr.msra.gmra.mrb[100].mxu0 %v13915_v63  ;;  %v12227_v63 = vld [vmem:[%s16361_s5 + $0xd40] ss:$8 sps:$4 sm:$0xff]  }
 0x4df   :  { %4558 = vmatpush1.bf16.msra.mxu0 %v12173_v23  ;;  %6248 = vmatpush1.bf16.msra.mxu1 %v12176_v59  ;;  %v12250_v23 = vld [vmem:[%s16361_s5 + $0xdb4] ss:$8 sps:$4 sm:$0xff]   ;;  %v12248_v59 = vld [vmem:[%s16361_s5 + $0xdb0] ss:$8 sps:$4 sm:$0xff]  }
 0x4e0   :  { %4559 = vmatprep.subr.bf16.mxu0 %v12181_v24  ;;  %6249 = vmatprep.subr.bf16.mxu1 %v12184_v36  ;;  %v12253_v24 = vld [vmem:[%s16361_s5 + $0xdc4] ss:$8 sps:$4 sm:$0xff]   ;;  %v12251_v36 = vld [vmem:[%s16361_s5 + $0xdc0] ss:$8 sps:$4 sm:$0xff]  }
 0x4e1   :  { %4589 = vmatprep.mubr.bf16.mxu0 %v12794_v0 }
 0x4e3   :  { %4560 = vmatpush1.bf16.msra.mxu0 %v12179_v25  ;;  %6250 = vmatpush1.bf16.msra.mxu1 %v12182_v26  ;;  %v12256_v25 = vld [vmem:[%s16361_s5 + $0xdd4] ss:$8 sps:$4 sm:$0xff]   ;;  %v12254_v26 = vld [vmem:[%s16361_s5 + $0xdd0] ss:$8 sps:$4 sm:$0xff]  }
 0x4e4   :  { %4561 = vmatprep.subr.bf16.mxu0 %v12187_v28  ;;  %6251 = vmatprep.subr.bf16.mxu1 %v12190_v20  ;;  %v12259_v28 = vld [vmem:[%s16361_s5 + $0xde4] ss:$8 sps:$4 sm:$0xff]   ;;  %v12257_v20 = vld [vmem:[%s16361_s5 + $0xde0] ss:$8 sps:$4 sm:$0xff]  }
 0x4e7   :  { %4562 = vmatpush1.bf16.msra.mxu0 %v12185_v31  ;;  %6252 = vmatpush1.bf16.msra.mxu1 %v12188_v39  ;;  %v12262_v31 = vld [vmem:[%s16361_s5 + $0xdf4] ss:$8 sps:$4 sm:$0xff]   ;;  %v12260_v39 = vld [vmem:[%s16361_s5 + $0xdf0] ss:$8 sps:$4 sm:$0xff]  }
 0x4e8   :  { %4563 = vmatprep.subr.bf16.mxu0 %v12193_v30  ;;  %6253 = vmatprep.subr.bf16.mxu1 %v12196_v40  ;;  %v12265_v30 = vld [vmem:[%s16361_s5 + $0xe04] ss:$8 sps:$4 sm:$0xff]   ;;  %v12263_v40 = vld [vmem:[%s16361_s5 + $0xe00] ss:$8 sps:$4 sm:$0xff]  }
 0x4eb   :  { %4564 = vmatpush1.bf16.msra.mxu0 %v12191_v34  ;;  %6254 = vmatpush1.bf16.msra.mxu1 %v12194_v42  ;;  %v6442_v34 = vrot.slane %v14110_v5, 4  ;;  %v12268_v42 = vld [vmem:[%s16361_s5 + $0xe14] ss:$8 sps:$4 sm:$0xff]  }
 0x4ec   :  { %4565 = vmatprep.subr.bf16.mxu0 %v12199_v13  ;;  %6255 = vmatprep.subr.bf16.mxu1 %v12202_v46  ;;  %v12266_v13 = vld [vmem:[%s16361_s5 + $0xe10] ss:$8 sps:$4 sm:$0xff]   ;;  %v12271_v46 = vld [vmem:[%s16361_s5 + $0xe24] ss:$8 sps:$4 sm:$0xff]  }
 0x4ef   :  { %4566 = vmatpush1.bf16.msra.mxu0 %v12197_v51  ;;  %6256 = vmatpush1.bf16.msra.mxu1 %v12200_v53  ;;  %v12274_v51 = vld [vmem:[%s16361_s5 + $0xe34] ss:$8 sps:$4 sm:$0xff]   ;;  %v12272_v53 = vld [vmem:[%s16361_s5 + $0xe30] ss:$8 sps:$4 sm:$0xff]  }
 0x4f0   :  { %4567 = vmatprep.subr.bf16.mxu0 %v12205_v22  ;;  %6257 = vmatprep.subr.bf16.mxu1 %v12208_v54  ;;  %v12277_v22 = vld [vmem:[%s16361_s5 + $0xe44] ss:$8 sps:$4 sm:$0xff]   ;;  %v12275_v54 = vld [vmem:[%s16361_s5 + $0xe40] ss:$8 sps:$4 sm:$0xff]  }
 0x4f3   :  { %4568 = vmatpush1.bf16.msra.mxu0 %v12203_v12  ;;  %6258 = vmatpush1.bf16.msra.mxu1 %v12206_v11  ;;  %v12280_v12 = vld [vmem:[%s16361_s5 + $0xe54] ss:$8 sps:$4 sm:$0xff]   ;;  %v12278_v11 = vld [vmem:[%s16361_s5 + $0xe50] ss:$8 sps:$4 sm:$0xff]  }
 0x4f4   :  { %4569 = vmatprep.subr.bf16.mxu0 %v12211_v21  ;;  %6382 = vmatprep.subr.bf16.mxu1 %v12214_v49  ;;  %v12283_v21 = vld [vmem:[%s16361_s5 + $0xe64] ss:$8 sps:$4 sm:$0xff]   ;;  %v12281_v49 = vld [vmem:[%s16361_s5 + $0xe60] ss:$8 sps:$4 sm:$0xff]  }
 0x4f6   :  { %6276 = vmatmul.mubr.bf16.vlgmr.msra.gmra.mrb[0].mxu1 %v6161_v56  ;;  %v12289_v56 = vld [vmem:[%s16361_s5 + $0xe84] ss:$8 sps:$4 sm:$0xff]  }
 0x4f7   :  { %4570 = vmatpush1.bf16.msra.mxu0 %v12209_v1  ;;  %6383 = vmatpush1.bf16.msra.mxu1 %v12212_v27  ;;  %v12286_v1 = vld [vmem:[%s16361_s5 + $0xe74] ss:$8 sps:$4 sm:$0xff]   ;;  %v12284_v27 = vld [vmem:[%s16361_s5 + $0xe70] ss:$8 sps:$4 sm:$0xff]  }
 0x4f8   :  { %4571 = vmatprep.subr.bf16.mxu0 %v12217_v33  ;;  %6384 = vmatprep.subr.bf16.mxu1 %v12220_v17  ;;  %v12287_v33 = vld [vmem:[%s16361_s5 + $0xe80] ss:$8 sps:$4 sm:$0xff]   ;;  %v12292_v17 = vld [vmem:[%s16361_s5 + $0xe94] ss:$8 sps:$4 sm:$0xff]  }
 0x4f9   :  { %6414 = vmatprep.mubr.bf16.mxu1 %v12794_v0 }
 0x4fb   :  { %4572 = vmatpush1.bf16.msra.mxu0 %v12215_v61  ;;  %6385 = vmatpush1.bf16.msra.mxu1 %v12218_v57  ;;  %v12290_v61 = vld [vmem:[%s16361_s5 + $0xe90] ss:$8 sps:$4 sm:$0xff]   ;;  %v12295_v57 = vld [vmem:[%s16361_s5 + $0xea4] ss:$8 sps:$4 sm:$0xff]  }
 0x4fc   :  { %6386 = vmatprep.subr.bf16.mxu1 %v12223_v58  ;;  %9627 = vmatprep.subr.bf16.mxu0 %v12794_v0  ;;  %v12293_v58 = vld [vmem:[%s16361_s5 + $0xea0] ss:$8 sps:$4 sm:$0xff]  }
 0x4fe   :  { %4590 = vmatmul.mubr.bf16.vlgmr.msra.gmra.mrb[100].mxu0 %v4475_v50  ;;  %v12296_v50 = vld [vmem:[%s16361_s5 + $0xeb0] ss:$8 sps:$4 sm:$0xff]  }
 0x4ff   :  { %6387 = vmatpush1.bf16.msra.mxu1 %v12221_v62  ;;  %v12298_v62 = vld [vmem:[%s16361_s5 + $0xeb4] ss:$8 sps:$4 sm:$0xff]  }
 0x500   :  { %6388 = vmatprep.subr.bf16.mxu1 %v12226_v47  ;;  %v12301_v47 = vld [vmem:[%s16361_s5 + $0xec4] ss:$8 sps:$4 sm:$0xff]  }
 0x503   :  { %6389 = vmatpush1.bf16.msra.mxu1 %v12224_v14  ;;  %v12299_v14 = vld [vmem:[%s16361_s5 + $0xec0] ss:$8 sps:$4 sm:$0xff]  }
 0x504   :  { %6390 = vmatprep.subr.bf16.mxu1 %v12229_v45  ;;  %v12304_v45 = vld [vmem:[%s16361_s5 + $0xed4] ss:$8 sps:$4 sm:$0xff]  }
 0x507   :  { %6391 = vmatpush1.bf16.msra.mxu1 %v12227_v63  ;;  %v12302_v63 = vld [vmem:[%s16361_s5 + $0xed0] ss:$8 sps:$4 sm:$0xff]  }
 0x508   :  { %6392 = vmatprep.subr.bf16.mxu1 %v12232_v2  ;;  %v12307_v2 = vld [vmem:[%s16361_s5 + $0xee4] ss:$8 sps:$4 sm:$0xff]  }
 0x50b   :  { %6393 = vmatpush1.bf16.msra.mxu1 %v12230_v3  ;;  %v12305_v3 = vld [vmem:[%s16361_s5 + $0xee0] ss:$8 sps:$4 sm:$0xff]  }
 0x50c   :  { %6394 = vmatprep.subr.bf16.mxu1 %v12235_v29  ;;  %v12310_v29 = vld [vmem:[%s16361_s5 + $0xef4] ss:$8 sps:$4 sm:$0xff]  }
 0x50f   :  { %6395 = vmatpush1.bf16.msra.mxu1 %v12233_v9  ;;  %v12308_v9 = vld [vmem:[%s16361_s5 + $0xef0] ss:$8 sps:$4 sm:$0xff]  }
 0x510   :  { %6396 = vmatprep.subr.bf16.mxu1 %v12238_v7  ;;  %v12313_v7 = vld [vmem:[%s16361_s5 + $0xf04] ss:$8 sps:$4 sm:$0xff]  }
 0x513   :  { %6397 = vmatpush1.bf16.msra.mxu1 %v12236_v44  ;;  %v12311_v44 = vld [vmem:[%s16361_s5 + $0xf00] ss:$8 sps:$4 sm:$0xff]  }
 0x514   :  { %6524 = vmatprep.subr.bf16.mxu1 %v12241_v8  ;;  %v6723_v8 = vrot.slane %v14143_v32, 4 }
 0x516   :  { %6415 = vmatmul.mubr.bf16.vlgmr.msra.gmra.mrb[0].mxu1 %v14110_v5  ;;  %v12269_v5 = vld [vmem:[%s16361_s5 + $0xe20] ss:$8 sps:$4 sm:$0xff]  }
 0x517   :  { %6525 = vmatpush1.bf16.msra.mxu1 %v12239_v10  ;;  %6556 = vmatprep.mubr.bf16.mxu1 %v12794_v0  ;;  %v12316_v10 = vld [vmem:[%s16361_s5 + $0xf14] ss:$8 sps:$4 sm:$0xff]  }
 0x518   :  { %6526 = vmatprep.subr.bf16.mxu1 %v12244_v18  ;;  %v12314_v18 = vld [vmem:[%s16361_s5 + $0xf10] ss:$8 sps:$4 sm:$0xff]  }
 0x51b   :  { %6527 = vmatpush1.bf16.msra.mxu1 %v12242_v48  ;;  %v12319_v48 = vld [vmem:[%s16361_s5 + $0xf24] ss:$8 sps:$4 sm:$0xff]  }
 0x51c   :  { %6528 = vmatprep.subr.bf16.mxu1 %v12247_v19  ;;  %v12322_v19 = vld [vmem:[%s16361_s5 + $0xf34] ss:$8 sps:$4 sm:$0xff]  }
 0x51f   :  { %6529 = vmatpush1.bf16.msra.mxu1 %v12245_v55  ;;  %v12320_v55 = vld [vmem:[%s16361_s5 + $0xf30] ss:$8 sps:$4 sm:$0xff]  }
 0x520   :  { %6530 = vmatprep.subr.bf16.mxu1 %v12250_v23  ;;  %v12325_v23 = vld [vmem:[%s16361_s5 + $0xf44] ss:$8 sps:$4 sm:$0xff]  }
 0x523   :  { %6531 = vmatpush1.bf16.msra.mxu1 %v12248_v59  ;;  %v12323_v59 = vld [vmem:[%s16361_s5 + $0xf40] ss:$8 sps:$4 sm:$0xff]  }
 0x524   :  { %6532 = vmatprep.subr.bf16.mxu1 %v12253_v24  ;;  %v12328_v24 = vld [vmem:[%s16361_s5 + $0xf54] ss:$8 sps:$4 sm:$0xff]  }
 0x527   :  { %6533 = vmatpush1.bf16.msra.mxu1 %v12251_v36  ;;  %v12326_v36 = vld [vmem:[%s16361_s5 + $0xf50] ss:$8 sps:$4 sm:$0xff]  }
 0x528   :  { %6534 = vmatprep.subr.bf16.mxu1 %v12256_v25  ;;  %v12331_v25 = vld [vmem:[%s16361_s5 + $0xf64] ss:$8 sps:$4 sm:$0xff]  }
 0x52b   :  { %6535 = vmatpush1.bf16.msra.mxu1 %v12254_v26  ;;  %v12329_v26 = vld [vmem:[%s16361_s5 + $0xf60] ss:$8 sps:$4 sm:$0xff]  }
 0x52c   :  { %6536 = vmatprep.subr.bf16.mxu1 %v12259_v28  ;;  %v12334_v28 = vld [vmem:[%s16361_s5 + $0xf74] ss:$8 sps:$4 sm:$0xff]  }
 0x52f   :  { %6537 = vmatpush1.bf16.msra.mxu1 %v12257_v20  ;;  %v12332_v20 = vld [vmem:[%s16361_s5 + $0xf70] ss:$8 sps:$4 sm:$0xff]  }
 0x530   :  { %6538 = vmatprep.subr.bf16.mxu1 %v12262_v31  ;;  %v12337_v31 = vld [vmem:[%s16361_s5 + $0xf84] ss:$8 sps:$4 sm:$0xff]  }
 0x533   :  { %6539 = vmatpush1.bf16.msra.mxu1 %v12260_v39  ;;  %v12335_v39 = vld [vmem:[%s16361_s5 + $0xf80] ss:$8 sps:$4 sm:$0xff]  }
 0x534   :  { %6663 = vmatprep.subr.bf16.mxu1 %v12265_v30  ;;  %v12340_v30 = vld [vmem:[%s16361_s5 + $0xf94] ss:$8 sps:$4 sm:$0xff]  }
 0x536   :  { %6557 = vmatmul.mubr.bf16.vlgmr.msra.gmra.mrb[0].mxu1 %v6442_v34  ;;  %v12343_v34 = vld [vmem:[%s16361_s5 + $0xfa4] ss:$8 sps:$4 sm:$0xff]  }
 0x537   :  { %6664 = vmatpush1.bf16.msra.mxu1 %v12263_v40  ;;  %6695 = vmatprep.mubr.bf16.mxu1 %v12794_v0  ;;  %v12338_v40 = vld [vmem:[%s16361_s5 + $0xf90] ss:$8 sps:$4 sm:$0xff]  }
 0x538   :  { %6665 = vmatprep.subr.bf16.mxu1 %v12268_v42  ;;  %v12341_v42 = vld [vmem:[%s16361_s5 + $0xfa0] ss:$8 sps:$4 sm:$0xff]  }
 0x53b   :  { %6666 = vmatpush1.bf16.msra.mxu1 %v12266_v13  ;;  %v12346_v13 = vld [vmem:[%s16361_s5 + $0xfb4] ss:$8 sps:$4 sm:$0xff]  }
 0x53c   :  { %6667 = vmatprep.subr.bf16.mxu1 %v12271_v46  ;;  %v12344_v46 = vld [vmem:[%s16361_s5 + $0xfb0] ss:$8 sps:$4 sm:$0xff]  }
 0x53f   :  { %6668 = vmatpush1.bf16.msra.mxu1 %v12269_v5  ;;  %v12349_v5 = vld [vmem:[%s16361_s5 + $0xfc4] ss:$8 sps:$4 sm:$0xff]  }
 0x540   :  { %6669 = vmatprep.subr.bf16.mxu1 %v12274_v51  ;;  %v12347_v51 = vld [vmem:[%s16361_s5 + $0xfc0] ss:$8 sps:$4 sm:$0xff]  }
 0x543   :  { %6670 = vmatpush1.bf16.msra.mxu1 %v12272_v53  ;;  %v12352_v53 = vld [vmem:[%s16361_s5 + $0xfd4] ss:$8 sps:$4 sm:$0xff]  }
 0x544   :  { %6671 = vmatprep.subr.bf16.mxu1 %v12277_v22  ;;  %v12350_v22 = vld [vmem:[%s16361_s5 + $0xfd0] ss:$8 sps:$4 sm:$0xff]  }
 0x547   :  { %6672 = vmatpush1.bf16.msra.mxu1 %v12275_v54  ;;  %v12355_v54 = vld [vmem:[%s16361_s5 + $0xfe4] ss:$8 sps:$4 sm:$0xff]  }
 0x548   :  { %6673 = vmatprep.subr.bf16.mxu1 %v12280_v12  ;;  %v12353_v12 = vld [vmem:[%s16361_s5 + $0xfe0] ss:$8 sps:$4 sm:$0xff]  }
 0x54b   :  { %6674 = vmatpush1.bf16.msra.mxu1 %v12278_v11  ;;  %v12358_v11 = vld [vmem:[%s16361_s5 + $0xff4] ss:$8 sps:$4 sm:$0xff]  }
 0x54c   :  { %6675 = vmatprep.subr.bf16.mxu1 %v12283_v21  ;;  %v12356_v21 = vld [vmem:[%s16361_s5 + $0xff0] ss:$8 sps:$4 sm:$0xff]  }
 0x54f   :  { %6676 = vmatpush1.bf16.msra.mxu1 %v12281_v49  ;;  %v12361_v49 = vld [vmem:[%s16361_s5 + $0x1004] ss:$8 sps:$4 sm:$0xff]  }
 0x550   :  { %6677 = vmatprep.subr.bf16.mxu1 %v12286_v1  ;;  %v12359_v1 = vld [vmem:[%s16361_s5 + $0x1000] ss:$8 sps:$4 sm:$0xff]  }
 0x553   :  { %6678 = vmatpush1.bf16.msra.mxu1 %v12284_v27  ;;  %v7004_v27 = vrot.slane %v14174_v52, 4 }
 0x554   :  { %6805 = vmatprep.subr.bf16.mxu1 %v12289_v56  ;;  %v12364_v56 = vld [vmem:[%s16361_s5 + $0x1014] ss:$8 sps:$4 sm:$0xff]  }
 0x556   :  { %6696 = vmatmul.mubr.bf16.vlgmr.msra.gmra.mrb[0].mxu1 %v14143_v32  ;;  %v12317_v32 = vld [vmem:[%s16361_s5 + $0xf20] ss:$8 sps:$4 sm:$0xff]  }
 0x557   :  { %6806 = vmatpush1.bf16.msra.mxu1 %v12287_v33  ;;  %6837 = vmatprep.mubr.bf16.mxu1 %v12794_v0  ;;  %v12362_v33 = vld [vmem:[%s16361_s5 + $0x1010] ss:$8 sps:$4 sm:$0xff]  }
 0x558   :  { %6807 = vmatprep.subr.bf16.mxu1 %v12292_v17  ;;  %v12367_v17 = vld [vmem:[%s16361_s5 + $0x1024] ss:$8 sps:$4 sm:$0xff]  }
 0x55b   :  { %6808 = vmatpush1.bf16.msra.mxu1 %v12290_v61  ;;  %v12370_v61 = vld [vmem:[%s16361_s5 + $0x1034] ss:$8 sps:$4 sm:$0xff]  }
 0x55c   :  { %6809 = vmatprep.subr.bf16.mxu1 %v12295_v57  ;;  %v12368_v57 = vld [vmem:[%s16361_s5 + $0x1030] ss:$8 sps:$4 sm:$0xff]  }
 0x55f   :  { %6810 = vmatpush1.bf16.msra.mxu1 %v12293_v58  ;;  %v12373_v58 = vld [vmem:[%s16361_s5 + $0x1044] ss:$8 sps:$4 sm:$0xff]  }
 0x560   :  { %6811 = vmatprep.subr.bf16.mxu1 %v12298_v62  ;;  %v12371_v62 = vld [vmem:[%s16361_s5 + $0x1040] ss:$8 sps:$4 sm:$0xff]  }
 0x563   :  { %6812 = vmatpush1.bf16.msra.mxu1 %v12296_v50  ;;  %v12376_v50 = vld [vmem:[%s16361_s5 + $0x1054] ss:$8 sps:$4 sm:$0xff]  }
 0x564   :  { %6813 = vmatprep.subr.bf16.mxu1 %v12301_v47  ;;  %v12374_v47 = vld [vmem:[%s16361_s5 + $0x1050] ss:$8 sps:$4 sm:$0xff]  }
 0x567   :  { %6814 = vmatpush1.bf16.msra.mxu1 %v12299_v14  ;;  %v12379_v14 = vld [vmem:[%s16361_s5 + $0x1064] ss:$8 sps:$4 sm:$0xff]  }
 0x568   :  { %6815 = vmatprep.subr.bf16.mxu1 %v12304_v45  ;;  %v12377_v45 = vld [vmem:[%s16361_s5 + $0x1060] ss:$8 sps:$4 sm:$0xff]  }
 0x56b   :  { %6816 = vmatpush1.bf16.msra.mxu1 %v12302_v63  ;;  %v12382_v63 = vld [vmem:[%s16361_s5 + $0x1074] ss:$8 sps:$4 sm:$0xff]  }
 0x56c   :  { %6817 = vmatprep.subr.bf16.mxu1 %v12307_v2  ;;  %v12380_v2 = vld [vmem:[%s16361_s5 + $0x1070] ss:$8 sps:$4 sm:$0xff]  }
 0x56f   :  { %6818 = vmatpush1.bf16.msra.mxu1 %v12305_v3  ;;  %v12385_v3 = vld [vmem:[%s16361_s5 + $0x1084] ss:$8 sps:$4 sm:$0xff]  }
 0x570   :  { %6819 = vmatprep.subr.bf16.mxu1 %v12310_v29 }
 0x573   :  { %6820 = vmatpush1.bf16.msra.mxu1 %v12308_v9 }
 0x574   :  { %6944 = vmatprep.subr.bf16.mxu1 %v12313_v7 }
 0x576   :  { %6838 = vmatmul.mubr.bf16.vlgmr.msra.gmra.mrb[0].mxu1 %v6723_v8 }
 0x577   :  { %6945 = vmatpush1.bf16.msra.mxu1 %v12311_v44  ;;  %6976 = vmatprep.mubr.bf16.mxu1 %v12794_v0  ;;  %v12383_v44 = vld [vmem:[%s16361_s5 + $0x1080] ss:$8 sps:$4 sm:$0xff]  }
 0x578   :  { %6946 = vmatprep.subr.bf16.mxu1 %v12316_v10  ;;  %v12388_v10 = vld [vmem:[%s16361_s5 + $0x1094] ss:$8 sps:$4 sm:$0xff]  }
 0x57b   :  { %6947 = vmatpush1.bf16.msra.mxu1 %v12314_v18  ;;  %v12386_v18 = vld [vmem:[%s16361_s5 + $0x1090] ss:$8 sps:$4 sm:$0xff]  }
 0x57c   :  { %6948 = vmatprep.subr.bf16.mxu1 %v12319_v48  ;;  %v12391_v48 = vld [vmem:[%s16361_s5 + $0x10a4] ss:$8 sps:$4 sm:$0xff]  }
 0x57f   :  { %6949 = vmatpush1.bf16.msra.mxu1 %v12317_v32  ;;  %v12389_v32 = vld [vmem:[%s16361_s5 + $0x10a0] ss:$8 sps:$4 sm:$0xff]  }
 0x580   :  { %6950 = vmatprep.subr.bf16.mxu1 %v12322_v19  ;;  %v12394_v19 = vld [vmem:[%s16361_s5 + $0x10b4] ss:$8 sps:$4 sm:$0xff]  }
 0x583   :  { %6951 = vmatpush1.bf16.msra.mxu1 %v12320_v55  ;;  %v12392_v55 = vld [vmem:[%s16361_s5 + $0x10b0] ss:$8 sps:$4 sm:$0xff]  }
 0x584   :  { %6952 = vmatprep.subr.bf16.mxu1 %v12325_v23  ;;  %v12397_v23 = vld [vmem:[%s16361_s5 + $0x10c4] ss:$8 sps:$4 sm:$0xff]  }
 0x587   :  { %6953 = vmatpush1.bf16.msra.mxu1 %v12323_v59  ;;  %v12395_v59 = vld [vmem:[%s16361_s5 + $0x10c0] ss:$8 sps:$4 sm:$0xff]  }
 0x588   :  { %6954 = vmatprep.subr.bf16.mxu1 %v12328_v24  ;;  %v12400_v24 = vld [vmem:[%s16361_s5 + $0x10d4] ss:$8 sps:$4 sm:$0xff]  }
 0x58b   :  { %6955 = vmatpush1.bf16.msra.mxu1 %v12326_v36  ;;  %v12398_v36 = vld [vmem:[%s16361_s5 + $0x10d0] ss:$8 sps:$4 sm:$0xff]  }
 0x58c   :  { %6956 = vmatprep.subr.bf16.mxu1 %v12331_v25  ;;  %v12403_v25 = vld [vmem:[%s16361_s5 + $0x10e4] ss:$8 sps:$4 sm:$0xff]  }
 0x58f   :  { %6957 = vmatpush1.bf16.msra.mxu1 %v12329_v26  ;;  %v12401_v26 = vld [vmem:[%s16361_s5 + $0x10e0] ss:$8 sps:$4 sm:$0xff]  }
 0x590   :  { %6958 = vmatprep.subr.bf16.mxu1 %v12334_v28  ;;  %v12406_v28 = vld [vmem:[%s16361_s5 + $0x10f4] ss:$8 sps:$4 sm:$0xff]  }
 0x593   :  { %6959 = vmatpush1.bf16.msra.mxu1 %v12332_v20  ;;  %v12404_v20 = vld [vmem:[%s16361_s5 + $0x10f0] ss:$8 sps:$4 sm:$0xff]  }
 0x594   :  { %7086 = vmatprep.subr.bf16.mxu1 %v12337_v31  ;;  %v12409_v31 = vld [vmem:[%s16361_s5 + $0x1104] ss:$8 sps:$4 sm:$0xff]  }
 0x596   :  { %6977 = vmatmul.mubr.bf16.vlgmr.msra.gmra.mrb[0].mxu1 %v14174_v52  ;;  %v12365_v52 = vld [vmem:[%s16361_s5 + $0x1020] ss:$8 sps:$4 sm:$0xff]  }
 0x597   :  { %7087 = vmatpush1.bf16.msra.mxu1 %v12335_v39  ;;  %7118 = vmatprep.mubr.bf16.mxu1 %v12794_v0  ;;  %v12407_v39 = vld [vmem:[%s16361_s5 + $0x1100] ss:$8 sps:$4 sm:$0xff]  }
 0x598   :  { %7088 = vmatprep.subr.bf16.mxu1 %v12340_v30  ;;  %v7285_v30 = vrot.slane %v14201_v6, 4 }
 0x59b   :  { %7089 = vmatpush1.bf16.msra.mxu1 %v12338_v40  ;;  %v12412_v40 = vld [vmem:[%s16361_s5 + $0x1114] ss:$8 sps:$4 sm:$0xff]  }
 0x59c   :  { %7090 = vmatprep.subr.bf16.mxu1 %v12343_v34  ;;  %v12410_v34 = vld [vmem:[%s16361_s5 + $0x1110] ss:$8 sps:$4 sm:$0xff]  }
 0x59f   :  { %7091 = vmatpush1.bf16.msra.mxu1 %v12341_v42  ;;  %v12415_v42 = vld [vmem:[%s16361_s5 + $0x1124] ss:$8 sps:$4 sm:$0xff]  }
 0x5a0   :  { %7092 = vmatprep.subr.bf16.mxu1 %v12346_v13  ;;  %v12418_v13 = vld [vmem:[%s16361_s5 + $0x1134] ss:$8 sps:$4 sm:$0xff]  }
 0x5a3   :  { %7093 = vmatpush1.bf16.msra.mxu1 %v12344_v46  ;;  %v12416_v46 = vld [vmem:[%s16361_s5 + $0x1130] ss:$8 sps:$4 sm:$0xff]  }
 0x5a4   :  { %7094 = vmatprep.subr.bf16.mxu1 %v12349_v5  ;;  %v12421_v5 = vld [vmem:[%s16361_s5 + $0x1144] ss:$8 sps:$4 sm:$0xff]  }
 0x5a7   :  { %7095 = vmatpush1.bf16.msra.mxu1 %v12347_v51  ;;  %v12419_v51 = vld [vmem:[%s16361_s5 + $0x1140] ss:$8 sps:$4 sm:$0xff]  }
 0x5a8   :  { %7096 = vmatprep.subr.bf16.mxu1 %v12352_v53  ;;  %v12424_v53 = vld [vmem:[%s16361_s5 + $0x1154] ss:$8 sps:$4 sm:$0xff]  }
 0x5ab   :  { %7097 = vmatpush1.bf16.msra.mxu1 %v12350_v22  ;;  %v12422_v22 = vld [vmem:[%s16361_s5 + $0x1150] ss:$8 sps:$4 sm:$0xff]  }
 0x5ac   :  { %7098 = vmatprep.subr.bf16.mxu1 %v12355_v54  ;;  %v12427_v54 = vld [vmem:[%s16361_s5 + $0x1164] ss:$8 sps:$4 sm:$0xff]  }
 0x5af   :  { %7099 = vmatpush1.bf16.msra.mxu1 %v12353_v12  ;;  %v12425_v12 = vld [vmem:[%s16361_s5 + $0x1160] ss:$8 sps:$4 sm:$0xff]  }
 0x5b0   :  { %7100 = vmatprep.subr.bf16.mxu1 %v12358_v11  ;;  %v12430_v11 = vld [vmem:[%s16361_s5 + $0x1174] ss:$8 sps:$4 sm:$0xff]  }
 0x5b3   :  { %7101 = vmatpush1.bf16.msra.mxu1 %v12356_v21  ;;  %v12428_v21 = vld [vmem:[%s16361_s5 + $0x1170] ss:$8 sps:$4 sm:$0xff]  }
 0x5b4   :  { %7225 = vmatprep.subr.bf16.mxu1 %v12361_v49  ;;  %v12433_v49 = vld [vmem:[%s16361_s5 + $0x1184] ss:$8 sps:$4 sm:$0xff]  }
 0x5b6   :  { %7119 = vmatmul.mubr.bf16.vlgmr.msra.gmra.mrb[0].mxu1 %v7004_v27  ;;  %v12436_v27 = vld [vmem:[%s16361_s5 + $0x1194] ss:$8 sps:$4 sm:$0xff]  }
 0x5b7   :  { %7226 = vmatpush1.bf16.msra.mxu1 %v12359_v1  ;;  %7257 = vmatprep.mubr.bf16.mxu1 %v12794_v0  ;;  %v12431_v1 = vld [vmem:[%s16361_s5 + $0x1180] ss:$8 sps:$4 sm:$0xff]  }
 0x5b8   :  { %7227 = vmatprep.subr.bf16.mxu1 %v12364_v56  ;;  %v12434_v56 = vld [vmem:[%s16361_s5 + $0x1190] ss:$8 sps:$4 sm:$0xff]  }
 0x5bb   :  { %7228 = vmatpush1.bf16.msra.mxu1 %v12362_v33  ;;  %v12439_v33 = vld [vmem:[%s16361_s5 + $0x11a4] ss:$8 sps:$4 sm:$0xff]  }
 0x5bc   :  { %7229 = vmatprep.subr.bf16.mxu1 %v12367_v17  ;;  %v12437_v17 = vld [vmem:[%s16361_s5 + $0x11a0] ss:$8 sps:$4 sm:$0xff]  }
 0x5bf   :  { %7230 = vmatpush1.bf16.msra.mxu1 %v12365_v52  ;;  %v12442_v52 = vld [vmem:[%s16361_s5 + $0x11b4] ss:$8 sps:$4 sm:$0xff]  }
 0x5c0   :  { %7231 = vmatprep.subr.bf16.mxu1 %v12370_v61  ;;  %v12440_v61 = vld [vmem:[%s16361_s5 + $0x11b0] ss:$8 sps:$4 sm:$0xff]  }
 0x5c3   :  { %7232 = vmatpush1.bf16.msra.mxu1 %v12368_v57  ;;  %v12445_v57 = vld [vmem:[%s16361_s5 + $0x11c4] ss:$8 sps:$4 sm:$0xff]  }
 0x5c4   :  { %7233 = vmatprep.subr.bf16.mxu1 %v12373_v58  ;;  %v12443_v58 = vld [vmem:[%s16361_s5 + $0x11c0] ss:$8 sps:$4 sm:$0xff]  }
 0x5c7   :  { %7234 = vmatpush1.bf16.msra.mxu1 %v12371_v62  ;;  %v12448_v62 = vld [vmem:[%s16361_s5 + $0x11d4] ss:$8 sps:$4 sm:$0xff]  }
 0x5c8   :  { %7235 = vmatprep.subr.bf16.mxu1 %v12376_v50  ;;  %v12446_v50 = vld [vmem:[%s16361_s5 + $0x11d0] ss:$8 sps:$4 sm:$0xff]  }
 0x5cb   :  { %7236 = vmatpush1.bf16.msra.mxu1 %v12374_v47  ;;  %v12451_v47 = vld [vmem:[%s16361_s5 + $0x11e4] ss:$8 sps:$4 sm:$0xff]  }
 0x5cc   :  { %7237 = vmatprep.subr.bf16.mxu1 %v12379_v14  ;;  %v12449_v14 = vld [vmem:[%s16361_s5 + $0x11e0] ss:$8 sps:$4 sm:$0xff]  }
 0x5cf   :  { %7238 = vmatpush1.bf16.msra.mxu1 %v12377_v45  ;;  %v12454_v45 = vld [vmem:[%s16361_s5 + $0x11f4] ss:$8 sps:$4 sm:$0xff]  }
 0x5d0   :  { %7239 = vmatprep.subr.bf16.mxu1 %v12382_v63  ;;  %v12452_v63 = vld [vmem:[%s16361_s5 + $0x11f0] ss:$8 sps:$4 sm:$0xff]  }
 0x5d1   :  { %v15462_v29 = vpop.f32.mrb[100].mxu0 }
 0x5d2   :  { %v15464_v9 = vpop.f32.mrb[101].mxu0 }
 0x5d3   :  { %v4595_v7 = vpop.f32.mrb[102].mxu0  ;;  %7240 = vmatpush1.bf16.msra.mxu1 %v12380_v2  ;;  %v12457_v2 = vld [vmem:[%s16361_s5 + $0x1204] ss:$8 sps:$4 sm:$0xff]  }
 0x5d4   :  { %v4596_v8 = vpop.f32.mrb[103].mxu0  ;;  %7367 = vmatprep.subr.bf16.mxu1 %v12385_v3  ;;  %v12455_v3 = vld [vmem:[%s16361_s5 + $0x1200] ss:$8 sps:$4 sm:$0xff]   ;;  %v7566_v7 = vrot.slane %v14231_v37, 4 }
 0x5d5   :  { %v12458_v8 = vld [vmem:[%s16361_s5 + $0x1210] ss:$8 sps:$4 sm:$0xff]  }
 0x5d6   :  { %7258 = vmatmul.mubr.bf16.vlgmr.msra.gmra.mrb[0].mxu1 %v14201_v6  ;;  %v12413_v6 = vld [vmem:[%s16361_s5 + $0x1120] ss:$8 sps:$4 sm:$0xff]  }
 0x5d7   :  { %7368 = vmatpush1.bf16.msra.mxu1 %v12383_v44  ;;  %7399 = vmatprep.mubr.bf16.mxu1 %v12794_v0  ;;  %v12460_v44 = vld [vmem:[%s16361_s5 + $0x1214] ss:$8 sps:$4 sm:$0xff]  }
 0x5d8   :  { %7369 = vmatprep.subr.bf16.mxu1 %v12388_v10  ;;  %v12463_v10 = vld [vmem:[%s16361_s5 + $0x1224] ss:$8 sps:$4 sm:$0xff]  }
 0x5db   :  { %7370 = vmatpush1.bf16.msra.mxu1 %v12386_v18  ;;  %v12466_v18 = vld [vmem:[%s16361_s5 + $0x1234] ss:$8 sps:$4 sm:$0xff]  }
 0x5dc   :  { %7371 = vmatprep.subr.bf16.mxu1 %v12391_v48  ;;  %v12464_v48 = vld [vmem:[%s16361_s5 + $0x1230] ss:$8 sps:$4 sm:$0xff]  }
 0x5df   :  { %7372 = vmatpush1.bf16.msra.mxu1 %v12389_v32  ;;  %v12469_v32 = vld [vmem:[%s16361_s5 + $0x1244] ss:$8 sps:$4 sm:$0xff]  }
 0x5e0   :  { %7373 = vmatprep.subr.bf16.mxu1 %v12394_v19  ;;  %v12467_v19 = vld [vmem:[%s16361_s5 + $0x1240] ss:$8 sps:$4 sm:$0xff]  }
 0x5e3   :  { %7374 = vmatpush1.bf16.msra.mxu1 %v12392_v55  ;;  %v12472_v55 = vld [vmem:[%s16361_s5 + $0x1254] ss:$8 sps:$4 sm:$0xff]  }
 0x5e4   :  { %7375 = vmatprep.subr.bf16.mxu1 %v12397_v23  ;;  %v12470_v23 = vld [vmem:[%s16361_s5 + $0x1250] ss:$8 sps:$4 sm:$0xff]  }
 0x5e7   :  { %7376 = vmatpush1.bf16.msra.mxu1 %v12395_v59  ;;  %v12475_v59 = vld [vmem:[%s16361_s5 + $0x1264] ss:$8 sps:$4 sm:$0xff]  }
 0x5e8   :  { %7377 = vmatprep.subr.bf16.mxu1 %v12400_v24  ;;  %v12473_v24 = vld [vmem:[%s16361_s5 + $0x1260] ss:$8 sps:$4 sm:$0xff]  }
 0x5eb   :  { %7378 = vmatpush1.bf16.msra.mxu1 %v12398_v36  ;;  %v12478_v36 = vld [vmem:[%s16361_s5 + $0x1274] ss:$8 sps:$4 sm:$0xff]  }
 0x5ec   :  { %7379 = vmatprep.subr.bf16.mxu1 %v12403_v25  ;;  %v12476_v25 = vld [vmem:[%s16361_s5 + $0x1270] ss:$8 sps:$4 sm:$0xff]  }
 0x5ef   :  { %7380 = vmatpush1.bf16.msra.mxu1 %v12401_v26  ;;  %v12481_v26 = vld [vmem:[%s16361_s5 + $0x1284] ss:$8 sps:$4 sm:$0xff]  }
 0x5f0   :  { %7381 = vmatprep.subr.bf16.mxu1 %v12406_v28  ;;  %v12479_v28 = vld [vmem:[%s16361_s5 + $0x1280] ss:$8 sps:$4 sm:$0xff]  }
 0x5f3   :  { %7382 = vmatpush1.bf16.msra.mxu1 %v12404_v20  ;;  %v12484_v20 = vld [vmem:[%s16361_s5 + $0x1294] ss:$8 sps:$4 sm:$0xff]  }
 0x5f4   :  { %7506 = vmatprep.subr.bf16.mxu1 %v12409_v31  ;;  %v12482_v31 = vld [vmem:[%s16361_s5 + $0x1290] ss:$8 sps:$4 sm:$0xff]  }
 0x5f6   :  { %7400 = vmatmul.mubr.bf16.vlgmr.msra.gmra.mrb[0].mxu1 %v7285_v30  ;;  %v12485_v30 = vld [vmem:[%s16361_s5 + $0x12a0] ss:$8 sps:$4 sm:$0xff]  }
 0x5f7   :  { %7507 = vmatpush1.bf16.msra.mxu1 %v12407_v39  ;;  %7538 = vmatprep.mubr.bf16.mxu1 %v12794_v0  ;;  %v12487_v39 = vld [vmem:[%s16361_s5 + $0x12a4] ss:$8 sps:$4 sm:$0xff]  }
 0x5f8   :  { %7508 = vmatprep.subr.bf16.mxu1 %v12412_v40  ;;  %v12490_v40 = vld [vmem:[%s16361_s5 + $0x12b4] ss:$8 sps:$4 sm:$0xff]  }
 0x5fb   :  { %7509 = vmatpush1.bf16.msra.mxu1 %v12410_v34  ;;  %v12488_v34 = vld [vmem:[%s16361_s5 + $0x12b0] ss:$8 sps:$4 sm:$0xff]  }
 0x5fc   :  { %7510 = vmatprep.subr.bf16.mxu1 %v12415_v42  ;;  %v12493_v42 = vld [vmem:[%s16361_s5 + $0x12c4] ss:$8 sps:$4 sm:$0xff]  }
 0x5ff   :  { %7511 = vmatpush1.bf16.msra.mxu1 %v12413_v6  ;;  %v12491_v6 = vld [vmem:[%s16361_s5 + $0x12c0] ss:$8 sps:$4 sm:$0xff]  }
 0x600   :  { %7512 = vmatprep.subr.bf16.mxu1 %v12418_v13  ;;  %v12496_v13 = vld [vmem:[%s16361_s5 + $0x12d4] ss:$8 sps:$4 sm:$0xff]  }
 0x603   :  { %7513 = vmatpush1.bf16.msra.mxu1 %v12416_v46  ;;  %v12494_v46 = vld [vmem:[%s16361_s5 + $0x12d0] ss:$8 sps:$4 sm:$0xff]  }
 0x604   :  { %7514 = vmatprep.subr.bf16.mxu1 %v12421_v5  ;;  %v12499_v5 = vld [vmem:[%s16361_s5 + $0x12e4] ss:$8 sps:$4 sm:$0xff]  }
 0x607   :  { %7515 = vmatpush1.bf16.msra.mxu1 %v12419_v51  ;;  %v12497_v51 = vld [vmem:[%s16361_s5 + $0x12e0] ss:$8 sps:$4 sm:$0xff]  }
 0x608   :  { %7516 = vmatprep.subr.bf16.mxu1 %v12424_v53  ;;  %v12502_v53 = vld [vmem:[%s16361_s5 + $0x12f4] ss:$8 sps:$4 sm:$0xff]  }
 0x60b   :  { %7517 = vmatpush1.bf16.msra.mxu1 %v12422_v22  ;;  %v12500_v22 = vld [vmem:[%s16361_s5 + $0x12f0] ss:$8 sps:$4 sm:$0xff]  }
 0x60c   :  { %7518 = vmatprep.subr.bf16.mxu1 %v12427_v54  ;;  %v12505_v54 = vld [vmem:[%s16361_s5 + $0x1304] ss:$8 sps:$4 sm:$0xff]  }
 0x60f   :  { %7519 = vmatpush1.bf16.msra.mxu1 %v12425_v12  ;;  %v12503_v12 = vld [vmem:[%s16361_s5 + $0x1300] ss:$8 sps:$4 sm:$0xff]  }
 0x610   :  { %7520 = vmatprep.subr.bf16.mxu1 %v12430_v11  ;;  %v7847_v11 = vrot.slane %v14259_v60, 4 }
 0x613   :  { %7521 = vmatpush1.bf16.msra.mxu1 %v12428_v21  ;;  %v12508_v21 = vld [vmem:[%s16361_s5 + $0x1314] ss:$8 sps:$4 sm:$0xff]  }
 0x614   :  { %7648 = vmatprep.subr.bf16.mxu1 %v12433_v49  ;;  %v12506_v49 = vld [vmem:[%s16361_s5 + $0x1310] ss:$8 sps:$4 sm:$0xff]  }
 0x616   :  { %7539 = vmatmul.mubr.bf16.vlgmr.msra.gmra.mrb[0].mxu1 %v14231_v37  ;;  %v12461_v37 = vld [vmem:[%s16361_s5 + $0x1220] ss:$8 sps:$4 sm:$0xff]  }
 0x617   :  { %7649 = vmatpush1.bf16.msra.mxu1 %v12431_v1  ;;  %7680 = vmatprep.mubr.bf16.mxu1 %v12794_v0  ;;  %v12511_v1 = vld [vmem:[%s16361_s5 + $0x1324] ss:$8 sps:$4 sm:$0xff]  }
 0x618   :  { %7650 = vmatprep.subr.bf16.mxu1 %v12436_v27  ;;  %v12514_v27 = vld [vmem:[%s16361_s5 + $0x1334] ss:$8 sps:$4 sm:$0xff]  }
 0x61b   :  { %7651 = vmatpush1.bf16.msra.mxu1 %v12434_v56  ;;  %v12512_v56 = vld [vmem:[%s16361_s5 + $0x1330] ss:$8 sps:$4 sm:$0xff]  }
 0x61c   :  { %7652 = vmatprep.subr.bf16.mxu1 %v12439_v33  ;;  %v12517_v33 = vld [vmem:[%s16361_s5 + $0x1344] ss:$8 sps:$4 sm:$0xff]  }
 0x61f   :  { %7653 = vmatpush1.bf16.msra.mxu1 %v12437_v17  ;;  %v12515_v17 = vld [vmem:[%s16361_s5 + $0x1340] ss:$8 sps:$4 sm:$0xff]  }
 0x620   :  { %7654 = vmatprep.subr.bf16.mxu1 %v12442_v52  ;;  %v12520_v52 = vld [vmem:[%s16361_s5 + $0x1354] ss:$8 sps:$4 sm:$0xff]  }
 0x623   :  { %7655 = vmatpush1.bf16.msra.mxu1 %v12440_v61  ;;  %v12518_v61 = vld [vmem:[%s16361_s5 + $0x1350] ss:$8 sps:$4 sm:$0xff]  }
 0x624   :  { %7656 = vmatprep.subr.bf16.mxu1 %v12445_v57  ;;  %v12523_v57 = vld [vmem:[%s16361_s5 + $0x1364] ss:$8 sps:$4 sm:$0xff]  }
 0x627   :  { %7657 = vmatpush1.bf16.msra.mxu1 %v12443_v58  ;;  %v12521_v58 = vld [vmem:[%s16361_s5 + $0x1360] ss:$8 sps:$4 sm:$0xff]  }
 0x628   :  { %7658 = vmatprep.subr.bf16.mxu1 %v12448_v62  ;;  %v12526_v62 = vld [vmem:[%s16361_s5 + $0x1374] ss:$8 sps:$4 sm:$0xff]  }
 0x62b   :  { %7659 = vmatpush1.bf16.msra.mxu1 %v12446_v50  ;;  %v12524_v50 = vld [vmem:[%s16361_s5 + $0x1370] ss:$8 sps:$4 sm:$0xff]  }
 0x62c   :  { %7660 = vmatprep.subr.bf16.mxu1 %v12451_v47  ;;  %v12529_v47 = vld [vmem:[%s16361_s5 + $0x1384] ss:$8 sps:$4 sm:$0xff]  }
 0x62f   :  { %7661 = vmatpush1.bf16.msra.mxu1 %v12449_v14  ;;  %v12527_v14 = vld [vmem:[%s16361_s5 + $0x1380] ss:$8 sps:$4 sm:$0xff]  }
 0x630   :  { %7662 = vmatprep.subr.bf16.mxu1 %v12454_v45  ;;  %v12532_v45 = vld [vmem:[%s16361_s5 + $0x1394] ss:$8 sps:$4 sm:$0xff]  }
 0x633   :  { %7663 = vmatpush1.bf16.msra.mxu1 %v12452_v63  ;;  %v12530_v63 = vld [vmem:[%s16361_s5 + $0x1390] ss:$8 sps:$4 sm:$0xff]  }
 0x634   :  { %7787 = vmatprep.subr.bf16.mxu1 %v12457_v2  ;;  %v12535_v2 = vld [vmem:[%s16361_s5 + $0x13a4] ss:$8 sps:$4 sm:$0xff]  }
 0x636   :  { %7681 = vmatmul.mubr.bf16.vlgmr.msra.gmra.mrb[0].mxu1 %v7566_v7  ;;  %v12538_v7 = vld [vmem:[%s16361_s5 + $0x13b4] ss:$8 sps:$4 sm:$0xff]  }
 0x637   :  { %7788 = vmatpush1.bf16.msra.mxu1 %v12455_v3  ;;  %7819 = vmatprep.mubr.bf16.mxu1 %v12794_v0  ;;  %v12533_v3 = vld [vmem:[%s16361_s5 + $0x13a0] ss:$8 sps:$4 sm:$0xff]  }
 0x638   :  { %7789 = vmatprep.subr.bf16.mxu1 %v12460_v44  ;;  %v12536_v44 = vld [vmem:[%s16361_s5 + $0x13b0] ss:$8 sps:$4 sm:$0xff]  }
 0x63b   :  { %7790 = vmatpush1.bf16.msra.mxu1 %v12458_v8  ;;  %v12541_v8 = vld [vmem:[%s16361_s5 + $0x13c4] ss:$8 sps:$4 sm:$0xff]  }
 0x63c   :  { %7791 = vmatprep.subr.bf16.mxu1 %v12463_v10  ;;  %v12539_v10 = vld [vmem:[%s16361_s5 + $0x13c0] ss:$8 sps:$4 sm:$0xff]  }
 0x63f   :  { %7792 = vmatpush1.bf16.msra.mxu1 %v12461_v37  ;;  %v12544_v37 = vld [vmem:[%s16361_s5 + $0x13d4] ss:$8 sps:$4 sm:$0xff]  }
 0x640   :  { %7793 = vmatprep.subr.bf16.mxu1 %v12466_v18  ;;  %v12542_v18 = vld [vmem:[%s16361_s5 + $0x13d0] ss:$8 sps:$4 sm:$0xff]  }
 0x643   :  { %7794 = vmatpush1.bf16.msra.mxu1 %v12464_v48  ;;  %v12547_v48 = vld [vmem:[%s16361_s5 + $0x13e4] ss:$8 sps:$4 sm:$0xff]  }
 0x644   :  { %7795 = vmatprep.subr.bf16.mxu1 %v12469_v32  ;;  %v12545_v32 = vld [vmem:[%s16361_s5 + $0x13e0] ss:$8 sps:$4 sm:$0xff]  }
 0x647   :  { %7796 = vmatpush1.bf16.msra.mxu1 %v12467_v19  ;;  %v12550_v19 = vld [vmem:[%s16361_s5 + $0x13f4] ss:$8 sps:$4 sm:$0xff]  }
 0x648   :  { %7797 = vmatprep.subr.bf16.mxu1 %v12472_v55  ;;  %v12548_v55 = vld [vmem:[%s16361_s5 + $0x13f0] ss:$8 sps:$4 sm:$0xff]  }
 0x64b   :  { %7798 = vmatpush1.bf16.msra.mxu1 %v12470_v23  ;;  %v12553_v23 = vld [vmem:[%s16361_s5 + $0x1404] ss:$8 sps:$4 sm:$0xff]  }
 0x64c   :  { %7799 = vmatprep.subr.bf16.mxu1 %v12475_v59  ;;  %v12551_v59 = vld [vmem:[%s16361_s5 + $0x1400] ss:$8 sps:$4 sm:$0xff]  }
 0x64f   :  { %7800 = vmatpush1.bf16.msra.mxu1 %v12473_v24  ;;  %v8128_v24 = vrot.slane %v14291_v15, 4 }
 0x650   :  { %7801 = vmatprep.subr.bf16.mxu1 %v12478_v36  ;;  %v12556_v36 = vld [vmem:[%s16361_s5 + $0x1414] ss:$8 sps:$4 sm:$0xff]  }
 0x653   :  { %7802 = vmatpush1.bf16.msra.mxu1 %v12476_v25  ;;  %v12554_v25 = vld [vmem:[%s16361_s5 + $0x1410] ss:$8 sps:$4 sm:$0xff]  }
 0x654   :  { %7929 = vmatprep.subr.bf16.mxu1 %v12481_v26  ;;  %v12559_v26 = vld [vmem:[%s16361_s5 + $0x1424] ss:$8 sps:$4 sm:$0xff]  }
 0x656   :  { %7820 = vmatmul.mubr.bf16.vlgmr.msra.gmra.mrb[0].mxu1 %v14259_v60  ;;  %v12509_v60 = vld [vmem:[%s16361_s5 + $0x1320] ss:$8 sps:$4 sm:$0xff]  }
 0x657   :  { %7930 = vmatpush1.bf16.msra.mxu1 %v12479_v28  ;;  %7961 = vmatprep.mubr.bf16.mxu1 %v12794_v0  ;;  %v12562_v28 = vld [vmem:[%s16361_s5 + $0x1434] ss:$8 sps:$4 sm:$0xff]  }
 0x658   :  { %7931 = vmatprep.subr.bf16.mxu1 %v12484_v20  ;;  %v12560_v20 = vld [vmem:[%s16361_s5 + $0x1430] ss:$8 sps:$4 sm:$0xff]  }
 0x65b   :  { %7932 = vmatpush1.bf16.msra.mxu1 %v12482_v31  ;;  %v12565_v31 = vld [vmem:[%s16361_s5 + $0x1444] ss:$8 sps:$4 sm:$0xff]  }
 0x65c   :  { %7933 = vmatprep.subr.bf16.mxu1 %v12487_v39  ;;  %v12563_v39 = vld [vmem:[%s16361_s5 + $0x1440] ss:$8 sps:$4 sm:$0xff]  }
 0x65f   :  { %7934 = vmatpush1.bf16.msra.mxu1 %v12485_v30  ;;  %v12568_v30 = vld [vmem:[%s16361_s5 + $0x1454] ss:$8 sps:$4 sm:$0xff]  }
 0x660   :  { %7935 = vmatprep.subr.bf16.mxu1 %v12490_v40  ;;  %v12566_v40 = vld [vmem:[%s16361_s5 + $0x1450] ss:$8 sps:$4 sm:$0xff]  }
 0x663   :  { %7936 = vmatpush1.bf16.msra.mxu1 %v12488_v34  ;;  %v12571_v34 = vld [vmem:[%s16361_s5 + $0x1464] ss:$8 sps:$4 sm:$0xff]  }
 0x664   :  { %7937 = vmatprep.subr.bf16.mxu1 %v12493_v42  ;;  %v12569_v42 = vld [vmem:[%s16361_s5 + $0x1460] ss:$8 sps:$4 sm:$0xff]  }
 0x667   :  { %7938 = vmatpush1.bf16.msra.mxu1 %v12491_v6  ;;  %v12574_v6 = vld [vmem:[%s16361_s5 + $0x1474] ss:$8 sps:$4 sm:$0xff]  }
 0x668   :  { %7939 = vmatprep.subr.bf16.mxu1 %v12496_v13  ;;  %v12572_v13 = vld [vmem:[%s16361_s5 + $0x1470] ss:$8 sps:$4 sm:$0xff]  }
 0x66b   :  { %7940 = vmatpush1.bf16.msra.mxu1 %v12494_v46  ;;  %v12577_v46 = vld [vmem:[%s16361_s5 + $0x1484] ss:$8 sps:$4 sm:$0xff]  }
 0x66c   :  { %7941 = vmatprep.subr.bf16.mxu1 %v12499_v5  ;;  %v12575_v5 = vld [vmem:[%s16361_s5 + $0x1480] ss:$8 sps:$4 sm:$0xff]  }
 0x66f   :  { %7942 = vmatpush1.bf16.msra.mxu1 %v12497_v51  ;;  %v12580_v51 = vld [vmem:[%s16361_s5 + $0x1494] ss:$8 sps:$4 sm:$0xff]  }
 0x670   :  { %7943 = vmatprep.subr.bf16.mxu1 %v12502_v53  ;;  %v12578_v53 = vld [vmem:[%s16361_s5 + $0x1490] ss:$8 sps:$4 sm:$0xff]  }
 0x673   :  { %7944 = vmatpush1.bf16.msra.mxu1 %v12500_v22  ;;  %v12583_v22 = vld [vmem:[%s16361_s5 + $0x14a4] ss:$8 sps:$4 sm:$0xff]  }
 0x674   :  { %8068 = vmatprep.subr.bf16.mxu1 %v12505_v54  ;;  %v12581_v54 = vld [vmem:[%s16361_s5 + $0x14a0] ss:$8 sps:$4 sm:$0xff]  }
 0x676   :  { %7962 = vmatmul.mubr.bf16.vlgmr.msra.gmra.mrb[0].mxu1 %v7847_v11  ;;  %v12584_v11 = vld [vmem:[%s16361_s5 + $0x14b0] ss:$8 sps:$4 sm:$0xff]  }
 0x677   :  { %8069 = vmatpush1.bf16.msra.mxu1 %v12503_v12  ;;  %8100 = vmatprep.mubr.bf16.mxu1 %v12794_v0  ;;  %v12586_v12 = vld [vmem:[%s16361_s5 + $0x14b4] ss:$8 sps:$4 sm:$0xff]  }
 0x678   :  { %8070 = vmatprep.subr.bf16.mxu1 %v12508_v21  ;;  %v12589_v21 = vld [vmem:[%s16361_s5 + $0x14c4] ss:$8 sps:$4 sm:$0xff]  }
 0x67b   :  { %8071 = vmatpush1.bf16.msra.mxu1 %v12506_v49  ;;  %v12587_v49 = vld [vmem:[%s16361_s5 + $0x14c0] ss:$8 sps:$4 sm:$0xff]  }
 0x67c   :  { %8072 = vmatprep.subr.bf16.mxu1 %v12511_v1  ;;  %v12592_v1 = vld [vmem:[%s16361_s5 + $0x14d4] ss:$8 sps:$4 sm:$0xff]  }
 0x67f   :  { %8073 = vmatpush1.bf16.msra.mxu1 %v12509_v60  ;;  %v12590_v60 = vld [vmem:[%s16361_s5 + $0x14d0] ss:$8 sps:$4 sm:$0xff]  }
 0x680   :  { %8074 = vmatprep.subr.bf16.mxu1 %v12514_v27  ;;  %v12595_v27 = vld [vmem:[%s16361_s5 + $0x14e4] ss:$8 sps:$4 sm:$0xff]  }
 0x683   :  { %8075 = vmatpush1.bf16.msra.mxu1 %v12512_v56  ;;  %v12593_v56 = vld [vmem:[%s16361_s5 + $0x14e0] ss:$8 sps:$4 sm:$0xff]  }
 0x684   :  { %8076 = vmatprep.subr.bf16.mxu1 %v12517_v33  ;;  %v12598_v33 = vld [vmem:[%s16361_s5 + $0x14f4] ss:$8 sps:$4 sm:$0xff]  }
 0x687   :  { %8077 = vmatpush1.bf16.msra.mxu1 %v12515_v17  ;;  %v12596_v17 = vld [vmem:[%s16361_s5 + $0x14f0] ss:$8 sps:$4 sm:$0xff]  }
 0x688   :  { %8078 = vmatprep.subr.bf16.mxu1 %v12520_v52  ;;  %v12601_v52 = vld [vmem:[%s16361_s5 + $0x1504] ss:$8 sps:$4 sm:$0xff]  }
 0x68b   :  { %8079 = vmatpush1.bf16.msra.mxu1 %v12518_v61  ;;  %v12599_v61 = vld [vmem:[%s16361_s5 + $0x1500] ss:$8 sps:$4 sm:$0xff]  }
 0x68c   :  { %8080 = vmatprep.subr.bf16.mxu1 %v12523_v57  ;;  %v8409_v57 = vrot.slane %v14318_v43, 4 }
 0x68f   :  { %8081 = vmatpush1.bf16.msra.mxu1 %v12521_v58  ;;  %v12604_v58 = vld [vmem:[%s16361_s5 + $0x1514] ss:$8 sps:$4 sm:$0xff]  }
 0x690   :  { %8082 = vmatprep.subr.bf16.mxu1 %v12526_v62  ;;  %v12602_v62 = vld [vmem:[%s16361_s5 + $0x1510] ss:$8 sps:$4 sm:$0xff]  }
 0x693   :  { %8083 = vmatpush1.bf16.msra.mxu1 %v12524_v50  ;;  %v12607_v50 = vld [vmem:[%s16361_s5 + $0x1524] ss:$8 sps:$4 sm:$0xff]  }
 0x694   :  { %8210 = vmatprep.subr.bf16.mxu1 %v12529_v47  ;;  %v12610_v47 = vld [vmem:[%s16361_s5 + $0x1534] ss:$8 sps:$4 sm:$0xff]  }
 0x696   :  { %8101 = vmatmul.mubr.bf16.vlgmr.msra.gmra.mrb[0].mxu1 %v14291_v15  ;;  %v12557_v15 = vld [vmem:[%s16361_s5 + $0x1420] ss:$8 sps:$4 sm:$0xff]  }
 0x697   :  { %8211 = vmatpush1.bf16.msra.mxu1 %v12527_v14  ;;  %8242 = vmatprep.mubr.bf16.mxu1 %v12794_v0  ;;  %v12608_v14 = vld [vmem:[%s16361_s5 + $0x1530] ss:$8 sps:$4 sm:$0xff]  }
 0x698   :  { %8212 = vmatprep.subr.bf16.mxu1 %v12532_v45  ;;  %v12613_v45 = vld [vmem:[%s16361_s5 + $0x1544] ss:$8 sps:$4 sm:$0xff]  }
 0x69b   :  { %8213 = vmatpush1.bf16.msra.mxu1 %v12530_v63  ;;  %v12611_v63 = vld [vmem:[%s16361_s5 + $0x1540] ss:$8 sps:$4 sm:$0xff]  }
 0x69c   :  { %8214 = vmatprep.subr.bf16.mxu1 %v12535_v2  ;;  %v12616_v2 = vld [vmem:[%s16361_s5 + $0x1554] ss:$8 sps:$4 sm:$0xff]  }
 0x69f   :  { %8215 = vmatpush1.bf16.msra.mxu1 %v12533_v3  ;;  %v12614_v3 = vld [vmem:[%s16361_s5 + $0x1550] ss:$8 sps:$4 sm:$0xff]  }
 0x6a0   :  { %8216 = vmatprep.subr.bf16.mxu1 %v12538_v7  ;;  %v12619_v7 = vld [vmem:[%s16361_s5 + $0x1564] ss:$8 sps:$4 sm:$0xff]  }
 0x6a3   :  { %8217 = vmatpush1.bf16.msra.mxu1 %v12536_v44  ;;  %v12617_v44 = vld [vmem:[%s16361_s5 + $0x1560] ss:$8 sps:$4 sm:$0xff]  }
 0x6a4   :  { %8218 = vmatprep.subr.bf16.mxu1 %v12541_v8  ;;  %v12622_v8 = vld [vmem:[%s16361_s5 + $0x1574] ss:$8 sps:$4 sm:$0xff]  }
 0x6a7   :  { %8219 = vmatpush1.bf16.msra.mxu1 %v12539_v10  ;;  %v12620_v10 = vld [vmem:[%s16361_s5 + $0x1570] ss:$8 sps:$4 sm:$0xff]  }
 0x6a8   :  { %8220 = vmatprep.subr.bf16.mxu1 %v12544_v37  ;;  %v12625_v37 = vld [vmem:[%s16361_s5 + $0x1584] ss:$8 sps:$4 sm:$0xff]  }
 0x6ab   :  { %8221 = vmatpush1.bf16.msra.mxu1 %v12542_v18  ;;  %v12623_v18 = vld [vmem:[%s16361_s5 + $0x1580] ss:$8 sps:$4 sm:$0xff]  }
 0x6ac   :  { %8222 = vmatprep.subr.bf16.mxu1 %v12547_v48  ;;  %v12628_v48 = vld [vmem:[%s16361_s5 + $0x1594] ss:$8 sps:$4 sm:$0xff]  }
 0x6af   :  { %8223 = vmatpush1.bf16.msra.mxu1 %v12545_v32  ;;  %v12626_v32 = vld [vmem:[%s16361_s5 + $0x1590] ss:$8 sps:$4 sm:$0xff]  }
 0x6b0   :  { %8224 = vmatprep.subr.bf16.mxu1 %v12550_v19  ;;  %v12631_v19 = vld [vmem:[%s16361_s5 + $0x15a4] ss:$8 sps:$4 sm:$0xff]  }
 0x6b3   :  { %8225 = vmatpush1.bf16.msra.mxu1 %v12548_v55  ;;  %v12629_v55 = vld [vmem:[%s16361_s5 + $0x15a0] ss:$8 sps:$4 sm:$0xff]  }
 0x6b4   :  { %8349 = vmatprep.subr.bf16.mxu1 %v12553_v23  ;;  %v12634_v23 = vld [vmem:[%s16361_s5 + $0x15b4] ss:$8 sps:$4 sm:$0xff]  }
 0x6b6   :  { %8243 = vmatmul.mubr.bf16.vlgmr.msra.gmra.mrb[0].mxu1 %v8128_v24  ;;  %v12637_v24 = vld [vmem:[%s16361_s5 + $0x15c4] ss:$8 sps:$4 sm:$0xff]  }
 0x6b7   :  { %8350 = vmatpush1.bf16.msra.mxu1 %v12551_v59  ;;  %8381 = vmatprep.mubr.bf16.mxu1 %v12794_v0  ;;  %v12632_v59 = vld [vmem:[%s16361_s5 + $0x15b0] ss:$8 sps:$4 sm:$0xff]  }
 0x6b8   :  { %8351 = vmatprep.subr.bf16.mxu1 %v12556_v36  ;;  %v12635_v36 = vld [vmem:[%s16361_s5 + $0x15c0] ss:$8 sps:$4 sm:$0xff]  }
 0x6bb   :  { %8352 = vmatpush1.bf16.msra.mxu1 %v12554_v25  ;;  %v12640_v25 = vld [vmem:[%s16361_s5 + $0x15d4] ss:$8 sps:$4 sm:$0xff]  }
 0x6bc   :  { %8353 = vmatprep.subr.bf16.mxu1 %v12559_v26  ;;  %v12638_v26 = vld [vmem:[%s16361_s5 + $0x15d0] ss:$8 sps:$4 sm:$0xff]  }
 0x6bf   :  { %8354 = vmatpush1.bf16.msra.mxu1 %v12557_v15  ;;  %v12643_v15 = vld [vmem:[%s16361_s5 + $0x15e4] ss:$8 sps:$4 sm:$0xff]  }
 0x6c0   :  { %8355 = vmatprep.subr.bf16.mxu1 %v12562_v28  ;;  %v12641_v28 = vld [vmem:[%s16361_s5 + $0x15e0] ss:$8 sps:$4 sm:$0xff]  }
 0x6c3   :  { %8356 = vmatpush1.bf16.msra.mxu1 %v12560_v20  ;;  %v12646_v20 = vld [vmem:[%s16361_s5 + $0x15f4] ss:$8 sps:$4 sm:$0xff]  }
 0x6c4   :  { %8357 = vmatprep.subr.bf16.mxu1 %v12565_v31  ;;  %v12644_v31 = vld [vmem:[%s16361_s5 + $0x15f0] ss:$8 sps:$4 sm:$0xff]  }
 0x6c7   :  { %8358 = vmatpush1.bf16.msra.mxu1 %v12563_v39  ;;  %v12649_v39 = vld [vmem:[%s16361_s5 + $0x1604] ss:$8 sps:$4 sm:$0xff]  }
 0x6c8   :  { %8359 = vmatprep.subr.bf16.mxu1 %v12568_v30  ;;  %v12647_v30 = vld [vmem:[%s16361_s5 + $0x1600] ss:$8 sps:$4 sm:$0xff]  }
 0x6cb   :  { %8360 = vmatpush1.bf16.msra.mxu1 %v12566_v40  ;;  %v8690_v40 = vrot.slane %v14347_v16, 4 }
 0x6cc   :  { %8361 = vmatprep.subr.bf16.mxu1 %v12571_v34  ;;  %v12652_v34 = vld [vmem:[%s16361_s5 + $0x1614] ss:$8 sps:$4 sm:$0xff]  }
 0x6cf   :  { %8362 = vmatpush1.bf16.msra.mxu1 %v12569_v42  ;;  %v12650_v42 = vld [vmem:[%s16361_s5 + $0x1610] ss:$8 sps:$4 sm:$0xff]  }
 0x6d0   :  { %8363 = vmatprep.subr.bf16.mxu1 %v12574_v6  ;;  %v12655_v6 = vld [vmem:[%s16361_s5 + $0x1624] ss:$8 sps:$4 sm:$0xff]  }
 0x6d3   :  { %8364 = vmatpush1.bf16.msra.mxu1 %v12572_v13  ;;  %v12658_v13 = vld [vmem:[%s16361_s5 + $0x1634] ss:$8 sps:$4 sm:$0xff]  }
 0x6d4   :  { %8491 = vmatprep.subr.bf16.mxu1 %v12577_v46  ;;  %v12656_v46 = vld [vmem:[%s16361_s5 + $0x1630] ss:$8 sps:$4 sm:$0xff]  }
 0x6d6   :  { %8382 = vmatmul.mubr.bf16.vlgmr.msra.gmra.mrb[0].mxu1 %v14318_v43  ;;  %v12605_v43 = vld [vmem:[%s16361_s5 + $0x1520] ss:$8 sps:$4 sm:$0xff]  }
 0x6d7   :  { %8492 = vmatpush1.bf16.msra.mxu1 %v12575_v5  ;;  %8523 = vmatprep.mubr.bf16.mxu1 %v12794_v0  ;;  %v12661_v5 = vld [vmem:[%s16361_s5 + $0x1644] ss:$8 sps:$4 sm:$0xff]  }
 0x6d8   :  { %8493 = vmatprep.subr.bf16.mxu1 %v12580_v51  ;;  %v12659_v51 = vld [vmem:[%s16361_s5 + $0x1640] ss:$8 sps:$4 sm:$0xff]  }
 0x6db   :  { %8494 = vmatpush1.bf16.msra.mxu1 %v12578_v53  ;;  %v12664_v53 = vld [vmem:[%s16361_s5 + $0x1654] ss:$8 sps:$4 sm:$0xff]  }
 0x6dc   :  { %8495 = vmatprep.subr.bf16.mxu1 %v12583_v22  ;;  %v12662_v22 = vld [vmem:[%s16361_s5 + $0x1650] ss:$8 sps:$4 sm:$0xff]  }
 0x6df   :  { %8496 = vmatpush1.bf16.msra.mxu1 %v12581_v54  ;;  %v12667_v54 = vld [vmem:[%s16361_s5 + $0x1664] ss:$8 sps:$4 sm:$0xff]  }
 0x6e0   :  { %8497 = vmatprep.subr.bf16.mxu1 %v12586_v12  ;;  %v12665_v12 = vld [vmem:[%s16361_s5 + $0x1660] ss:$8 sps:$4 sm:$0xff]  }
 0x6e3   :  { %8498 = vmatpush1.bf16.msra.mxu1 %v12584_v11  ;;  %v12670_v11 = vld [vmem:[%s16361_s5 + $0x1674] ss:$8 sps:$4 sm:$0xff]  }
 0x6e4   :  { %8499 = vmatprep.subr.bf16.mxu1 %v12589_v21  ;;  %v12668_v21 = vld [vmem:[%s16361_s5 + $0x1670] ss:$8 sps:$4 sm:$0xff]  }
 0x6e7   :  { %8500 = vmatpush1.bf16.msra.mxu1 %v12587_v49  ;;  %v12673_v49 = vld [vmem:[%s16361_s5 + $0x1684] ss:$8 sps:$4 sm:$0xff]  }
 0x6e8   :  { %8501 = vmatprep.subr.bf16.mxu1 %v12592_v1  ;;  %v12671_v1 = vld [vmem:[%s16361_s5 + $0x1680] ss:$8 sps:$4 sm:$0xff]  }
 0x6eb   :  { %8502 = vmatpush1.bf16.msra.mxu1 %v12590_v60  ;;  %v12676_v60 = vld [vmem:[%s16361_s5 + $0x1694] ss:$8 sps:$4 sm:$0xff]  }
 0x6ec   :  { %8503 = vmatprep.subr.bf16.mxu1 %v12595_v27  ;;  %v12674_v27 = vld [vmem:[%s16361_s5 + $0x1690] ss:$8 sps:$4 sm:$0xff]  }
 0x6ef   :  { %8504 = vmatpush1.bf16.msra.mxu1 %v12593_v56  ;;  %v12767_v56 = vld [vmem:[%s16363_s7] sm:$0xff]  }
 0x6f0   :  { %8505 = vmatprep.subr.bf16.mxu1 %v12598_v33  ;;  %v12679_v33 = vld [vmem:[%s16361_s5 + $0x16a4] ss:$8 sps:$4 sm:$0xff]   ;;  %9628 = vmatpush1.bf16.msra.mxu0 %v12767_v56  ;;  %v12748_v56 = vld [vmem:[%s16361_s5 + $0x1814] ss:$8 sps:$4 sm:$0xff]  }
 0x6f1   :  { %9629 = vmatprep.subr.bf16.mxu0 %v12794_v0 }
 0x6f3   :  { %8506 = vmatpush1.bf16.msra.mxu1 %v12596_v17  ;;  %v12768_v17 = vld [vmem:[%s16363_s7 + $0x8] sm:$0xff]  }
 0x6f4   :  { %8630 = vmatprep.subr.bf16.mxu1 %v12601_v52  ;;  %v12677_v52 = vld [vmem:[%s16361_s5 + $0x16a0] ss:$8 sps:$4 sm:$0xff]   ;;  %9630 = vmatpush1.bf16.msra.mxu0 %v12768_v17  ;;  %v12751_v17 = vld [vmem:[%s16361_s5 + $0x1824] ss:$8 sps:$4 sm:$0xff]  }
 0x6f5   :  { %9631 = vmatprep.subr.bf16.mxu0 %v12794_v0 }
 0x6f6   :  { %8524 = vmatmul.mubr.bf16.vlgmr.msra.gmra.mrb[0].mxu1 %v8409_v57  ;;  %v12769_v57 = vld [vmem:[%s16363_s7 + $0x10] sm:$0xff]  }
 0x6f7   :  { %8631 = vmatpush1.bf16.msra.mxu1 %v12599_v61  ;;  %8662 = vmatprep.mubr.bf16.mxu1 %v12794_v0  ;;  %v12682_v61 = vld [vmem:[%s16361_s5 + $0x16b4] ss:$8 sps:$4 sm:$0xff]  }
 0x6f8   :  { %8632 = vmatprep.subr.bf16.mxu1 %v12604_v58  ;;  %v12680_v58 = vld [vmem:[%s16361_s5 + $0x16b0] ss:$8 sps:$4 sm:$0xff]   ;;  %9632 = vmatpush1.bf16.msra.mxu0 %v12769_v57  ;;  %v12757_v57 = vld [vmem:[%s16361_s5 + $0x1844] ss:$8 sps:$4 sm:$0xff]  }
 0x6f9   :  { %9633 = vmatprep.subr.bf16.mxu0 %v12794_v0 }
 0x6fb   :  { %8633 = vmatpush1.bf16.msra.mxu1 %v12602_v62  ;;  %v12685_v62 = vld [vmem:[%s16361_s5 + $0x16c4] ss:$8 sps:$4 sm:$0xff]  }
 0x6fc   :  { %8634 = vmatprep.subr.bf16.mxu1 %v12607_v50  ;;  %v12770_v50 = vld [vmem:[%s16363_s7 + $0x18] sm:$0xff]  }
 0x6fd   :  { %9634 = vmatpush1.bf16.msra.mxu0 %v12770_v50  ;;  %v12758_v50 = vld [vmem:[%s16361_s5 + $0x1850] ss:$8 sps:$4 sm:$0xff]  }
 0x6fe   :  { %9635 = vmatprep.subr.bf16.mxu0 %v12794_v0 }
 0x6ff   :  { %8635 = vmatpush1.bf16.msra.mxu1 %v12605_v43  ;;  %v12683_v43 = vld [vmem:[%s16361_s5 + $0x16c0] ss:$8 sps:$4 sm:$0xff]  }
 0x700   :  { %8636 = vmatprep.subr.bf16.mxu1 %v12610_v47  ;;  %v12688_v47 = vld [vmem:[%s16361_s5 + $0x16d4] ss:$8 sps:$4 sm:$0xff]  }
 0x703   :  { %8637 = vmatpush1.bf16.msra.mxu1 %v12608_v14  ;;  %v12771_v14 = vld [vmem:[%s16363_s7 + $0x20] sm:$0xff]  }
 0x704   :  { %8638 = vmatprep.subr.bf16.mxu1 %v12613_v45  ;;  %v12686_v45 = vld [vmem:[%s16361_s5 + $0x16d0] ss:$8 sps:$4 sm:$0xff]   ;;  %9636 = vmatpush1.bf16.msra.mxu0 %v12771_v14  ;;  %v12793_v14 = vld [vmem:[%s16362_s4] ss:$0 sm:$0xff] }
 0x705   :  { %9637 = vmatprep.subr.bf16.mxu0 %v12794_v0 }
 0x707   :  { %8639 = vmatpush1.bf16.msra.mxu1 %v12611_v63  ;;  %v12691_v63 = vld [vmem:[%s16361_s5 + $0x16e4] ss:$8 sps:$4 sm:$0xff]  }
 0x708   :  { %8640 = vmatprep.subr.bf16.mxu1 %v12616_v2  ;;  %v12772_v2 = vld [vmem:[%s16363_s7 + $0x28] sm:$0xff]  }
 0x709   :  { %9638 = vmatpush1.bf16.msra.mxu0 %v12772_v2  ;;  %v12764_v2 = vld [vmem:[%s16361_s5 + $0x1870] ss:$8 sps:$4 sm:$0xff]  }
 0x70a   :  { %9639 = vmatprep.subr.bf16.mxu0 %v12794_v0 }
 0x70b   :  { %8641 = vmatpush1.bf16.msra.mxu1 %v12614_v3  ;;  %v12689_v3 = vld [vmem:[%s16361_s5 + $0x16e0] ss:$8 sps:$4 sm:$0xff]  }
 0x70c   :  { %8642 = vmatprep.subr.bf16.mxu1 %v12619_v7  ;;  %v12694_v7 = vld [vmem:[%s16361_s5 + $0x16f4] ss:$8 sps:$4 sm:$0xff]  }
 0x70f   :  { %8643 = vmatpush1.bf16.msra.mxu1 %v12617_v44  ;;  %v12773_v44 = vld [vmem:[%s16363_s7 + $0x30] sm:$0xff]  }
 0x710   :  { %8644 = vmatprep.subr.bf16.mxu1 %v12622_v8  ;;  %v12692_v8 = vld [vmem:[%s16361_s5 + $0x16f0] ss:$8 sps:$4 sm:$0xff]   ;;  %9640 = vmatpush1.bf16.msra.mxu0 %v12773_v44 }
 0x711   :  { %9641 = vmatprep.subr.bf16.mxu0 %v12794_v0  ;;  %v12777_v44 = vld [vmem:[%s16363_s7 + $0x50] sm:$0xff]  }
 0x713   :  { %8645 = vmatpush1.bf16.msra.mxu1 %v12620_v10  ;;  %v12697_v10 = vld [vmem:[%s16361_s5 + $0x1704] ss:$8 sps:$4 sm:$0xff]  }
 0x714   :  { %8772 = vmatprep.subr.bf16.mxu1 %v12625_v37  ;;  %v12774_v37 = vld [vmem:[%s16363_s7 + $0x38] sm:$0xff]  }
 0x715   :  { %9642 = vmatpush1.bf16.msra.mxu0 %v12774_v37 }
 0x716   :  { %8663 = vmatmul.mubr.bf16.vlgmr.msra.gmra.mrb[0].mxu1 %v14347_v16  ;;  %v12653_v16 = vld [vmem:[%s16361_s5 + $0x1620] ss:$8 sps:$4 sm:$0xff]   ;;  %9643 = vmatprep.subr.bf16.mxu0 %v12794_v0 }
 0x717   :  { %8773 = vmatpush1.bf16.msra.mxu1 %v12623_v18  ;;  %8804 = vmatprep.mubr.bf16.mxu1 %v12794_v0  ;;  %v12695_v18 = vld [vmem:[%s16361_s5 + $0x1700] ss:$8 sps:$4 sm:$0xff]  }
 0x718   :  { %8774 = vmatprep.subr.bf16.mxu1 %v12628_v48  ;;  %v8971_v48 = vrot.slane %v14375_v41, 4 }
 0x71b   :  { %8775 = vmatpush1.bf16.msra.mxu1 %v12626_v32  ;;  %v12700_v32 = vld [vmem:[%s16361_s5 + $0x1714] ss:$8 sps:$4 sm:$0xff]  }
 0x71c   :  { %8776 = vmatprep.subr.bf16.mxu1 %v12631_v19  ;;  %v12775_v19 = vld [vmem:[%s16363_s7 + $0x40] sm:$0xff]  }
 0x71d   :  { %9644 = vmatpush1.bf16.msra.mxu0 %v12775_v19 }
 0x71e   :  { %9645 = vmatprep.subr.bf16.mxu0 %v12794_v0 }
 0x71f   :  { %8777 = vmatpush1.bf16.msra.mxu1 %v12629_v55  ;;  %v12698_v55 = vld [vmem:[%s16361_s5 + $0x1710] ss:$8 sps:$4 sm:$0xff]  }
 0x720   :  { %8778 = vmatprep.subr.bf16.mxu1 %v12634_v23  ;;  %v12776_v23 = vld [vmem:[%s16363_s7 + $0x48] sm:$0xff]  }
 0x721   :  { %9646 = vmatpush1.bf16.msra.mxu0 %v12776_v23 }
 0x722   :  { %9647 = vmatprep.subr.bf16.mxu0 %v12794_v0 }
 0x723   :  { %8779 = vmatpush1.bf16.msra.mxu1 %v12632_v59  ;;  %v12701_v59 = vld [vmem:[%s16361_s5 + $0x1720] ss:$8 sps:$4 sm:$0xff]  }
 0x724   :  { %8780 = vmatprep.subr.bf16.mxu1 %v12637_v24  ;;  %v12706_v24 = vld [vmem:[%s16361_s5 + $0x1734] ss:$8 sps:$4 sm:$0xff]  }
 0x725   :  { %9648 = vmatpush1.bf16.msra.mxu0 %v12777_v44 }
 0x726   :  { %9649 = vmatprep.subr.bf16.mxu0 %v12794_v0 }
 0x727   :  { %8781 = vmatpush1.bf16.msra.mxu1 %v12635_v36  ;;  %v12704_v36 = vld [vmem:[%s16361_s5 + $0x1730] ss:$8 sps:$4 sm:$0xff]  }
 0x728   :  { %8782 = vmatprep.subr.bf16.mxu1 %v12640_v25  ;;  %v12709_v25 = vld [vmem:[%s16361_s5 + $0x1744] ss:$8 sps:$4 sm:$0xff]  }
 0x72b   :  { %8783 = vmatpush1.bf16.msra.mxu1 %v12638_v26  ;;  %v12707_v26 = vld [vmem:[%s16361_s5 + $0x1740] ss:$8 sps:$4 sm:$0xff]  }
 0x72c   :  { %8784 = vmatprep.subr.bf16.mxu1 %v12643_v15  ;;  %v12712_v15 = vld [vmem:[%s16361_s5 + $0x1754] ss:$8 sps:$4 sm:$0xff]  }
 0x72f   :  { %8785 = vmatpush1.bf16.msra.mxu1 %v12641_v28  ;;  %v12710_v28 = vld [vmem:[%s16361_s5 + $0x1750] ss:$8 sps:$4 sm:$0xff]  }
 0x730   :  { %8786 = vmatprep.subr.bf16.mxu1 %v12646_v20  ;;  %v12715_v20 = vld [vmem:[%s16361_s5 + $0x1764] ss:$8 sps:$4 sm:$0xff]  }
 0x733   :  { %8787 = vmatpush1.bf16.msra.mxu1 %v12644_v31  ;;  %v12713_v31 = vld [vmem:[%s16361_s5 + $0x1760] ss:$8 sps:$4 sm:$0xff]  }
 0x734   :  { %8911 = vmatprep.subr.bf16.mxu1 %v12649_v39  ;;  %v12718_v39 = vld [vmem:[%s16361_s5 + $0x1774] ss:$8 sps:$4 sm:$0xff]  }
 0x736   :  { %8805 = vmatmul.mubr.bf16.vlgmr.msra.gmra.mrb[0].mxu1 %v8690_v40  ;;  %v12721_v40 = vld [vmem:[%s16361_s5 + $0x1784] ss:$8 sps:$4 sm:$0xff]  }
 0x737   :  { %8912 = vmatpush1.bf16.msra.mxu1 %v12647_v30  ;;  %8943 = vmatprep.mubr.bf16.mxu1 %v12794_v0  ;;  %v12716_v30 = vld [vmem:[%s16361_s5 + $0x1770] ss:$8 sps:$4 sm:$0xff]  }
 0x738   :  { %8913 = vmatprep.subr.bf16.mxu1 %v12652_v34  ;;  %v12719_v34 = vld [vmem:[%s16361_s5 + $0x1780] ss:$8 sps:$4 sm:$0xff]  }
 0x73b   :  { %8914 = vmatpush1.bf16.msra.mxu1 %v12650_v42  ;;  %v12724_v42 = vld [vmem:[%s16361_s5 + $0x1794] ss:$8 sps:$4 sm:$0xff]  }
 0x73c   :  { %8915 = vmatprep.subr.bf16.mxu1 %v12655_v6  ;;  %v12722_v6 = vld [vmem:[%s16361_s5 + $0x1790] ss:$8 sps:$4 sm:$0xff]  }
 0x73f   :  { %8916 = vmatpush1.bf16.msra.mxu1 %v12653_v16  ;;  %v12727_v16 = vld [vmem:[%s16361_s5 + $0x17a4] ss:$8 sps:$4 sm:$0xff]  }
 0x740   :  { %8917 = vmatprep.subr.bf16.mxu1 %v12658_v13  ;;  %v12725_v13 = vld [vmem:[%s16361_s5 + $0x17a0] ss:$8 sps:$4 sm:$0xff]  }
 0x743   :  { %8918 = vmatpush1.bf16.msra.mxu1 %v12656_v46  ;;  %v12730_v46 = vld [vmem:[%s16361_s5 + $0x17b4] ss:$8 sps:$4 sm:$0xff]  }
 0x744   :  { %8919 = vmatprep.subr.bf16.mxu1 %v12661_v5  ;;  %v12728_v5 = vld [vmem:[%s16361_s5 + $0x17b0] ss:$8 sps:$4 sm:$0xff]  }
 0x747   :  { %8920 = vmatpush1.bf16.msra.mxu1 %v12659_v51  ;;  %v12733_v51 = vld [vmem:[%s16361_s5 + $0x17c4] ss:$8 sps:$4 sm:$0xff]  }
 0x748   :  { %8921 = vmatprep.subr.bf16.mxu1 %v12664_v53  ;;  %v12731_v53 = vld [vmem:[%s16361_s5 + $0x17c0] ss:$8 sps:$4 sm:$0xff]  }
 0x74b   :  { %8922 = vmatpush1.bf16.msra.mxu1 %v12662_v22  ;;  %v12736_v22 = vld [vmem:[%s16361_s5 + $0x17d4] ss:$8 sps:$4 sm:$0xff]  }
 0x74c   :  { %8923 = vmatprep.subr.bf16.mxu1 %v12667_v54  ;;  %v12734_v54 = vld [vmem:[%s16361_s5 + $0x17d0] ss:$8 sps:$4 sm:$0xff]  }
 0x74f   :  { %8924 = vmatpush1.bf16.msra.mxu1 %v12665_v12  ;;  %v12739_v12 = vld [vmem:[%s16361_s5 + $0x17e4] ss:$8 sps:$4 sm:$0xff]  }
 0x750   :  { %8925 = vmatprep.subr.bf16.mxu1 %v12670_v11  ;;  %v12737_v11 = vld [vmem:[%s16361_s5 + $0x17e0] ss:$8 sps:$4 sm:$0xff]  }
 0x753   :  { %8926 = vmatpush1.bf16.msra.mxu1 %v12668_v21  ;;  %v12742_v21 = vld [vmem:[%s16361_s5 + $0x17f4] ss:$8 sps:$4 sm:$0xff]  }
 0x754   :  { %9053 = vmatprep.subr.bf16.mxu1 %v12673_v49  ;;  %v12740_v49 = vld [vmem:[%s16361_s5 + $0x17f0] ss:$8 sps:$4 sm:$0xff]  }
 0x756   :  { %8944 = vmatmul.mubr.bf16.vlgmr.msra.gmra.mrb[0].mxu1 %v14375_v41  ;;  %v12703_v41 = vld [vmem:[%s16361_s5 + $0x1724] ss:$8 sps:$4 sm:$0xff]  }
 0x757   :  { %9054 = vmatpush1.bf16.msra.mxu1 %v12671_v1  ;;  %9085 = vmatprep.mubr.bf16.mxu1 %v12794_v0  ;;  %v12745_v1 = vld [vmem:[%s16361_s5 + $0x1804] ss:$8 sps:$4 sm:$0xff]  }
 0x758   :  { %9055 = vmatprep.subr.bf16.mxu1 %v12676_v60  ;;  %v12743_v60 = vld [vmem:[%s16361_s5 + $0x1800] ss:$8 sps:$4 sm:$0xff]  }
 0x75b   :  { %9056 = vmatpush1.bf16.msra.mxu1 %v12674_v27  ;;  %v9252_v27 = vrot.slane %v14406_v35, 4 }
 0x75c   :  { %9057 = vmatprep.subr.bf16.mxu1 %v12679_v33  ;;  %v12746_v33 = vld [vmem:[%s16361_s5 + $0x1810] ss:$8 sps:$4 sm:$0xff]  }
 0x75f   :  { %9058 = vmatpush1.bf16.msra.mxu1 %v12677_v52  ;;  %v12754_v52 = vld [vmem:[%s16361_s5 + $0x1834] ss:$8 sps:$4 sm:$0xff]  }
 0x760   :  { %9059 = vmatprep.subr.bf16.mxu1 %v12682_v61  ;;  %v12752_v61 = vld [vmem:[%s16361_s5 + $0x1830] ss:$8 sps:$4 sm:$0xff]  }
 0x763   :  { %9060 = vmatpush1.bf16.msra.mxu1 %v12680_v58  ;;  %v12755_v58 = vld [vmem:[%s16361_s5 + $0x1840] ss:$8 sps:$4 sm:$0xff]  }
 0x764   :  { %9061 = vmatprep.subr.bf16.mxu1 %v12685_v62  ;;  %v12760_v62 = vld [vmem:[%s16361_s5 + $0x1854] ss:$8 sps:$4 sm:$0xff]  }
 0x767   :  { %9062 = vmatpush1.bf16.msra.mxu1 %v12683_v43  ;;  %v12763_v43 = vld [vmem:[%s16361_s5 + $0x1864] ss:$8 sps:$4 sm:$0xff]  }
 0x768   :  { %9063 = vmatprep.subr.bf16.mxu1 %v12688_v47  ;;  %v12761_v47 = vld [vmem:[%s16361_s5 + $0x1860] ss:$8 sps:$4 sm:$0xff]  }
 0x76b   :  { %9064 = vmatpush1.bf16.msra.mxu1 %v12686_v45  ;;  %v11181_v45 = vadd.f32 %v12793_v14, %v14411_v38  ;;  %v12778_v38 = vld [vmem:[%s16363_s7 + $0x58] ss:$0 sps:$4 sm:$0xff]  }
 0x76c   :  { %9065 = vmatprep.subr.bf16.mxu1 %v12691_v63  ;;  %v12766_v63 = vld [vmem:[%s16361_s5 + $0x1874] ss:$8 sps:$4 sm:$0xff]  }
 0x76f   :  { %9066 = vmatpush1.bf16.msra.mxu1 %v12689_v3  ;;  %v2595_v3 = vmax.f32 %v11181_v45, 0.0 }
 0x770   :  { %9067 = vmatprep.subr.bf16.mxu1 %v12694_v7 }
 0x771   :  { %v2620_v7 = vpack.c.bf16 %v2595_v3, %v2595_v3 }
 0x773   :  { %9068 = vmatpush1.bf16.msra.mxu1 %v12692_v8  ;;  %v9625_v8 = vsel %vm1800_vm2, %v12778_v38, 0 }
 0x774   :  { %9192 = vmatprep.subr.bf16.mxu1 %v12697_v10  ;;  %9650 = vmatpush1.bf16.msra.mxu0 %v9625_v8  ;;  %v2760_v10 = vlaneseq }
 0x775   :  { %11119 = vmatprep.subr.bf16.mxu0 %v12795_v4 }
 0x776   :  { %9086 = vmatmul.mubr.bf16.vlgmr.msra.gmra.mrb[0].mxu1 %v8971_v48  ;;  %v2761_v37 = vshrl.u32 %v2760_v10, 7  ;;  %v2621_v48 = vld [vmem:[%s16365_s6] sm:$0x3] }
 0x777   :  { %9193 = vmatpush1.bf16.msra.mxu1 %v12695_v18  ;;  %9224 = vmatprep.mubr.bf16.mxu1 %v12794_v0 }
 0x778   :  { %9194 = vmatprep.subr.bf16.mxu1 %v12700_v32  ;;  %v2762_v18 = vsub.s32 0, %v2761_v37  ;;  %v2766_v32 = vsub.s32 1, %v2761_v37 }
 0x77a   :  { %v2763_v19 = vrot.slane %v2621_v48, %v2762_v18 }
 0x77b   :  { %9195 = vmatpush1.bf16.msra.mxu1 %v12698_v55  ;;  %v2767_v55 = vrot.slane %v2621_v48, %v2766_v32 }
 0x77c   :  { %9196 = vmatprep.subr.bf16.mxu1 %v12703_v41 }
 0x77d   :  { %v11184_v41 = vadd.f32 %v15464_v9, %v2767_v55  ;;  %v12781_v9 = vld [vmem:[%s16364_s9 + $0x10] sm:$0xff]  }
 0x77f   :  { %9197 = vmatpush1.bf16.msra.mxu1 %v12701_v59 }
 0x780   :  { %9198 = vmatprep.subr.bf16.mxu1 %v12706_v24 }
 0x783   :  { %9199 = vmatpush1.bf16.msra.mxu1 %v12704_v36 }
 0x784   :  { %9200 = vmatprep.subr.bf16.mxu1 %v12709_v25 }
 0x787   :  { %9201 = vmatpush1.bf16.msra.mxu1 %v12707_v26 }
 0x788   :  { %9202 = vmatprep.subr.bf16.mxu1 %v12712_v15 }
 0x78b   :  { %9203 = vmatpush1.bf16.msra.mxu1 %v12710_v28 }
 0x78c   :  { %9204 = vmatprep.subr.bf16.mxu1 %v12715_v20 }
 0x78f   :  { %9205 = vmatpush1.bf16.msra.mxu1 %v12713_v31  ;;  %v12779_v31 = vld [vmem:[%s16364_s9] sm:$0xff]  }
 0x790   :  { %9206 = vmatprep.subr.bf16.mxu1 %v12718_v39 }
 0x793   :  { %9207 = vmatpush1.bf16.msra.mxu1 %v12716_v30  ;;  %v12782_v30 = vld [vmem:[%s16364_s9 + $0x18] sm:$0xff]  }
 0x794   :  { %9334 = vmatprep.subr.bf16.mxu1 %v12721_v40  ;;  %v12783_v40 = vld [vmem:[%s16364_s9 + $0x20] sm:$0xff]  }
 0x796   :  { %9225 = vmatmul.mubr.bf16.vlgmr.msra.gmra.mrb[0].mxu1 %v14406_v35  ;;  %v12749_v35 = vld [vmem:[%s16361_s5 + $0x1820] ss:$8 sps:$4 sm:$0xff]  }
 0x797   :  { %9335 = vmatpush1.bf16.msra.mxu1 %v12719_v34  ;;  %9366 = vmatprep.mubr.bf16.mxu1 %v12794_v0  ;;  %v10679_v34 = vld [vmem:[%s16366_s8] ss:$0 sm:$0xff] }
 0x798   :  { %9336 = vmatprep.subr.bf16.mxu1 %v12724_v42 }
 0x79b   :  { %9337 = vmatpush1.bf16.msra.mxu1 %v12722_v6 }
 0x79c   :  { %9338 = vmatprep.subr.bf16.mxu1 %v12727_v16 }
 0x79f   :  { %9339 = vmatpush1.bf16.msra.mxu1 %v12725_v13 }
 0x7a0   :  { %9340 = vmatprep.subr.bf16.mxu1 %v12730_v46 }
 0x7a3   :  { %9341 = vmatpush1.bf16.msra.mxu1 %v12728_v5 }
 0x7a4   :  { %9342 = vmatprep.subr.bf16.mxu1 %v12733_v51 }
 0x7a7   :  { %9343 = vmatpush1.bf16.msra.mxu1 %v12731_v53  ;;  %v10693_v53 = vld [vmem:[%s16368_s10] ss:$0 sm:$0xff] }
 0x7a8   :  { %9344 = vmatprep.subr.bf16.mxu1 %v12736_v22 }
 0x7ab   :  { %9345 = vmatpush1.bf16.msra.mxu1 %v12734_v54 }
 0x7ac   :  { %9346 = vmatprep.subr.bf16.mxu1 %v12739_v12 }
 0x7af   :  { %9347 = vmatpush1.bf16.msra.mxu1 %v12737_v11  ;;  %v10700_v11 = vld [vmem:[%s16369_s11] ss:$0 sm:$0xff] }
 0x7b0   :  { %9348 = vmatprep.subr.bf16.mxu1 %v12742_v21 }
 0x7b3   :  { %9349 = vmatpush1.bf16.msra.mxu1 %v12740_v49 }
 0x7b4   :  { %9473 = vmatprep.subr.bf16.mxu1 %v12745_v1 }
 0x7b6   :  { %9367 = vmatmul.mubr.bf16.vlgmr.msra.gmra.mrb[0].mxu1 %v9252_v27 }
 0x7b7   :  { %9474 = vmatpush1.bf16.msra.mxu1 %v12743_v60  ;;  %9505 = vmatprep.mubr.bf16.mxu1 %v12794_v0  ;;  %v11182_v0 = vadd.f32 %v15462_v29, %v2763_v19  ;;  %v12780_v29 = vld [vmem:[%s16364_s9 + $0x8] sm:$0xff]  }
 0x7b8   :  { %9475 = vmatprep.subr.bf16.mxu1 %v12748_v56 }
 0x7bb   :  { %9476 = vmatpush1.bf16.msra.mxu1 %v12746_v33 }
 0x7bc   :  { %9477 = vmatprep.subr.bf16.mxu1 %v12751_v17 }
 0x7bf   :  { %9478 = vmatpush1.bf16.msra.mxu1 %v12749_v35 }
 0x7c0   :  { %9479 = vmatprep.subr.bf16.mxu1 %v12754_v52 }
 0x7c3   :  { %9480 = vmatpush1.bf16.msra.mxu1 %v12752_v61 }
 0x7c4   :  { %9481 = vmatprep.subr.bf16.mxu1 %v12757_v57 }
 0x7c7   :  { %9482 = vmatpush1.bf16.msra.mxu1 %v12755_v58 }
 0x7c8   :  { %9483 = vmatprep.subr.bf16.mxu1 %v12760_v62 }
 0x7cb   :  { %9484 = vmatpush1.bf16.msra.mxu1 %v12758_v50 }
 0x7cc   :  { %9485 = vmatprep.subr.bf16.mxu1 %v12763_v43 }
 0x7cf   :  { %9486 = vmatpush1.bf16.msra.mxu1 %v12761_v47 }
 0x7d0   :  { %9487 = vmatprep.subr.bf16.mxu1 %v12766_v63 }
 0x7d3   :  { %9488 = vmatpush1.bf16.msra.mxu1 %v12764_v2 }
 0x7d6   :  { %9506 = vmatmul.mubr.bf16.vlgmr.msra.gmra.mrb[0].mxu1 %v2620_v7 }
 0x8a9   :  { %v9507_v23 = vpop.f32.mrb[0].mxu1 }
 0x8aa   :  { %v11183_v59 = vadd.f32 %v11182_v0, %v9507_v23  ;;  %v9509_v24 = vpop.f32.mrb[1].mxu1 }
 0x8ab   :  { %v11185_v36 = vadd.f32 %v11184_v41, %v9509_v24  ;;  %v9511_v25 = vpop.f32.mrb[2].mxu1 }
 0x8ac   :  { %v9516_v26 = vmax.f32 %v11183_v59, 0.0  ;;  %v9512_v15 = vpop.f32.mrb[3].mxu1 }
 0x8ad   :  { %v9517_v28 = vmax.f32 %v11185_v36, 0.0 }
 0x8ae   :  { %v9518_v39 = vpack.c.bf16 %v9516_v26, %v9516_v26 }
 0x8af   :  { %v9519_v20 = vpack.c.bf16 %v9517_v28, %v9517_v28 }
 0x8b1   :  { %10692 = vmatprep.mubr.msk.bf16.mxu0 %vm9619_vm3, %v9519_v20 }
 0x8b2   :  { %9660 = vmatmul.mubr.bf16.vlgmr.msra.gmra.mrb[104].mxu0 %v9518_v39 }
 0x8b3   :  { %11120 = vmatpush3.bf16.msra.mxu0 %v12779_v31  ;;  %11129 = vmatprep.mubr.msk.bf16.mxu0 %vm12796_vm0, %v12795_v4 }
 0x8b4   :  { %11121 = vmatprep.subr.bf16.mxu0 %v12795_v4 }
 0x8b7   :  { %11122 = vmatpush3.bf16.msra.mxu0 %v12780_v29 }
 0x8b8   :  { %11123 = vmatprep.subr.bf16.mxu0 %v12795_v4 }
 0x8bb   :  { %11124 = vmatpush3.bf16.msra.mxu0 %v12781_v9 }
 0x8bc   :  { %11125 = vmatprep.subr.bf16.mxu0 %v12795_v4 }
 0x8bf   :  { %11126 = vmatpush3.bf16.msra.mxu0 %v12782_v30 }
 0x8c0   :  { %11127 = vmatprep.subr.bf16.mxu0 %v12795_v4  ;;  %v18_v4 = vstv %s16367_s12 }
 0x8c1   :  { %19 = vst [vmem:[#allocation2] sm:$0x1] %v18_v4 }
 0x8c3   :  { %11128 = vmatpush3.bf16.msra.mxu0 %v12783_v40 }
 0x8c8   :  { %v10701_v56 = vld [vmem:[#allocation2] ss:$0 sm:$0xff] }
 0x985   :  { %v9661_v42 = vpop.f32.mrb[104].mxu0 }
 0x986   :  { %v9662_v6 = vadd.f32 %v10679_v34, %v9661_v42  ;;  %v9663_v16 = vpop.f32.mrb[105].mxu0 }
 0x987   :  { %v9664_v13 = vpop.f32.mrb[106].mxu0 }
 0x988   :  { %v9667_v46 = vmax.f32 %v9662_v6, 0.0  ;;  %v9665_v5 = vpop.f32.mrb[107].mxu0 }
 0x98a   :  { %v9668_v51 = vpack.c.bf16 %v9667_v46, %v9667_v46 }
 0x98c   :  { %11130 = vmatmul.mubr.msk.bf16.vlgmr.msra.gmra.mrb[108].mxu0 %vm9716_vm4, %v9668_v51 }
 0xa5f   :  { %v9754_v22 = vpop.f32.mrb[108].mxu0 }
 0xa60   :  { %v9755_v54 = vadd.f32 %v10693_v53, %v9754_v22  ;;  %v11131_v12 = vpop.f32.mrb[109].mxu0 }
 0xa61   :  { %v9757_v21 = vpop.f32.mrb[110].mxu0 }
 0xa62   :  { %v9760_v49 = vmax.f32 %v9755_v54, 0.0  ;;  %v11132_v1 = vpop.f32.mrb[111].mxu0 }
 0xa64   :  { %v9768_v60 = vmul.f32 %v10700_v11, %v9760_v49 }
 0xa66   :  { %v9770_v27 = vsel %vm9769_vm5, %v9768_v60, 0.0 }
 0xa67   :  { %9771 = vadd.xlane.f32.xlu1 %v9770_v27 }
 0xaf4   :  { %v9772_v33 = vpop.xlane.xlu1 %9771 }
 0xaf5   :  { %v9780_v17 = vadd.f32 %v10701_v56, %v9772_v33 }
 0xaf7   :  { %9782 = vst.msk [vmem:[%s16370_s13] sm:$0x3] %vm9781_vm6, %v9780_v17 }

</bundles_post_ra>
